<compile_context>
chip_gen: v5e
topology: v5e:2x2
jax: 0.10.0
libtpu: 0.0.40
codegen_flags: <defaults>
</compile_context>

<pallas_src>
import functools

import numpy as np
import jax
import jax.numpy as jnp
from jax.experimental import pallas as pl
from jax.experimental.pallas import tpu as pltpu


def action_fused_kernel(
    x_ref,        # (C, NL)     f32  input, channel-major; lane = frame*HW + h*W + w
    w_shift_ref,  # (C, 3)      f32  generic temporal-shift taps (unused on one-hot path)
    w_p1_ref,     # (27,)       f32  SMEM: 3x3x3 conv weights flattened (dt, dh, dw)
    a_p2_ref,     # (3R, C)     f32  host-folded [W0;W1;W2] @ w_p2_squeeze
    smat_ref,     # (2, NT, NT) f32  frame -1 / +1 column-selection matrices
    w_p2_ex_ref,  # (C, R)      f32
    w_p3_sq_ref,  # (R, C)      bf16
    bn_g_ref,     # (R, 1)      f32
    bn_b_ref,     # (R, 1)      f32
    w_p3_dw_ref,  # (R, 9)      f32  depthwise 3x3 flattened (dh, dw)
    w_p3_ex_ref,  # (C, R)      f32
    w_net_ref,    # (OC, C)     bf16 wrapped `net` (1x1 conv)
    masks_ref,    # (11, NL)    f32  rows 0..8: combined (dh,dw) spatial masks; 9: t>=1; 10: t<=T-2
    expand_ref,   # (NT, NL)    bf16 frame -> lane one-hot (doubles as pooling matrix)
    o_ref,        # (OC, NL)    f32
    xs_scr,       # (C, NL)     f32  scratch (used only by the one-hot shift path)
    *, HW, W, onehot_fold,
):
    f32 = jnp.float32
    bf16 = jnp.bfloat16

    def roll(arr, d):
        # value at lane i + d (wrap-around; boundary validity handled by the masks)
        if d == 0:
            return arr
        n = arr.shape[-1]
        return pltpu.roll(arr, (-d) % n, 1)

    msk = masks_ref[...]
    m_sp = [msk[k:k + 1] for k in range(9)]        # combined spatial masks, k = dh*3 + dw
    m_tp = msk[9:10]                                # frame t-1 exists within segment
    m_tn = msk[10:11]                               # frame t+1 exists within segment

    # ---- temporal shift (depthwise conv1d over t within each segment, zero pad) ----
    if onehot_fold is not None:
        # Untrained / frozen shift pattern: channel-slice rolls only (sublane-aligned).
        f = onehot_fold
        C = x_ref.shape[0]
        xs_scr[0:f, :] = roll(x_ref[0:f, :], +HW) * m_tn            # "shift left": frame t+1
        xs_scr[f:2 * f, :] = roll(x_ref[f:2 * f, :], -HW) * m_tp    # "shift right": frame t-1
        xs_scr[2 * f:C, :] = x_ref[2 * f:C, :]                      # identity channels
        xs = xs_scr[...]
    else:
        x = x_ref[...]
        xp = roll(x, -HW) * m_tp
        xn = roll(x, +HW) * m_tn
        xs = (w_shift_ref[:, 0:1] * xp
              + w_shift_ref[:, 1:2] * x
              + w_shift_ref[:, 2:3] * xn)

    C = xs.shape[0]
    xs_bf = xs.astype(bf16)
    expand_bf = expand_ref[...]                     # (NT, NL), exact 0/1 in bf16

    # ---- p1: spatio-temporal excitation (channel mean -> 3x3x3 conv, roll-factored) ----
    ones_c = jnp.full((1, C), 1.0 / C, bf16)        # channel mean on the MXU (frees the XLU)
    xm = jnp.dot(ones_c, xs_bf, preferred_element_type=f32)          # (1, NL)
    xm_sp = []
    for k in range(9):                               # 8 spatial rolls + identity
        d = (k // 3 - 1) * W + (k % 3 - 1)
        v = roll(xm, d)
        xm_sp.append(v if k == 4 else v * m_sp[k])
    part = []
    for dt in range(3):                              # 3 per-dt weighted partial sums
        p = xm_sp[0] * w_p1_ref[dt * 9]
        for k in range(1, 9):
            p = p + xm_sp[k] * w_p1_ref[dt * 9 + k]
        part.append(p)
    p1 = roll(part[0], -HW) * m_tp + part[1] + roll(part[2], +HW) * m_tn   # 2 temporal rolls

    # ---- p2: channel excitation (per-frame means; temporal conv folded into squeeze) ----
    pooled = jax.lax.dot_general(                    # (C, NT): contract lanes vs expand
        xs_bf, expand_bf, (((1,), (1,)), ((), ())),
        preferred_element_type=f32) * (1.0 / HW)
    yw = jnp.dot(a_p2_ref[...], pooled, preferred_element_type=f32)   # (3R, NT) = [W0y;W1y;W2y]
    R = a_p2_ref.shape[0] // 3
    z2 = jnp.maximum(
        yw[R:2 * R]
        + jnp.dot(yw[0:R], smat_ref[0], preferred_element_type=f32)   # (W0 y2) shifted to t-1
        + jnp.dot(yw[2 * R:], smat_ref[1], preferred_element_type=f32),  # (W2 y2) shifted to t+1
        0.0)
    g2 = jnp.dot(w_p2_ex_ref[...], z2, preferred_element_type=f32)    # (C, NT)

    # ---- p3: motion excitation (squeeze -> BN(train stats) -> dw3x3 -> frame diff) ----
    x3 = jnp.dot(w_p3_sq_ref[...], xs_bf, preferred_element_type=f32)  # (R, NL)
    mu = jnp.mean(x3, axis=1, keepdims=True)
    var = jnp.mean(jnp.square(x3 - mu), axis=1, keepdims=True)          # biased (train-mode) var
    y_bn = (x3 - mu) * jax.lax.rsqrt(var + 1e-5) * bn_g_ref[...] + bn_b_ref[...]

    conv3 = y_bn * w_p3_dw_ref[:, 4:5]               # center tap: no roll, no mask
    for k in range(9):
        if k == 4:
            continue
        d = (k // 3 - 1) * W + (k % 3 - 1)
        conv3 = conv3 + w_p3_dw_ref[:, k:k + 1] * (roll(y_bn, d) * m_sp[k])
    diff = (roll(conv3, HW) - y_bn) * m_tn           # conv3[t+1] - bn[t]; zero at t = T-1
    pooled3 = jax.lax.dot_general(
        diff.astype(bf16), expand_bf, (((1,), (1,)), ((), ())),
        preferred_element_type=f32) * (1.0 / HW)     # (R, NT)
    g3 = jnp.dot(w_p3_ex_ref[...], pooled3, preferred_element_type=f32)  # (C, NT)

    # ---- fused gating + wrapped net (1x1 conv as one bf16 MXU matmul, f32 accumulate) ----
    # x_p1 + x_p2 + x_p3 == x_shift * (sig(p1) + sig(g2) + sig(g3) + 3)
    gate_fr = jax.nn.sigmoid(g2) + jax.nn.sigmoid(g3)                   # (C, NT), f32
    gate = jnp.dot(gate_fr.astype(bf16), expand_bf,
                   preferred_element_type=f32)                          # (C, NL)
    g = xs * (jax.nn.sigmoid(p1) + gate + 3.0)
    o_ref[...] = jnp.dot(w_net_ref[...], g.astype(bf16),
                         preferred_element_type=f32)                    # (OC, NL)


# ----------------------------- forward wrapper ------------------------------------------

def action_forward(x, params, n_segment=3, onehot_shift_fold=None):
    nt, C, H, W = x.shape
    T = n_segment
    HW = H * W
    NL = nt * HW
    R = C // 16
    OC = params["w_net"].shape[0]
    f32 = jnp.float32
    bf16 = jnp.bfloat16

    # channel-major, lane-dense layout: lanes index (frame, h, w)
    x_cn = jnp.transpose(x, (1, 0, 2, 3)).reshape(C, NL).astype(f32)

    # compile-time-constant masks / selection matrices (tiny, built host-side)
    lane = np.arange(NL)
    frame = lane // HW
    t_idx = frame % T
    hh = (lane % HW) // W
    ww = lane % W
    rows = []
    for dh in range(3):
        for dw in range(3):
            hs, ws = hh + dh - 1, ww + dw - 1
            rows.append((hs >= 0) & (hs < H) & (ws >= 0) & (ws < W))
    rows.append(t_idx >= 1)                                            # frame t-1 exists
    rows.append(t_idx <= T - 2)                                        # frame t+1 exists
    masks = np.stack(rows).astype(np.float32)                          # (11, NL)

    fr = np.arange(nt)
    expand = (fr[:, None] == frame[None, :]).astype(np.float32)        # (nt, NL)
    s_prev = ((fr[:, None] == fr[None, :] - 1)
              & (fr[None, :] % T != 0)).astype(np.float32)             # y @ S_prev -> y[t-1]
    s_next = ((fr[:, None] == fr[None, :] + 1)
              & (fr[:, None] % T != 0)).astype(np.float32)             # y @ S_next -> y[t+1]
    smat = np.stack([s_prev, s_next])                                  # (2, nt, nt)

    # fold the p2 temporal-conv taps into the squeeze weight: [W0;W1;W2] @ Wsq -> (3R, C)
    a_p2 = jnp.dot(params["w_p2_t"].reshape(3 * R, R), params["w_p2_sq"])

    vmem = pl.BlockSpec(memory_space=pltpu.MemorySpace.VMEM)
    smem = pl.BlockSpec(memory_space=pltpu.MemorySpace.SMEM)

    kernel = functools.partial(action_fused_kernel, HW=HW, W=W,
                               onehot_fold=onehot_shift_fold)
    out = pl.pallas_call(
        kernel,
        out_shape=jax.ShapeDtypeStruct((OC, NL), f32),
        in_specs=[vmem, vmem, smem] + [vmem] * 11,
        out_specs=vmem,
        scratch_shapes=[pltpu.VMEM((C, NL), f32)],
    )(
        x_cn,
        params["w_shift"],                           # (C, 3)  (ignored on one-hot path)
        params["w_p1"].reshape(27),                  # (27,)   SMEM scalars
        a_p2,                                        # (3R, C)
        jnp.asarray(smat),                           # (2, nt, nt)
        params["w_p2_ex"],                           # (C, R)
        params["w_p3_sq"].astype(bf16),              # (R, C)   bf16 MXU operand
        params["bn_gamma"],                          # (R, 1)
        params["bn_beta"],                           # (R, 1)
        params["w_p3_dw"].reshape(R, 9),             # (R, 9)
        params["w_p3_ex"],                           # (C, R)
        params["w_net"].astype(bf16),                # (OC, C)  bf16 MXU operand
        jnp.asarray(masks),                          # (11, NL)
        jnp.asarray(expand, dtype=bf16),             # (nt, NL)
    )
    return jnp.transpose(out.reshape(OC, nt, H, W), (1, 0, 2, 3))      # (nt, OC, H, W)


# ----------------------------- helpers / deterministic parameter init -------------------

def detect_onehot_fold(w_shift, shift_div=8):
    """Return `fold` if w_shift is still the one-hot init pattern (and sublane-aligned)."""
    w = np.asarray(w_shift)
    C = w.shape[0]
    fold = C // shift_div
    if fold == 0 or fold % 8 != 0:
        return None
    expect = np.zeros((C, 3), np.float32)
    expect[:fold, 2] = 1.0
    expect[fold:2 * fold, 0] = 1.0
    if 2 * fold < C:
        expect[2 * fold:, 1] = 1.0
    return fold if np.array_equal(w, expect) else None


def init_params(key, C, OC, shift_div=8):
    R = C // 16
    fold = C // shift_div
    ks = jax.random.split(key, 8)

    def uinit(k, shape, fan_in):
        bound = 1.0 / np.sqrt(fan_in)
        return jax.random.uniform(k, shape, jnp.float32, -bound, bound)

    # action_shift: fixed one-hot shift pattern from the PyTorch __init__
    w_shift = np.zeros((C, 3), np.float32)
    w_shift[:fold, 2] = 1.0            # shift left  (uses t+1)
    w_shift[fold:2 * fold, 0] = 1.0    # shift right (uses t-1)
    if 2 * fold < C:
        w_shift[2 * fold:, 1] = 1.0    # identity

    return dict(
        w_shift=jnp.asarray(w_shift),                 # (C, 3)
        w_p1=uinit(ks[0], (3, 3, 3), 27),             # Conv3d(1,1,3,3,3)
        w_p2_sq=uinit(ks[1], (R, C), C),              # 1x1 squeeze
        w_p2_t=uinit(ks[2], (3, R, R), 3 * R),        # conv1d taps [k](out,in)
        w_p2_ex=uinit(ks[3], (C, R), R),              # 1x1 expand
        w_p3_sq=uinit(ks[4], (R, C), C),
        bn_gamma=jnp.ones((R, 1), jnp.float32),
        bn_beta=jnp.zeros((R, 1), jnp.float32),
        w_p3_dw=uinit(ks[5], (R, 3, 3), 9),           # depthwise 3x3
        w_p3_ex=uinit(ks[6], (C, R), R),
        w_net=uinit(ks[7], (OC, C), C),               # wrapped net: 1x1 Conv2d(C->OC)
    )


if __name__ == "__main__":
    key = jax.random.PRNGKey(0)
    k_x, k_p = jax.random.split(key)

    n_segment = 3
    n_batch, C, H, W = 2, 64, 8, 8       # C must be a multiple of 16 (reduced_channels = C//16)
    OC = 128
    nt = n_batch * n_segment

    x = jax.random.normal(k_x, (nt, C, H, W), jnp.float32)
    params = init_params(k_p, C, OC)

    # static dispatch: untrained / frozen one-hot shift weights take the fast path
    onehot_fold = detect_onehot_fold(params["w_shift"])

    fwd = jax.jit(functools.partial(action_forward, n_segment=n_segment,
                                    onehot_shift_fold=onehot_fold))
    out = fwd(x, params)
    jax.block_until_ready(out)
    assert out.shape == (nt, OC, H, W) and out.dtype == jnp.float32
    print("KERNEL_OK")
</pallas_src>

<mosaic_0001>
module attributes {stable_mosaic.version = 11 : i64} {
  func.func @action_fused_kernel(%arg0: memref<64x384xf32, #tpu.memory_space<vmem>>, %arg1: memref<64x3xf32, #tpu.memory_space<vmem>>, %arg2: memref<27xf32, #tpu.memory_space<smem>>, %arg3: memref<12x64xf32, #tpu.memory_space<vmem>>, %arg4: memref<2x6x6xf32, #tpu.memory_space<vmem>>, %arg5: memref<64x4xf32, #tpu.memory_space<vmem>>, %arg6: memref<4x64xbf16, #tpu.memory_space<vmem>>, %arg7: memref<4x1xf32, #tpu.memory_space<vmem>>, %arg8: memref<4x1xf32, #tpu.memory_space<vmem>>, %arg9: memref<4x9xf32, #tpu.memory_space<vmem>>, %arg10: memref<64x4xf32, #tpu.memory_space<vmem>>, %arg11: memref<128x64xbf16, #tpu.memory_space<vmem>>, %arg12: memref<11x384xf32, #tpu.memory_space<vmem>>, %arg13: memref<6x384xbf16, #tpu.memory_space<vmem>>, %arg14: memref<128x384xf32, #tpu.memory_space<vmem>>, %arg15: memref<64x384xf32, #tpu.memory_space<vmem>>) attributes {dimension_semantics = [], scalar_prefetch = 0 : i64, scratch_operands = 1 : i64, tpu.core_type = #tpu.core_type<tc>} {
    %c0 = arith.constant 0 : index
    %c0_0 = arith.constant 0 : index
    %0 = vector.load %arg12[%c0, %c0_0] : memref<11x384xf32, #tpu.memory_space<vmem>>, vector<11x384xf32>
    %1 = vector.extract_strided_slice %0 {offsets = [0, 0], sizes = [1, 384], strides = [1, 1]} : vector<11x384xf32> to vector<1x384xf32>
    %2 = vector.extract_strided_slice %0 {offsets = [1, 0], sizes = [1, 384], strides = [1, 1]} : vector<11x384xf32> to vector<1x384xf32>
    %3 = vector.extract_strided_slice %0 {offsets = [2, 0], sizes = [1, 384], strides = [1, 1]} : vector<11x384xf32> to vector<1x384xf32>
    %4 = vector.extract_strided_slice %0 {offsets = [3, 0], sizes = [1, 384], strides = [1, 1]} : vector<11x384xf32> to vector<1x384xf32>
    %5 = vector.extract_strided_slice %0 {offsets = [5, 0], sizes = [1, 384], strides = [1, 1]} : vector<11x384xf32> to vector<1x384xf32>
    %6 = vector.extract_strided_slice %0 {offsets = [6, 0], sizes = [1, 384], strides = [1, 1]} : vector<11x384xf32> to vector<1x384xf32>
    %7 = vector.extract_strided_slice %0 {offsets = [7, 0], sizes = [1, 384], strides = [1, 1]} : vector<11x384xf32> to vector<1x384xf32>
    %8 = vector.extract_strided_slice %0 {offsets = [8, 0], sizes = [1, 384], strides = [1, 1]} : vector<11x384xf32> to vector<1x384xf32>
    %9 = vector.extract_strided_slice %0 {offsets = [9, 0], sizes = [1, 384], strides = [1, 1]} : vector<11x384xf32> to vector<1x384xf32>
    %10 = vector.extract_strided_slice %0 {offsets = [10, 0], sizes = [1, 384], strides = [1, 1]} : vector<11x384xf32> to vector<1x384xf32>
    %c0_1 = arith.constant 0 : index
    %c0_2 = arith.constant 0 : index
    %11 = vector.load %arg0[%c0_1, %c0_2] : memref<64x384xf32, #tpu.memory_space<vmem>>, vector<8x384xf32>
    %c320_i32 = arith.constant 320 : i32
    %12 = tpu.dynamic_rotate %11 by %c320_i32 dim 1 : vector<8x384xf32>, i32 -> vector<8x384xf32>
    %13 = vector.broadcast %10 : vector<1x384xf32> to vector<8x384xf32>
    %14 = arith.mulf %12, %13 : vector<8x384xf32>
    %c0_3 = arith.constant 0 : index
    %c0_4 = arith.constant 0 : index
    %15 = vector.load %arg15[%c0_3, %c0_4] : memref<64x384xf32, #tpu.memory_space<vmem>>, vector<8x384xf32>
    tpu.vector_store %arg15[%c0_3, %c0_4], %14 {strides = array<i32>} : memref<64x384xf32, #tpu.memory_space<vmem>>, vector<8x384xf32>,
    %c8 = arith.constant 8 : index
    %c0_5 = arith.constant 0 : index
    %16 = vector.load %arg0[%c8, %c0_5] : memref<64x384xf32, #tpu.memory_space<vmem>>, vector<8x384xf32>
    %c64_i32 = arith.constant 64 : i32
    %17 = tpu.dynamic_rotate %16 by %c64_i32 dim 1 : vector<8x384xf32>, i32 -> vector<8x384xf32>
    %18 = vector.broadcast %9 : vector<1x384xf32> to vector<8x384xf32>
    %19 = arith.mulf %17, %18 : vector<8x384xf32>
    %c8_6 = arith.constant 8 : index
    %c0_7 = arith.constant 0 : index
    %20 = vector.load %arg15[%c8_6, %c0_7] : memref<64x384xf32, #tpu.memory_space<vmem>>, vector<8x384xf32>
    tpu.vector_store %arg15[%c8_6, %c0_7], %19 {strides = array<i32>} : memref<64x384xf32, #tpu.memory_space<vmem>>, vector<8x384xf32>,
    %c16 = arith.constant 16 : index
    %c0_8 = arith.constant 0 : index
    %21 = vector.load %arg0[%c16, %c0_8] : memref<64x384xf32, #tpu.memory_space<vmem>>, vector<48x384xf32>
    %c16_9 = arith.constant 16 : index
    %c0_10 = arith.constant 0 : index
    %22 = vector.load %arg15[%c16_9, %c0_10] : memref<64x384xf32, #tpu.memory_space<vmem>>, vector<48x384xf32>
    tpu.vector_store %arg15[%c16_9, %c0_10], %21 {strides = array<i32>} : memref<64x384xf32, #tpu.memory_space<vmem>>, vector<48x384xf32>,
    %c0_11 = arith.constant 0 : index
    %c0_12 = arith.constant 0 : index
    %23 = vector.load %arg15[%c0_11, %c0_12] : memref<64x384xf32, #tpu.memory_space<vmem>>, vector<64x384xf32>
    %24 = arith.truncf %23 : vector<64x384xf32> to vector<64x384xbf16>
    %c0_13 = arith.constant 0 : index
    %c0_14 = arith.constant 0 : index
    %25 = vector.load %arg13[%c0_13, %c0_14] : memref<6x384xbf16, #tpu.memory_space<vmem>>, vector<6x384xbf16>
    %cst = arith.constant 1.562500e-02 : bf16
    %26 = vector.broadcast %cst : bf16 to vector<1x64xbf16>
    %cst_15 = arith.constant dense<0.000000e+00> : vector<1x384xf32>
    %27 = tpu.matmul %26, %24, %cst_15 {dimension_numbers = #tpu.dot_dimension_numbers<[1], [0], [0], [1], [0, 0, 1, 1], [], []>} : vector<1x64xbf16>, vector<64x384xbf16>, vector<1x384xf32> -> vector<1x384xf32>
    %c9_i32 = arith.constant 9 : i32
    %28 = tpu.dynamic_rotate %27 by %c9_i32 dim 1 : vector<1x384xf32>, i32 -> vector<1x384xf32>
    %29 = arith.mulf %28, %1 : vector<1x384xf32>
    %c8_i32 = arith.constant 8 : i32
    %30 = tpu.dynamic_rotate %27 by %c8_i32 dim 1 : vector<1x384xf32>, i32 -> vector<1x384xf32>
    %31 = arith.mulf %30, %2 : vector<1x384xf32>
    %c7_i32 = arith.constant 7 : i32
    %32 = tpu.dynamic_rotate %27 by %c7_i32 dim 1 : vector<1x384xf32>, i32 -> vector<1x384xf32>
    %33 = arith.mulf %32, %3 : vector<1x384xf32>
    %c1_i32 = arith.constant 1 : i32
    %34 = tpu.dynamic_rotate %27 by %c1_i32 dim 1 : vector<1x384xf32>, i32 -> vector<1x384xf32>
    %35 = arith.mulf %34, %4 : vector<1x384xf32>
    %c383_i32 = arith.constant 383 : i32
    %36 = tpu.dynamic_rotate %27 by %c383_i32 dim 1 : vector<1x384xf32>, i32 -> vector<1x384xf32>
    %37 = arith.mulf %36, %5 : vector<1x384xf32>
    %c377_i32 = arith.constant 377 : i32
    %38 = tpu.dynamic_rotate %27 by %c377_i32 dim 1 : vector<1x384xf32>, i32 -> vector<1x384xf32>
    %39 = arith.mulf %38, %6 : vector<1x384xf32>
    %c376_i32 = arith.constant 376 : i32
    %40 = tpu.dynamic_rotate %27 by %c376_i32 dim 1 : vector<1x384xf32>, i32 -> vector<1x384xf32>
    %41 = arith.mulf %40, %7 : vector<1x384xf32>
    %c375_i32 = arith.constant 375 : i32
    %42 = tpu.dynamic_rotate %27 by %c375_i32 dim 1 : vector<1x384xf32>, i32 -> vector<1x384xf32>
    %43 = arith.mulf %42, %8 : vector<1x384xf32>
    %c0_16 = arith.constant 0 : index
    %44 = memref.load %arg2[%c0_16] : memref<27xf32, #tpu.memory_space<smem>>
    %45 = vector.broadcast %44 : f32 to vector<1x384xf32>
    %46 = arith.mulf %29, %45 : vector<1x384xf32>
    %c1 = arith.constant 1 : index
    %47 = memref.load %arg2[%c1] : memref<27xf32, #tpu.memory_space<smem>>
    %48 = vector.broadcast %47 : f32 to vector<1x384xf32>
    %49 = arith.mulf %31, %48 : vector<1x384xf32>
    %50 = arith.addf %46, %49 : vector<1x384xf32>
    %c2 = arith.constant 2 : index
    %51 = memref.load %arg2[%c2] : memref<27xf32, #tpu.memory_space<smem>>
    %52 = vector.broadcast %51 : f32 to vector<1x384xf32>
    %53 = arith.mulf %33, %52 : vector<1x384xf32>
    %54 = arith.addf %50, %53 : vector<1x384xf32>
    %c3 = arith.constant 3 : index
    %55 = memref.load %arg2[%c3] : memref<27xf32, #tpu.memory_space<smem>>
    %56 = vector.broadcast %55 : f32 to vector<1x384xf32>
    %57 = arith.mulf %35, %56 : vector<1x384xf32>
    %58 = arith.addf %54, %57 : vector<1x384xf32>
    %c4 = arith.constant 4 : index
    %59 = memref.load %arg2[%c4] : memref<27xf32, #tpu.memory_space<smem>>
    %60 = vector.broadcast %59 : f32 to vector<1x384xf32>
    %61 = arith.mulf %27, %60 : vector<1x384xf32>
    %62 = arith.addf %58, %61 : vector<1x384xf32>
    %c5 = arith.constant 5 : index
    %63 = memref.load %arg2[%c5] : memref<27xf32, #tpu.memory_space<smem>>
    %64 = vector.broadcast %63 : f32 to vector<1x384xf32>
    %65 = arith.mulf %37, %64 : vector<1x384xf32>
    %66 = arith.addf %62, %65 : vector<1x384xf32>
    %c6 = arith.constant 6 : index
    %67 = memref.load %arg2[%c6] : memref<27xf32, #tpu.memory_space<smem>>
    %68 = vector.broadcast %67 : f32 to vector<1x384xf32>
    %69 = arith.mulf %39, %68 : vector<1x384xf32>
    %70 = arith.addf %66, %69 : vector<1x384xf32>
    %c7 = arith.constant 7 : index
    %71 = memref.load %arg2[%c7] : memref<27xf32, #tpu.memory_space<smem>>
    %72 = vector.broadcast %71 : f32 to vector<1x384xf32>
    %73 = arith.mulf %41, %72 : vector<1x384xf32>
    %74 = arith.addf %70, %73 : vector<1x384xf32>
    %c8_17 = arith.constant 8 : index
    %75 = memref.load %arg2[%c8_17] : memref<27xf32, #tpu.memory_space<smem>>
    %76 = vector.broadcast %75 : f32 to vector<1x384xf32>
    %77 = arith.mulf %43, %76 : vector<1x384xf32>
    %78 = arith.addf %74, %77 : vector<1x384xf32>
    %c9 = arith.constant 9 : index
    %79 = memref.load %arg2[%c9] : memref<27xf32, #tpu.memory_space<smem>>
    %80 = vector.broadcast %79 : f32 to vector<1x384xf32>
    %81 = arith.mulf %29, %80 : vector<1x384xf32>
    %c10 = arith.constant 10 : index
    %82 = memref.load %arg2[%c10] : memref<27xf32, #tpu.memory_space<smem>>
    %83 = vector.broadcast %82 : f32 to vector<1x384xf32>
    %84 = arith.mulf %31, %83 : vector<1x384xf32>
    %85 = arith.addf %81, %84 : vector<1x384xf32>
    %c11 = arith.constant 11 : index
    %86 = memref.load %arg2[%c11] : memref<27xf32, #tpu.memory_space<smem>>
    %87 = vector.broadcast %86 : f32 to vector<1x384xf32>
    %88 = arith.mulf %33, %87 : vector<1x384xf32>
    %89 = arith.addf %85, %88 : vector<1x384xf32>
    %c12 = arith.constant 12 : index
    %90 = memref.load %arg2[%c12] : memref<27xf32, #tpu.memory_space<smem>>
    %91 = vector.broadcast %90 : f32 to vector<1x384xf32>
    %92 = arith.mulf %35, %91 : vector<1x384xf32>
    %93 = arith.addf %89, %92 : vector<1x384xf32>
    %c13 = arith.constant 13 : index
    %94 = memref.load %arg2[%c13] : memref<27xf32, #tpu.memory_space<smem>>
    %95 = vector.broadcast %94 : f32 to vector<1x384xf32>
    %96 = arith.mulf %27, %95 : vector<1x384xf32>
    %97 = arith.addf %93, %96 : vector<1x384xf32>
    %c14 = arith.constant 14 : index
    %98 = memref.load %arg2[%c14] : memref<27xf32, #tpu.memory_space<smem>>
    %99 = vector.broadcast %98 : f32 to vector<1x384xf32>
    %100 = arith.mulf %37, %99 : vector<1x384xf32>
    %101 = arith.addf %97, %100 : vector<1x384xf32>
    %c15 = arith.constant 15 : index
    %102 = memref.load %arg2[%c15] : memref<27xf32, #tpu.memory_space<smem>>
    %103 = vector.broadcast %102 : f32 to vector<1x384xf32>
    %104 = arith.mulf %39, %103 : vector<1x384xf32>
    %105 = arith.addf %101, %104 : vector<1x384xf32>
    %c16_18 = arith.constant 16 : index
    %106 = memref.load %arg2[%c16_18] : memref<27xf32, #tpu.memory_space<smem>>
    %107 = vector.broadcast %106 : f32 to vector<1x384xf32>
    %108 = arith.mulf %41, %107 : vector<1x384xf32>
    %109 = arith.addf %105, %108 : vector<1x384xf32>
    %c17 = arith.constant 17 : index
    %110 = memref.load %arg2[%c17] : memref<27xf32, #tpu.memory_space<smem>>
    %111 = vector.broadcast %110 : f32 to vector<1x384xf32>
    %112 = arith.mulf %43, %111 : vector<1x384xf32>
    %113 = arith.addf %109, %112 : vector<1x384xf32>
    %c18 = arith.constant 18 : index
    %114 = memref.load %arg2[%c18] : memref<27xf32, #tpu.memory_space<smem>>
    %115 = vector.broadcast %114 : f32 to vector<1x384xf32>
    %116 = arith.mulf %29, %115 : vector<1x384xf32>
    %c19 = arith.constant 19 : index
    %117 = memref.load %arg2[%c19] : memref<27xf32, #tpu.memory_space<smem>>
    %118 = vector.broadcast %117 : f32 to vector<1x384xf32>
    %119 = arith.mulf %31, %118 : vector<1x384xf32>
    %120 = arith.addf %116, %119 : vector<1x384xf32>
    %c20 = arith.constant 20 : index
    %121 = memref.load %arg2[%c20] : memref<27xf32, #tpu.memory_space<smem>>
    %122 = vector.broadcast %121 : f32 to vector<1x384xf32>
    %123 = arith.mulf %33, %122 : vector<1x384xf32>
    %124 = arith.addf %120, %123 : vector<1x384xf32>
    %c21 = arith.constant 21 : index
    %125 = memref.load %arg2[%c21] : memref<27xf32, #tpu.memory_space<smem>>
    %126 = vector.broadcast %125 : f32 to vector<1x384xf32>
    %127 = arith.mulf %35, %126 : vector<1x384xf32>
    %128 = arith.addf %124, %127 : vector<1x384xf32>
    %c22 = arith.constant 22 : index
    %129 = memref.load %arg2[%c22] : memref<27xf32, #tpu.memory_space<smem>>
    %130 = vector.broadcast %129 : f32 to vector<1x384xf32>
    %131 = arith.mulf %27, %130 : vector<1x384xf32>
    %132 = arith.addf %128, %131 : vector<1x384xf32>
    %c23 = arith.constant 23 : index
    %133 = memref.load %arg2[%c23] : memref<27xf32, #tpu.memory_space<smem>>
    %134 = vector.broadcast %133 : f32 to vector<1x384xf32>
    %135 = arith.mulf %37, %134 : vector<1x384xf32>
    %136 = arith.addf %132, %135 : vector<1x384xf32>
    %c24 = arith.constant 24 : index
    %137 = memref.load %arg2[%c24] : memref<27xf32, #tpu.memory_space<smem>>
    %138 = vector.broadcast %137 : f32 to vector<1x384xf32>
    %139 = arith.mulf %39, %138 : vector<1x384xf32>
    %140 = arith.addf %136, %139 : vector<1x384xf32>
    %c25 = arith.constant 25 : index
    %141 = memref.load %arg2[%c25] : memref<27xf32, #tpu.memory_space<smem>>
    %142 = vector.broadcast %141 : f32 to vector<1x384xf32>
    %143 = arith.mulf %41, %142 : vector<1x384xf32>
    %144 = arith.addf %140, %143 : vector<1x384xf32>
    %c26 = arith.constant 26 : index
    %145 = memref.load %arg2[%c26] : memref<27xf32, #tpu.memory_space<smem>>
    %146 = vector.broadcast %145 : f32 to vector<1x384xf32>
    %147 = arith.mulf %43, %146 : vector<1x384xf32>
    %148 = arith.addf %144, %147 : vector<1x384xf32>
    %c64_i32_19 = arith.constant 64 : i32
    %149 = tpu.dynamic_rotate %78 by %c64_i32_19 dim 1 : vector<1x384xf32>, i32 -> vector<1x384xf32>
    %150 = arith.mulf %149, %9 : vector<1x384xf32>
    %151 = arith.addf %150, %113 : vector<1x384xf32>
    %c320_i32_20 = arith.constant 320 : i32
    %152 = tpu.dynamic_rotate %148 by %c320_i32_20 dim 1 : vector<1x384xf32>, i32 -> vector<1x384xf32>
    %153 = arith.mulf %152, %10 : vector<1x384xf32>
    %154 = arith.addf %151, %153 : vector<1x384xf32>
    %cst_21 = arith.constant dense<0.000000e+00> : vector<64x6xf32>
    %155 = tpu.matmul %24, %25, %cst_21 {dimension_numbers = #tpu.dot_dimension_numbers<[1], [1], [0], [0], [0, 0, 1, 0], [], []>} : vector<64x384xbf16>, vector<6x384xbf16>, vector<64x6xf32> -> vector<64x6xf32>
    %cst_22 = arith.constant 1.562500e-02 : f32
    %156 = vector.broadcast %cst_22 : f32 to vector<64x6xf32>
    %157 = arith.mulf %155, %156 : vector<64x6xf32>
    %c0_23 = arith.constant 0 : index
    %c0_24 = arith.constant 0 : index
    %158 = vector.load %arg3[%c0_23, %c0_24] : memref<12x64xf32, #tpu.memory_space<vmem>>, vector<12x64xf32>
    %cst_25 = arith.constant dense<0.000000e+00> : vector<12x6xf32>
    %159 = tpu.matmul %158, %157, %cst_25 {dimension_numbers = #tpu.dot_dimension_numbers<[1], [0], [0], [1], [0, 0, 1, 1], [], []>} : vector<12x64xf32>, vector<64x6xf32>, vector<12x6xf32> -> vector<12x6xf32>
    %160 = vector.extract_strided_slice %159 {offsets = [4, 0], sizes = [4, 6], strides = [1, 1]} : vector<12x6xf32> to vector<4x6xf32>
    %161 = vector.extract_strided_slice %159 {offsets = [0, 0], sizes = [4, 6], strides = [1, 1]} : vector<12x6xf32> to vector<4x6xf32>
    %c0_26 = arith.constant 0 : index
    %c0_27 = arith.constant 0 : index
    %c0_28 = arith.constant 0 : index
    %162 = vector.load %arg4[%c0_26, %c0_27, %c0_28] : memref<2x6x6xf32, #tpu.memory_space<vmem>>, vector<1x6x6xf32>
    %163 = vector.shape_cast %162 : vector<1x6x6xf32> to vector<6x6xf32>
    %cst_29 = arith.constant dense<0.000000e+00> : vector<4x6xf32>
    %164 = tpu.matmul %161, %163, %cst_29 {dimension_numbers = #tpu.dot_dimension_numbers<[1], [0], [0], [1], [0, 0, 1, 1], [], []>} : vector<4x6xf32>, vector<6x6xf32>, vector<4x6xf32> -> vector<4x6xf32>
    %165 = arith.addf %160, %164 : vector<4x6xf32>
    %166 = vector.extract_strided_slice %159 {offsets = [8, 0], sizes = [4, 6], strides = [1, 1]} : vector<12x6xf32> to vector<4x6xf32>
    %c1_30 = arith.constant 1 : index
    %c0_31 = arith.constant 0 : index
    %c0_32 = arith.constant 0 : index
    %167 = vector.load %arg4[%c1_30, %c0_31, %c0_32] : memref<2x6x6xf32, #tpu.memory_space<vmem>>, vector<1x6x6xf32>
    %168 = vector.shape_cast %167 : vector<1x6x6xf32> to vector<6x6xf32>
    %cst_33 = arith.constant dense<0.000000e+00> : vector<4x6xf32>
    %169 = tpu.matmul %166, %168, %cst_33 {dimension_numbers = #tpu.dot_dimension_numbers<[1], [0], [0], [1], [0, 0, 1, 1], [], []>} : vector<4x6xf32>, vector<6x6xf32>, vector<4x6xf32> -> vector<4x6xf32>
    %170 = arith.addf %165, %169 : vector<4x6xf32>
    %cst_34 = arith.constant 0.000000e+00 : f32
    %171 = vector.broadcast %cst_34 : f32 to vector<4x6xf32>
    %172 = arith.maximumf %170, %171 : vector<4x6xf32>
    %c0_35 = arith.constant 0 : index
    %c0_36 = arith.constant 0 : index
    %173 = vector.load %arg5[%c0_35, %c0_36] : memref<64x4xf32, #tpu.memory_space<vmem>>, vector<64x4xf32>
    %cst_37 = arith.constant dense<0.000000e+00> : vector<64x6xf32>
    %174 = tpu.matmul %173, %172, %cst_37 {dimension_numbers = #tpu.dot_dimension_numbers<[1], [0], [0], [1], [0, 0, 1, 1], [], []>} : vector<64x4xf32>, vector<4x6xf32>, vector<64x6xf32> -> vector<64x6xf32>
    %c0_38 = arith.constant 0 : index
    %c0_39 = arith.constant 0 : index
    %175 = vector.load %arg6[%c0_38, %c0_39] : memref<4x64xbf16, #tpu.memory_space<vmem>>, vector<4x64xbf16>
    %cst_40 = arith.constant dense<0.000000e+00> : vector<4x384xf32>
    %176 = tpu.matmul %175, %24, %cst_40 {dimension_numbers = #tpu.dot_dimension_numbers<[1], [0], [0], [1], [0, 0, 1, 1], [], []>} : vector<4x64xbf16>, vector<64x384xbf16>, vector<4x384xf32> -> vector<4x384xf32>
    %cst_41 = arith.constant dense<0.000000e+00> : vector<4xf32>
    %177 = vector.multi_reduction <add>, %176, %cst_41 [1] : vector<4x384xf32> to vector<4xf32>
    %178 = vector.shape_cast %177 : vector<4xf32> to vector<4x1xf32>
    %cst_42 = arith.constant 3.840000e+02 : f32
    %179 = vector.broadcast %cst_42 : f32 to vector<4x1xf32>
    %180 = arith.divf %178, %179 : vector<4x1xf32>
    %181 = vector.broadcast %180 : vector<4x1xf32> to vector<4x384xf32>
    %182 = arith.subf %176, %181 : vector<4x384xf32>
    %183 = arith.mulf %182, %182 : vector<4x384xf32>
    %cst_43 = arith.constant dense<0.000000e+00> : vector<4xf32>
    %184 = vector.multi_reduction <add>, %183, %cst_43 [1] : vector<4x384xf32> to vector<4xf32>
    %185 = vector.shape_cast %184 : vector<4xf32> to vector<4x1xf32>
    %cst_44 = arith.constant 3.840000e+02 : f32
    %186 = vector.broadcast %cst_44 : f32 to vector<4x1xf32>
    %187 = arith.divf %185, %186 : vector<4x1xf32>
    %188 = vector.broadcast %180 : vector<4x1xf32> to vector<4x384xf32>
    %189 = arith.subf %176, %188 : vector<4x384xf32>
    %cst_45 = arith.constant 9.99999974E-6 : f32
    %190 = vector.broadcast %cst_45 : f32 to vector<4x1xf32>
    %191 = arith.addf %187, %190 : vector<4x1xf32>
    %192 = math.rsqrt %191 : vector<4x1xf32>
    %193 = vector.broadcast %192 : vector<4x1xf32> to vector<4x384xf32>
    %194 = arith.mulf %189, %193 : vector<4x384xf32>
    %c0_46 = arith.constant 0 : index
    %c0_47 = arith.constant 0 : index
    %195 = vector.load %arg7[%c0_46, %c0_47] : memref<4x1xf32, #tpu.memory_space<vmem>>, vector<4x1xf32>
    %196 = vector.broadcast %195 : vector<4x1xf32> to vector<4x384xf32>
    %197 = arith.mulf %194, %196 : vector<4x384xf32>
    %c0_48 = arith.constant 0 : index
    %c0_49 = arith.constant 0 : index
    %198 = vector.load %arg8[%c0_48, %c0_49] : memref<4x1xf32, #tpu.memory_space<vmem>>, vector<4x1xf32>
    %199 = vector.broadcast %198 : vector<4x1xf32> to vector<4x384xf32>
    %200 = arith.addf %197, %199 : vector<4x384xf32>
    %c0_50 = arith.constant 0 : index
    %c4_51 = arith.constant 4 : index
    %201 = vector.load %arg9[%c0_50, %c4_51] : memref<4x9xf32, #tpu.memory_space<vmem>>, vector<4x1xf32>
    %202 = vector.broadcast %201 : vector<4x1xf32> to vector<4x384xf32>
    %203 = arith.mulf %200, %202 : vector<4x384xf32>
    %c0_52 = arith.constant 0 : index
    %c0_53 = arith.constant 0 : index
    %204 = vector.load %arg9[%c0_52, %c0_53] : memref<4x9xf32, #tpu.memory_space<vmem>>, vector<4x1xf32>
    %c9_i32_54 = arith.constant 9 : i32
    %205 = tpu.dynamic_rotate %200 by %c9_i32_54 dim 1 : vector<4x384xf32>, i32 -> vector<4x384xf32>
    %206 = vector.broadcast %1 : vector<1x384xf32> to vector<4x384xf32>
    %207 = arith.mulf %205, %206 : vector<4x384xf32>
    %208 = vector.broadcast %204 : vector<4x1xf32> to vector<4x384xf32>
    %209 = arith.mulf %208, %207 : vector<4x384xf32>
    %210 = arith.addf %203, %209 : vector<4x384xf32>
    %c0_55 = arith.constant 0 : index
    %c1_56 = arith.constant 1 : index
    %211 = vector.load %arg9[%c0_55, %c1_56] : memref<4x9xf32, #tpu.memory_space<vmem>>, vector<4x1xf32>
    %c8_i32_57 = arith.constant 8 : i32
    %212 = tpu.dynamic_rotate %200 by %c8_i32_57 dim 1 : vector<4x384xf32>, i32 -> vector<4x384xf32>
    %213 = vector.broadcast %2 : vector<1x384xf32> to vector<4x384xf32>
    %214 = arith.mulf %212, %213 : vector<4x384xf32>
    %215 = vector.broadcast %211 : vector<4x1xf32> to vector<4x384xf32>
    %216 = arith.mulf %215, %214 : vector<4x384xf32>
    %217 = arith.addf %210, %216 : vector<4x384xf32>
    %c0_58 = arith.constant 0 : index
    %c2_59 = arith.constant 2 : index
    %218 = vector.load %arg9[%c0_58, %c2_59] : memref<4x9xf32, #tpu.memory_space<vmem>>, vector<4x1xf32>
    %c7_i32_60 = arith.constant 7 : i32
    %219 = tpu.dynamic_rotate %200 by %c7_i32_60 dim 1 : vector<4x384xf32>, i32 -> vector<4x384xf32>
    %220 = vector.broadcast %3 : vector<1x384xf32> to vector<4x384xf32>
    %221 = arith.mulf %219, %220 : vector<4x384xf32>
    %222 = vector.broadcast %218 : vector<4x1xf32> to vector<4x384xf32>
    %223 = arith.mulf %222, %221 : vector<4x384xf32>
    %224 = arith.addf %217, %223 : vector<4x384xf32>
    %c0_61 = arith.constant 0 : index
    %c3_62 = arith.constant 3 : index
    %225 = vector.load %arg9[%c0_61, %c3_62] : memref<4x9xf32, #tpu.memory_space<vmem>>, vector<4x1xf32>
    %c1_i32_63 = arith.constant 1 : i32
    %226 = tpu.dynamic_rotate %200 by %c1_i32_63 dim 1 : vector<4x384xf32>, i32 -> vector<4x384xf32>
    %227 = vector.broadcast %4 : vector<1x384xf32> to vector<4x384xf32>
    %228 = arith.mulf %226, %227 : vector<4x384xf32>
    %229 = vector.broadcast %225 : vector<4x1xf32> to vector<4x384xf32>
    %230 = arith.mulf %229, %228 : vector<4x384xf32>
    %231 = arith.addf %224, %230 : vector<4x384xf32>
    %c0_64 = arith.constant 0 : index
    %c5_65 = arith.constant 5 : index
    %232 = vector.load %arg9[%c0_64, %c5_65] : memref<4x9xf32, #tpu.memory_space<vmem>>, vector<4x1xf32>
    %c383_i32_66 = arith.constant 383 : i32
    %233 = tpu.dynamic_rotate %200 by %c383_i32_66 dim 1 : vector<4x384xf32>, i32 -> vector<4x384xf32>
    %234 = vector.broadcast %5 : vector<1x384xf32> to vector<4x384xf32>
    %235 = arith.mulf %233, %234 : vector<4x384xf32>
    %236 = vector.broadcast %232 : vector<4x1xf32> to vector<4x384xf32>
    %237 = arith.mulf %236, %235 : vector<4x384xf32>
    %238 = arith.addf %231, %237 : vector<4x384xf32>
    %c0_67 = arith.constant 0 : index
    %c6_68 = arith.constant 6 : index
    %239 = vector.load %arg9[%c0_67, %c6_68] : memref<4x9xf32, #tpu.memory_space<vmem>>, vector<4x1xf32>
    %c377_i32_69 = arith.constant 377 : i32
    %240 = tpu.dynamic_rotate %200 by %c377_i32_69 dim 1 : vector<4x384xf32>, i32 -> vector<4x384xf32>
    %241 = vector.broadcast %6 : vector<1x384xf32> to vector<4x384xf32>
    %242 = arith.mulf %240, %241 : vector<4x384xf32>
    %243 = vector.broadcast %239 : vector<4x1xf32> to vector<4x384xf32>
    %244 = arith.mulf %243, %242 : vector<4x384xf32>
    %245 = arith.addf %238, %244 : vector<4x384xf32>
    %c0_70 = arith.constant 0 : index
    %c7_71 = arith.constant 7 : index
    %246 = vector.load %arg9[%c0_70, %c7_71] : memref<4x9xf32, #tpu.memory_space<vmem>>, vector<4x1xf32>
    %c376_i32_72 = arith.constant 376 : i32
    %247 = tpu.dynamic_rotate %200 by %c376_i32_72 dim 1 : vector<4x384xf32>, i32 -> vector<4x384xf32>
    %248 = vector.broadcast %7 : vector<1x384xf32> to vector<4x384xf32>
    %249 = arith.mulf %247, %248 : vector<4x384xf32>
    %250 = vector.broadcast %246 : vector<4x1xf32> to vector<4x384xf32>
    %251 = arith.mulf %250, %249 : vector<4x384xf32>
    %252 = arith.addf %245, %251 : vector<4x384xf32>
    %c0_73 = arith.constant 0 : index
    %c8_74 = arith.constant 8 : index
    %253 = vector.load %arg9[%c0_73, %c8_74] : memref<4x9xf32, #tpu.memory_space<vmem>>, vector<4x1xf32>
    %c375_i32_75 = arith.constant 375 : i32
    %254 = tpu.dynamic_rotate %200 by %c375_i32_75 dim 1 : vector<4x384xf32>, i32 -> vector<4x384xf32>
    %255 = vector.broadcast %8 : vector<1x384xf32> to vector<4x384xf32>
    %256 = arith.mulf %254, %255 : vector<4x384xf32>
    %257 = vector.broadcast %253 : vector<4x1xf32> to vector<4x384xf32>
    %258 = arith.mulf %257, %256 : vector<4x384xf32>
    %259 = arith.addf %252, %258 : vector<4x384xf32>
    %c320_i32_76 = arith.constant 320 : i32
    %260 = tpu.dynamic_rotate %259 by %c320_i32_76 dim 1 : vector<4x384xf32>, i32 -> vector<4x384xf32>
    %261 = arith.subf %260, %200 : vector<4x384xf32>
    %262 = vector.broadcast %10 : vector<1x384xf32> to vector<4x384xf32>
    %263 = arith.mulf %261, %262 : vector<4x384xf32>
    %264 = arith.truncf %263 : vector<4x384xf32> to vector<4x384xbf16>
    %cst_77 = arith.constant dense<0.000000e+00> : vector<4x6xf32>
    %265 = tpu.matmul %264, %25, %cst_77 {dimension_numbers = #tpu.dot_dimension_numbers<[1], [1], [0], [0], [0, 0, 1, 0], [], []>} : vector<4x384xbf16>, vector<6x384xbf16>, vector<4x6xf32> -> vector<4x6xf32>
    %cst_78 = arith.constant 1.562500e-02 : f32
    %266 = vector.broadcast %cst_78 : f32 to vector<4x6xf32>
    %267 = arith.mulf %265, %266 : vector<4x6xf32>
    %c0_79 = arith.constant 0 : index
    %c0_80 = arith.constant 0 : index
    %268 = vector.load %arg10[%c0_79, %c0_80] : memref<64x4xf32, #tpu.memory_space<vmem>>, vector<64x4xf32>
    %cst_81 = arith.constant dense<0.000000e+00> : vector<64x6xf32>
    %269 = tpu.matmul %268, %267, %cst_81 {dimension_numbers = #tpu.dot_dimension_numbers<[1], [0], [0], [1], [0, 0, 1, 1], [], []>} : vector<64x4xf32>, vector<4x6xf32>, vector<64x6xf32> -> vector<64x6xf32>
    %270 = arith.negf %174 : vector<64x6xf32>
    %271 = math.exp %270 : vector<64x6xf32>
    %cst_82 = arith.constant 1.000000e+00 : f32
    %272 = vector.broadcast %cst_82 : f32 to vector<64x6xf32>
    %273 = arith.addf %272, %271 : vector<64x6xf32>
    %274 = arith.divf %272, %273 : vector<64x6xf32>
    %275 = arith.negf %269 : vector<64x6xf32>
    %276 = math.exp %275 : vector<64x6xf32>
    %cst_83 = arith.constant 1.000000e+00 : f32
    %277 = vector.broadcast %cst_83 : f32 to vector<64x6xf32>
    %278 = arith.addf %277, %276 : vector<64x6xf32>
    %279 = arith.divf %277, %278 : vector<64x6xf32>
    %280 = arith.addf %274, %279 : vector<64x6xf32>
    %281 = arith.truncf %280 : vector<64x6xf32> to vector<64x6xbf16>
    %cst_84 = arith.constant dense<0.000000e+00> : vector<64x384xf32>
    %282 = tpu.matmul %281, %25, %cst_84 {dimension_numbers = #tpu.dot_dimension_numbers<[1], [0], [0], [1], [0, 0, 1, 1], [], []>} : vector<64x6xbf16>, vector<6x384xbf16>, vector<64x384xf32> -> vector<64x384xf32>
    %283 = arith.negf %154 : vector<1x384xf32>
    %284 = math.exp %283 : vector<1x384xf32>
    %cst_85 = arith.constant 1.000000e+00 : f32
    %285 = vector.broadcast %cst_85 : f32 to vector<1x384xf32>
    %286 = arith.addf %285, %284 : vector<1x384xf32>
    %287 = arith.divf %285, %286 : vector<1x384xf32>
    %288 = vector.broadcast %287 : vector<1x384xf32> to vector<64x384xf32>
    %289 = arith.addf %288, %282 : vector<64x384xf32>
    %cst_86 = arith.constant 3.000000e+00 : f32
    %290 = vector.broadcast %cst_86 : f32 to vector<64x384xf32>
    %291 = arith.addf %289, %290 : vector<64x384xf32>
    %292 = arith.mulf %23, %291 : vector<64x384xf32>
    %c0_87 = arith.constant 0 : index
    %c0_88 = arith.constant 0 : index
    %293 = vector.load %arg11[%c0_87, %c0_88] : memref<128x64xbf16, #tpu.memory_space<vmem>>, vector<128x64xbf16>
    %294 = arith.truncf %292 : vector<64x384xf32> to vector<64x384xbf16>
    %cst_89 = arith.constant dense<0.000000e+00> : vector<128x384xf32>
    %295 = tpu.matmul %293, %294, %cst_89 {dimension_numbers = #tpu.dot_dimension_numbers<[1], [0], [0], [1], [0, 0, 1, 1], [], []>} : vector<128x64xbf16>, vector<64x384xbf16>, vector<128x384xf32> -> vector<128x384xf32>
    %c0_90 = arith.constant 0 : index
    %c0_91 = arith.constant 0 : index
    %296 = vector.load %arg14[%c0_90, %c0_91] : memref<128x384xf32, #tpu.memory_space<vmem>>, vector<128x384xf32>
    tpu.vector_store %arg14[%c0_90, %c0_91], %295 {strides = array<i32>} : memref<128x384xf32, #tpu.memory_space<vmem>>, vector<128x384xf32>,
    return
  }
}

</mosaic_0001>

<bundles_post_ra>
// kernel: action_forward.1
= control target key start
LH: loop header
LB: loop body
LE: loop exit
PB: predicated region body
PF: predicated region fallthrough
CT: control target
= control target key end

     0   :  { %19 = vsyncpa [#allocation4], 0  ;;  %s2502_s15 = smov [#allocation3]   ;;  %s4287_s0 = inlined_call_operand.vmem [shape: f32[64,384], index: 0, kind: input, shape index: {}]   ;;  %s4288_s1 = inlined_call_operand.vmem [shape: f32[64,3], index: 1, kind: input, shape index: {}]   ;;  %s4289_s2 = inlined_call_operand.vmem [shape: f32[27], index: 2, kind: input, shape index: {}]   ;;  %s4290_s3 = inlined_call_operand.vmem [shape: f32[12,64], index: 3, kind: input, shape index: {}]   ;;  %s4291_s4 = inlined_call_operand.vmem [shape: f32[2,6,6], index: 4, kind: input, shape index: {}]   ;;  %s4292_s5 = inlined_call_operand.vmem [shape: f32[64,4], index: 5, kind: input, shape index: {}]   ;;  %s4293_s6 = inlined_call_operand.vmem [shape: bf16[4,64], index: 6, kind: input, shape index: {}]   ;;  %s4294_s7 = inlined_call_operand.vmem [shape: f32[4,1], index: 7, kind: input, shape index: {}]   ;;  %s4295_s8 = inlined_call_operand.vmem [shape: f32[4,1], index: 8, kind: input, shape index: {}]   ;;  %s4296_s9 = inlined_call_operand.vmem [shape: f32[4,9], index: 9, kind: input, shape index: {}]   ;;  %s4297_s10 = inlined_call_operand.vmem [shape: f32[64,4], index: 10, kind: input, shape index: {}]   ;;  %s4298_s11 = inlined_call_operand.vmem [shape: bf16[128,64], index: 11, kind: input, shape index: {}]   ;;  %s4299_s12 = inlined_call_operand.vmem [shape: f32[11,384], index: 12, kind: input, shape index: {}]   ;;  %s4300_s13 = inlined_call_operand.vmem [shape: bf16[6,384], index: 13, kind: input, shape index: {}]   ;;  %s4301_s14 = inlined_call_operand.vmem [shape: f32[128,384], index: 14, kind: output, shape index: {}]  }
   0x1   :  { %s29_s30 = sshll.u32 %s4289_s2, 4  ;;  %s30_s30 = int_to_ptr.vmem [resolvable:$true] %s29_s30 }
   0x2   :  { %32 = dma.vmem_to_smem %s30_s30, 16, %s2502_s15, [#allocation4]  }
   0x3   :  { %2500 = dma.done.wait [#allocation4], 16  }
   0x4   :  { %2501 = vsyncadd [#allocation4], 4294967280 }
   0x5   :  { %59 = sfence }
   0x6   :  { %v92_v0 = vld [vmem:[%s4287_s0 + $0x18] sm:$0xff]  ;;  %v68_v1 = vld [vmem:[%s4287_s0] sm:$0xff]  ;;  %s2503_s19 = smov 64   ;;  %v70_v2 = vld [vmem:[%s4287_s0 + $0x10] sm:$0xff]  ;;  %v77_v31 = vlaneseq  ;;  %vm187_vm1 = vcmask 523264   ;;  %vm863_vm2 = vcmask 1043456  }
   0x7   :  { %95 = vrot.lane.b32.xlu1 %v92_v0, %s2503_s19  ;;  %71 = vrot.lane.b32.xlu0 %v68_v1, %s2503_s19  ;;  %v2616_v3 = vld [vmem:[%s4300_s13] sm:$0x77]  ;;  %v94_v6 = vld [vmem:[%s4287_s0 + $0x28] sm:$0xff]  ;;  %s2514_s26 = smov 8   ;;  %s2515_s27 = smov 9   ;;  %vm767_vm9 = vcmask 1045504  }
   0x8   :  { %75 = vrot.lane.b32.xlu2 %v70_v2, %s2503_s19  ;;  %v627_v4 = vunpack.c.l.b16 %v2616_v3  ;;  %v69_v7 = vld [vmem:[%s4287_s0 + $0x8] sm:$0xff]  ;;  %v93_v8 = vld [vmem:[%s4287_s0 + $0x20] sm:$0xff]  ;;  %v122_v10 = vld [vmem:[%s4287_s0 + $0x78] sm:$0xff]  ;;  %v2690_v32 = vand.u32 127, %v77_v31  ;;  %s2516_s30 = smov 7   ;;  %s2517_s15 = smov 1  }
   0x9   :  { %v119_v9 = vld [vmem:[%s4287_s0 + $0x60] sm:$0xff]  ;;  %v125_v12 = vld [vmem:[%s4287_s0 + $0x90] sm:$0xff]  ;;  %v128_v13 = vld [vmem:[%s4287_s0 + $0xa8] sm:$0xff]  ;;  %s2518_s1 = smov 127   ;;  %s2521_s16 = smov 121   ;;  %vm763_vm10 = vcmask 48128  }
   0xa   :  { %v2619_v5 = vpack.c.b16 %v627_v4, %v627_v4  ;;  %v179_v11 = vpack.c.bf16 %v122_v10, %v119_v9  ;;  %v126_v14 = vld [vmem:[%s4287_s0 + $0x98] sm:$0xff]  ;;  %v129_v15 = vld [vmem:[%s4287_s0 + $0xb0] sm:$0xff]  ;;  %v182_v16 = vpack.c.bf16 %v128_v13, %v125_v12  ;;  %v120_v18 = vld [vmem:[%s4287_s0 + $0x68] sm:$0xff]  ;;  %vm79_vm0 = vcmp.lt.s32.totalorder %v2690_v32, 64  ;;  %s2215_s25 = sld [smem:[#allocation3 + $0xa]] }
   0xb   :  { %v2652_v17 = vpack.c.bf16 %v129_v15, %v126_v14  ;;  %v123_v19 = vld [vmem:[%s4287_s0 + $0x80] sm:$0xff]  ;;  %v186_v20 = vld [vmem:[%s4300_s13 + $0x8] sm:$0x7]  ;;  %v113_v24 = vld [vmem:[%s4287_s0 + $0x30] sm:$0xff]  ;;  %s2522_s13 = smov 119   ;;  %vm236_vm7 = vcmp.lt.s32.totalorder %v2690_v32, 9 }
   0xc   :  { %4318 = vst [vmem:[#allocation6_spill] sm:$0xff] %v2619_v5  ;;  %2355 = vmatpush.bf16.xpose.msra.mxu3 %v2619_v5  ;;  %195 = vmatpush.bf16.msra.mxu0 %v182_v16  ;;  %v2664_v21 = vpack.c.bf16 %v123_v19, %v120_v18  ;;  %v629_v22 = vunpack.c.l.b16 %v186_v20  ;;  %v116_v25 = vld [vmem:[%s4287_s0 + $0x48] sm:$0xff]  ;;  %v114_v26 = vld [vmem:[%s4287_s0 + $0x38] sm:$0xff]  ;;  %v117_v27 = vld [vmem:[%s4287_s0 + $0x50] sm:$0xff]  ;;  %vm249_vm8 = vcmp.lt.s32.totalorder %v2690_v32, 8  ;;  %vm271_vm11 = vcmp.lt.s32.totalorder %v2690_v32, 7 }
   0xd   :  { %208 = vmatpush.bf16.msra.mxu2 %v2652_v17  ;;  %v2682_v28 = vpack.c.bf16 %v116_v25, %v113_v24  ;;  %v2684_v29 = vpack.c.bf16 %v117_v27, %v114_v26  ;;  %v2695_v35 = vld [vmem:[%s4299_s12 + $0x20] sm:$0x7]  ;;  %v2700_v36 = vld [vmem:[%s4299_s12 + $0x28] sm:$0x7]  ;;  %v2706_v38 = vld [vmem:[%s4299_s12 + $0x18] sm:$0x7] }
   0xe   :  { %v2666_v23 = vpack.c.b16 %v629_v22, %v629_v22  ;;  %v105_v39 = vperm.slane %v2695_v35, 1  ;;  %v4302_v40 = vperm.slane %v2700_v36, 2  ;;  %v104_v43 = vperm.slane %v2706_v38, 1  ;;  %v127_v55 = vld [vmem:[%s4287_s0 + $0xa0] sm:$0xff]  ;;  %v130_v56 = vld [vmem:[%s4287_s0 + $0xb8] sm:$0xff]  ;;  %v121_v1 = vld [vmem:[%s4287_s0 + $0x70] sm:$0xff] }
   0xf   :  { %99 = vrot.lane.b32.xlu1 %v94_v6, %s2503_s19  ;;  %73 = vrot.lane.b32.xlu0 %v69_v7, %s2503_s19  ;;  %v106_v44 = vperm.slane %v2700_v36, 1  ;;  %v4304_v45 = vperm.slane %v2706_v38, 2  ;;  %v4303_v46 = vperm.slane %v2695_v35, 2  ;;  %v184_v0 = vpack.c.bf16 %v130_v56, %v127_v55  ;;  %v124_v2 = vld [vmem:[%s4287_s0 + $0x88] sm:$0xff]  ;;  %v907_v4 = vld [vmem:[%s4293_s6] sm:$0x3] }
  0x10   :  { %97 = vrot.lane.b32.xlu2 %v93_v8, %s2503_s19  ;;  %4319 = vst [vmem:[#allocation7_spill] sm:$0xff] %v2666_v23  ;;  %196 = vmatpush.bf16.msra.mxu0 %v179_v11  ;;  %v181_v6 = vpack.c.bf16 %v124_v2, %v121_v1  ;;  %v2504_v7 = vmov 1015037056   ;;  %v115_v8 = vld [vmem:[%s4287_s0 + $0x40] sm:$0xff]  ;;  %v118_v9 = vld [vmem:[%s4287_s0 + $0x58] sm:$0xff]  ;;  %vm290_vm12 = vcmp.lt.s32.totalorder %v2690_v32, 1 }
  0x11   :  { %209 = vmatpush.bf16.msra.mxu2 %v2664_v21  ;;  %701 = vmatpush.bf16.xpose.msra.mxu1 %v2666_v23  ;;  %v178_v10 = vpack.c.bf16 %v118_v9, %v115_v8  ;;  %v2812_v1 = vld [vmem:[%s4296_s9] sm:$0xf]  ;;  %v2506_v8 = vmov 5   ;;  %vm309_vm13 = vcmp.lt.s32.totalorder %v2690_v32, 127  ;;  %vm347_vm14 = vcmp.lt.s32.totalorder %v2690_v32, 120  ;;  %s3152_s28 = sld [smem:[#allocation3]] }
  0x12   :  { %vm328_vm15 = vcmp.lt.s32.totalorder %v2690_v32, 121  ;;  %s3156_s29 = sld [smem:[#allocation3 + $0x12]] }
  0x13   :  { %654 = vmatmul.bf16.vlgmr.msra.gmra.mxu3 %v179_v11  ;;  %s3191_s17 = sld [smem:[#allocation3 + $0x15]] }
  0x14   :  { %915 = vmatpush.bf16.msrb.mxu3 %v182_v16  ;;  %197 = vmatpush.bf16.msra.mxu0 %v2682_v28  ;;  %s3210_s18 = sld [smem:[#allocation3 + $0x5]] }
  0x15   :  { %210 = vmatpush.bf16.msra.mxu2 %v2684_v29  ;;  %s3220_s2 = sld [smem:[#allocation3 + $0xe]] }
  0x16   :  { %s3222_s20 = sld [smem:[#allocation3 + $0x17]] }
  0x17   :  { %s3246_s21 = sld [smem:[#allocation3 + $0x6]] }
  0x18   :  { %916 = vmatpush.bf16.msrb.mxu3 %v179_v11  ;;  %v628_v11 = vunpack.c.h.b16 %v2616_v3  ;;  %s3260_s6 = sld [smem:[#allocation3 + $0xf]] }
  0x19   :  { %1245 = vmatpush.bf16.xpose.msrb.mxu1 %v2619_v5  ;;  %s3264_s22 = sld [smem:[#allocation3 + $0x18]] }
  0x1a   :  { %v2779_v12 = vpack.c.b16 %v628_v11, %v628_v11  ;;  %s3329_s9 = sld [smem:[#allocation3 + $0x7]] }
  0x1b   :  { %s3335_s23 = sld [smem:[#allocation3 + $0x10]] }
  0x1c   :  { %917 = vmatpush.bf16.msrb.mxu3 %v2682_v28  ;;  %4326 = vst [vmem:[#allocation14_spill] sm:$0xff] %v2779_v12  ;;  %s3345_s24 = sld [smem:[#allocation3 + $0x19]] }
  0x23   :  { %659 = vmatmul.bf16.gmra.mxu3 %v182_v16 }
  0x62   :  { %v76_v30 = vpop.permute.xlu2 %75 }
  0x6a   :  { %v98_v37 = vpop.permute.xlu2 %97 }
  0x79   :  { %v96_v33 = vpop.permute.xlu1 %95  ;;  %v72_v34 = vpop.permute.xlu0 %71 }
  0x7a   :  { %v102_v41 = vsel %vm79_vm0, %v96_v33, %v98_v37  ;;  %v82_v42 = vsel %vm79_vm0, %v76_v30, %v72_v34 }
  0x7b   :  { %v2718_v47 = vmul.f32 %v105_v39, %v102_v41  ;;  %v2722_v48 = vmul.f32 %v4302_v40, %v82_v42 }
  0x7d   :  { %4320 = vst [vmem:[#allocation8_spill] sm:$0xff] %v2718_v47 }
  0x7e   :  { %4321 = vst [vmem:[#allocation9_spill] sm:$0xff] %v2722_v48 }
  0x81   :  { %v100_v49 = vpop.permute.xlu1 %99  ;;  %v74_v50 = vpop.permute.xlu0 %73 }
  0x82   :  { %v101_v51 = vsel %vm79_vm0, %v98_v37, %v100_v49  ;;  %v103_v52 = vsel %vm79_vm0, %v100_v49, %v96_v33  ;;  %v80_v53 = vsel %vm79_vm0, %v74_v50, %v76_v30  ;;  %v81_v54 = vsel %vm79_vm0, %v72_v34, %v74_v50 }
  0x83   :  { %v2738_v57 = vmul.f32 %v104_v43, %v103_v52  ;;  %v2740_v58 = vmul.f32 %v106_v44, %v101_v51  ;;  %v2744_v59 = vmul.f32 %v4304_v45, %v81_v54  ;;  %v2748_v60 = vmul.f32 %v4303_v46, %v80_v53 }
  0x85   :  { %4322 = vst [vmem:[#allocation10_spill] sm:$0xff] %v2738_v57  ;;  %v173_v61 = vpack.c.bf16 %v2738_v57, %v2744_v59  ;;  %v174_v62 = vpack.c.bf16 %v2718_v47, %v2748_v60  ;;  %v175_v63 = vpack.c.bf16 %v2740_v58, %v2722_v48 }
  0x86   :  { %4323 = vst [vmem:[#allocation11_spill] sm:$0xff] %v2740_v58 }
  0x87   :  { %4324 = vst [vmem:[#allocation12_spill] sm:$0xff] %v2744_v59  ;;  %198 = vmatpush.bf16.msra.mxu0 %v173_v61  ;;  %211 = vmatpush.bf16.msra.mxu2 %v174_v62 }
  0x88   :  { %4325 = vst [vmem:[#allocation13_spill] sm:$0xff] %v2748_v60  ;;  %702 = vmatmul.bf16.vlgmr.msra.gmra.mxu1 %v175_v63  ;;  %918 = vmatpush.bf16.msrb.mxu3 %v173_v61  ;;  %v3333_v60 = vstv %s3264_s22 }
  0x8a   :  { %2203 = vmatmul.msk.bf16.vlgmr.msra.gmra.mxu0 %vm187_vm1, %v2504_v7  ;;  %2204 = vmatmul.msk.bf16.vlgmr.msra.gmra.mxu2 %vm187_vm1, %v2504_v7 }
  0x8b   :  { %221 = vmatpush.bf16.msrb.mxu2 %v184_v0  ;;  %643 = vmatpush.bf16.xpose.msrb.mxu0 %v2619_v5 }
  0x8c   :  { %928 = vmatpush.bf16.msra.mxu3 %v2652_v17 }
  0x8d   :  { %2248 = vmatmul.msk.bf16.vlgmr.msrb.gmra.mxu3 %vm187_vm1, %v907_v4 }
  0x8f   :  { %222 = vmatpush.bf16.msrb.mxu2 %v181_v6 }
  0x90   :  { %929 = vmatpush.bf16.msra.mxu3 %v2664_v21 }
  0x93   :  { %941 = vmatpush.bf16.msra.mxu0 %v184_v0  ;;  %223 = vmatpush.bf16.msrb.mxu2 %v178_v10 }
  0x94   :  { %930 = vmatpush.bf16.msra.mxu3 %v2684_v29 }
  0x96   :  { %v655_v3 = vpop.f32.mrf.mxu3 }
  0x97   :  { %942 = vmatpush.bf16.msra.mxu0 %v181_v6  ;;  %224 = vmatpush.bf16.msrb.mxu2 %v175_v63 }
  0x98   :  { %931 = vmatpush.bf16.msra.mxu3 %v174_v62  ;;  %707 = vmatmul.bf16.gmra.mxu1 %v178_v10 }
  0x9a   :  { %2205 = vmatmul.msk.bf16.vlgmr.msrb.gmra.mxu2 %vm187_vm1, %v2504_v7  ;;  %644 = vmatmul.bf16.vlgmr.msrb.gmra.mxu0 %v173_v61 }
  0x9b   :  { %943 = vmatpush.bf16.msra.mxu0 %v178_v10  ;;  %672 = vmatpush.bf16.xpose.msra.mxu2 %v2779_v12 }
  0x9c   :  { %1258 = vmatpush.bf16.xpose.msrb.mxu3 %v2779_v12 }
  0x9d   :  { %2249 = vmatmul.msk.bf16.vlgmr.msra.gmra.mxu3 %vm187_vm1, %v907_v4 }
  0x9e   :  { %v657_v13 = vpop.f32.mrf.mxu3 }
  0x9f   :  { %944 = vmatpush.bf16.msra.mxu0 %v175_v63 }
  0xa3   :  { %1271 = vmatpush.bf16.xpose.msrb.mxu0 %v2666_v23 }
  0xa6   :  { %v660_v14 = vpop.f32.mrf.mxu3 }
  0xa8   :  { %712 = vmatmul.bf16.gmra.mxu1 %v181_v6 }
  0xaa   :  { %649 = vmatmul.bf16.gmra.mxu0 %v2682_v28  ;;  %673 = vmatmul.bf16.vlgmr.msra.gmra.mxu2 %v174_v62 }
  0xae   :  { %v662_v15 = vpop.f32.mrf.mxu3 }
  0xb8   :  { %717 = vmatmul.bf16.gmra.mxu1 %v184_v0 }
  0xba   :  { %678 = vmatmul.bf16.gmra.mxu2 %v2684_v29  ;;  %2250 = vmatmul.msk.bf16.vlgmr.msra.gmra.mxu0 %vm187_vm1, %v907_v4  ;;  %v2505_v4 = vmov 2  }
  0xbb   :  { %2381 = vset.pattern.permute.xlu1 %v2505_v4 }
  0xbc   :  { %1086 = vperm.xlu1 %2381, %v2812_v1  }
  0xc4   :  { %2383 = vset.pattern.permute.xlu1 %v2506_v8 }
  0xc5   :  { %1136 = vperm.xlu1 %2383, %v2812_v1  }
  0xca   :  { %683 = vmatmul.bf16.gmra.mxu2 %v2664_v21 }
  0xda   :  { %688 = vmatmul.bf16.gmra.mxu2 %v2652_v17 }
 0x105   :  { %v703_v17 = vpop.f32.mrf.mxu1 }
 0x107   :  { %v2791_v16 = vpop.f32.mrf.mxu0 }
 0x10d   :  { %v2793_v18 = vpop.f32.mrf.mxu2  ;;  %v705_v31 = vpop.f32.mrf.mxu1 }
 0x10f   :  { %v202_v20 = vpop.f32.mrf.mxu0 }
 0x110   :  { %v2795_v19 = vpop.f32.mrf.mxu3 }
 0x111   :  { %v950_v42 = vsel %vm863_vm2, %v2795_v19, 0.0 }
 0x115   :  { %v215_v22 = vpop.f32.mrf.mxu2  ;;  %v708_v41 = vpop.f32.mrf.mxu1 }
 0x117   :  { %v645_v25 = vpop.f32.mrf.mxu0 }
 0x118   :  { %v922_v24 = vpop.f32.mrf.mxu3 }
 0x11d   :  { %v2797_v26 = vpop.f32.mrf.mxu2  ;;  %v710_v54 = vpop.f32.mrf.mxu1 }
 0x11f   :  { %v647_v21 = vpop.f32.mrf.mxu0 }
 0x120   :  { %v2799_v27 = vpop.f32.mrf.mxu3 }
 0x121   :  { %v951_v43 = vsel %vm863_vm2, %v2799_v27, 0.0 }
 0x122   :  { %v952_v49 = vadd.f32 %v951_v43, %v950_v42 }
 0x125   :  { %v228_v28 = vpop.f32.mrf.mxu2  ;;  %v713_v61 = vpop.f32.mrf.mxu1 }
 0x127   :  { %v650_v30 = vpop.f32.mrf.mxu0 }
 0x128   :  { %v935_v29 = vpop.f32.mrf.mxu3 }
 0x12d   :  { %v674_v33 = vpop.f32.mrf.mxu2  ;;  %v715_v63 = vpop.f32.mrf.mxu1 }
 0x12e   :  { %v675_v34 = vadd.f32 %v674_v33, %v645_v25 }
 0x12f   :  { %v652_v37 = vpop.f32.mrf.mxu0 }
 0x130   :  { %v704_v39 = vadd.f32 %v703_v17, %v675_v34 }
 0x135   :  { %v676_v44 = vpop.f32.mrf.mxu2  ;;  %v718_v2 = vpop.f32.mrf.mxu1 }
 0x136   :  { %v677_v43 = vadd.f32 %v676_v44, %v647_v21  ;;  %v993_v21 = vld [vmem:[%s4294_s7] sm:$0xf]  ;;  %s2216_s7 = sld [smem:[#allocation3 + $0xb]] }
 0x137   :  { %v2805_v50 = vpop.f32.mrf.mxu0 }
 0x138   :  { %v953_v51 = vsel %vm863_vm2, %v2805_v50, 0.0 }
 0x139   :  { %v954_v52 = vadd.f32 %v953_v51, %v952_v49 }
 0x13b   :  { %955 = vadd.xlane.f32.xlu0 %v954_v52 }
 0x13d   :  { %v679_v53 = vpop.f32.mrf.mxu2  ;;  %v720_v10 = vpop.f32.mrf.mxu1 }
 0x13e   :  { %v680_v33 = vadd.f32 %v679_v53, %v650_v30  ;;  %v2507_v30 = vmov 384.0  }
 0x13f   :  { %v948_v55 = vpop.f32.mrf.mxu0  ;;  %2387 = vrcp.f32 %v2507_v30  ;;  %v2513_v30 = vmov 8  }
 0x140   :  { %v709_v51 = vadd.f32 %v708_v41, %v680_v33  ;;  %v706_v55 = vadd.f32 %v705_v31, %v677_v43  ;;  %v2508_v41 = vmov 0  }
 0x141   :  { %2377 = vset.pattern.permute.xlu2 %v2508_v41 }
 0x142   :  { %996 = vperm.xlu2 %2377, %v993_v21  }
 0x145   :  { %v681_v56 = vpop.f32.mrf.mxu2  ;;  %v2388_v53 = vpop.eup %2387 }
 0x146   :  { %v682_v17 = vadd.f32 %v681_v56, %v652_v37  ;;  %v723_v37 = vmul.f32 0.015625, %v704_v39  ;;  %v958_v44 = vmul.f32 384.0, %v2388_v53  ;;  %vm962_vm3 = vweird.f32 %v2388_v53 }
 0x148   :  { %v959_v31 = vsub.f32 1.0, %v958_v44 }
 0x14a   :  { %v960_v56 = vmul.f32 %v2388_v53, %v959_v31 }
 0x14c   :  { %v961_v39 = vadd.f32 %v2388_v53, %v960_v56 }
 0x14d   :  { %v684_v62 = vpop.f32.mrf.mxu2 }
 0x14e   :  { %v685_v22 = vadd.f32 %v684_v62, %v655_v3  ;;  %v725_v3 = vmul.f32 0.015625, %v709_v51  ;;  %v2509_v62 = vmov 4  }
 0x150   :  { %v714_v34 = vadd.f32 %v713_v61, %v685_v22  ;;  %v963_v61 = vsel %vm962_vm3, %v2388_v53, %v961_v39  ;;  %v732_v39 = vld [vmem:[%s4290_s3 + $0x8] sm:$0xf]  ;;  %vm366_vm3 = vcmp.lt.s32.totalorder %v2690_v32, 119 }
 0x152   :  { %v727_v52 = vmul.f32 0.015625, %v714_v34 }
 0x155   :  { %v686_v0 = vpop.f32.mrf.mxu2 }
 0x156   :  { %v687_v11 = vadd.f32 %v686_v0, %v657_v13 }
 0x158   :  { %v716_v28 = vadd.f32 %v715_v63, %v687_v11 }
 0x15a   :  { %v728_v49 = vmul.f32 0.015625, %v716_v28 }
 0x15d   :  { %v689_v6 = vpop.f32.mrf.mxu2 }
 0x15e   :  { %v690_v7 = vadd.f32 %v689_v6, %v660_v14  ;;  %v711_v14 = vadd.f32 %v710_v54, %v682_v17  ;;  %v1002_v54 = vld [vmem:[%s4295_s8] sm:$0xf]  ;;  %s3143_s8 = sld [smem:[#allocation3 + $0x4]] }
 0x15f   :  { %1005 = vperm.xlu2 %2377, %v1002_v54  }
 0x160   :  { %v719_v24 = vadd.f32 %v718_v2, %v690_v7  ;;  %v726_v13 = vmul.f32 0.015625, %v711_v14 }
 0x162   :  { %v729_v42 = vmul.f32 0.015625, %v719_v24 }
 0x165   :  { %v691_v9 = vpop.f32.mrf.mxu2 }
 0x166   :  { %v692_v20 = vadd.f32 %v691_v9, %v662_v15  ;;  %v724_v15 = vmul.f32 0.015625, %v706_v55 }
 0x167   :  { %2378 = vset.pattern.permute.xlu2 %v2509_v62 }
 0x168   :  { %v721_v25 = vadd.f32 %v720_v10, %v692_v20  ;;  %1014 = vperm.xlu2 %2378, %v2812_v1  }
 0x16a   :  { %v730_v29 = vmul.f32 0.015625, %v721_v25  ;;  %v2512_v25 = vmov 6  }
 0x16c   :  { %747 = vmatpush.msrb.mxu2 %v730_v29 }
 0x16e   :  { %748 = vmatpush.msrb.mxu2 %v729_v42 }
 0x170   :  { %749 = vmatpush.msrb.mxu2 %v728_v49  ;;  %2379 = vset.pattern.permute.xlu2 %v2508_v41 }
 0x171   :  { %1036 = vperm.xlu2 %2379, %v2812_v1  }
 0x172   :  { %750 = vmatpush.msrb.mxu2 %v727_v52 }
 0x174   :  { %751 = vmatpush.msrb.mxu2 %v726_v13  ;;  %v731_v13 = vld [vmem:[%s4290_s3] sm:$0xff]  ;;  %s2520_s3 = smov 120  }
 0x176   :  { %752 = vmatpush.msrb.mxu2 %v725_v3 }
 0x178   :  { %753 = vmatpush.msrb.mxu2 %v724_v15 }
 0x17a   :  { %754 = vmatpush.msrb.mxu2 %v723_v37 }
 0x17b   :  { %2232 = vmatmul.msk.f32.vlgmr.msrb.gmra.mxu2 %vm187_vm1, %v731_v13 }
 0x183   :  { %2233 = vmatmul.msk.f32.gmra.mxu2 %vm187_vm1, %v732_v39 }
 0x19c   :  { %v997_v49 = vpop.permute.xlu2 %996 }
 0x1ae   :  { %v956_v63 = vpop.xlane.xlu0 %955 }
 0x1af   :  { %v964_v0 = vmul.f32 %v963_v61, %v956_v63 }
 0x1b1   :  { %v965_v2 = vsub.f32 %v2795_v19, %v964_v0  ;;  %v966_v4 = vsub.f32 %v2799_v27, %v964_v0  ;;  %v967_v6 = vsub.f32 %v2805_v50, %v964_v0  ;;  %v2510_v19 = vmov 1   ;;  %v2832_v50 = vpop.permute.xlu1 %1086  ;;  %v2916_v0 = vld [vmem:[%s4299_s12 + $0x8] sm:$0xff] }
 0x1b2   :  { %2380 = vset.pattern.permute.xlu0 %v2510_v19  ;;  %v2511_v27 = vmov 3   ;;  %v1130_v40 = vperm.slane %v2916_v0, 5 }
 0x1b3   :  { %v968_v7 = vmul.f32 %v965_v2, %v965_v2  ;;  %v969_v8 = vmul.f32 %v966_v4, %v966_v4  ;;  %v970_v9 = vmul.f32 %v967_v6, %v967_v6  ;;  %1061 = vperm.xlu0 %2380, %v2812_v1  }
 0x1b5   :  { %v971_v10 = vsel %vm863_vm2, %v968_v7, 0.0  ;;  %v972_v11 = vsel %vm863_vm2, %v969_v8, 0.0  ;;  %v974_v22 = vsel %vm863_vm2, %v970_v9, 0.0  ;;  %v2929_v8 = vld [vmem:[%s4299_s12] sm:$0xff]  ;;  %v2934_v9 = vld [vmem:[%s4299_s12 + $0x10] sm:$0xff] }
 0x1b6   :  { %v973_v20 = vadd.f32 %v972_v11, %v971_v10  ;;  %v1129_v48 = vperm.slane %v2929_v8, 5 }
 0x1b8   :  { %v975_v24 = vadd.f32 %v974_v22, %v973_v20  ;;  %v1029_v22 = vperm.slane %v2929_v8, 0 }
 0x1b9   :  { %v2835_v17 = vpop.permute.xlu1 %1136  ;;  %v1006_v44 = vpop.permute.xlu2 %1005 }
 0x1ba   :  { %976 = vadd.xlane.f32.xlu1 %v975_v24  ;;  %v1031_v24 = vperm.slane %v2934_v9, 0 }
 0x1bb   :  { %2382 = vset.pattern.permute.xlu0 %v2511_v27 }
 0x1bc   :  { %1111 = vperm.xlu0 %2382, %v2812_v1  }
 0x1c2   :  { %v1015_v62 = vpop.permute.xlu2 %1014 }
 0x1c4   :  { %2384 = vset.pattern.permute.xlu0 %v2512_v25 }
 0x1c5   :  { %1161 = vperm.xlu0 %2384, %v2812_v1  }
 0x1cd   :  { %2386 = vset.pattern.permute.xlu0 %v2513_v30 }
 0x22d   :  { %v977_v28 = vpop.xlane.xlu1 %976 }
 0x22e   :  { %v978_v29 = vmul.f32 %v977_v28, %v963_v61  ;;  %v2519_v61 = vmov 7  }
 0x22f   :  { %2385 = vset.pattern.permute.xlu1 %v2519_v61 }
 0x230   :  { %v979_v33 = vadd.f32 1e-05, %v978_v29 }
 0x232   :  { %2389 = vrsqrt.f32 %v979_v33  ;;  %vm986_vm5 = vweird.f32 %v979_v33 }
 0x238   :  { %v2390_v34 = vpop.eup %2389 }
 0x239   :  { %v981_v42 = vmul.f32 %v2390_v34, %v979_v33  ;;  %vm987_vm4 = vweird.f32 %v2390_v34 }
 0x23a   :  { %vm988_vm6 = vmor %vm986_vm5, %vm987_vm4  ;;  %vm838_vm4 = vcmask 31744  }
 0x23b   :  { %v982_v43 = vmul.f32 %v2390_v34, %v981_v42 }
 0x23d   :  { %v983_v14 = vmul.f32 0.5, %v982_v43 }
 0x23f   :  { %v984_v51 = vsub.f32 1.5, %v983_v14 }
 0x241   :  { %v985_v52 = vmul.f32 %v2390_v34, %v984_v51  ;;  %v1054_v51 = vperm.slane %v2929_v8, 1 }
 0x243   :  { %v989_v55 = vsel %vm988_vm6, %v2390_v34, %v985_v52 }
 0x244   :  { %v990_v3 = vmul.f32 %v989_v55, %v965_v2  ;;  %v991_v15 = vmul.f32 %v989_v55, %v966_v4  ;;  %v992_v37 = vmul.f32 %v989_v55, %v967_v6  ;;  %v1030_v2 = vperm.slane %v2916_v0, 0 }
 0x246   :  { %v999_v53 = vmul.f32 %v997_v49, %v990_v3  ;;  %v1000_v21 = vmul.f32 %v997_v49, %v991_v15  ;;  %v1001_v41 = vmul.f32 %v997_v49, %v992_v37  ;;  %v1062_v15 = vpop.permute.xlu0 %1061 }
 0x248   :  { %v2841_v31 = vadd.f32 %v1006_v44, %v999_v53  ;;  %v2843_v54 = vadd.f32 %v1006_v44, %v1000_v21  ;;  %v2845_v56 = vadd.f32 %v1006_v44, %v1001_v41  ;;  %v762_v41 = vld [vmem:[%s4291_s4] sm:$0x3f]  ;;  %v2956_v44 = vpop.f32.mrf.mxu2 }
 0x249   :  { %2234 = vmatpush.msk.msra.mxu2 %vm767_vm9, %v762_v41  ;;  %v1105_v41 = vperm.slane %v2916_v0, 3 }
 0x24a   :  { %1049 = vrot.lane.b32.xlu1 %v2845_v56, %s2514_s26  ;;  %1047 = vrot.lane.b32.xlu0 %v2843_v54, %s2514_s26  ;;  %v1018_v10 = vmul.f32 %v1015_v62, %v2843_v54  ;;  %v1017_v33 = vmul.f32 %v1015_v62, %v2841_v31  ;;  %v1019_v34 = vmul.f32 %v1015_v62, %v2845_v56 }
 0x24b   :  { %1020 = vrot.lane.b32.xlu2 %v2841_v31, %s2515_s27  ;;  %2235 = vmatmul.msk.f32.vlgmr.msra.gmra.mxu2 %vm763_vm10, %v2956_v44 }
 0x24e   :  { %v2960_v39 = vpop.permute.xlu0 %1111 }
 0x252   :  { %1074 = vrot.lane.b32.xlu1 %v2845_v56, %s2516_s30  ;;  %1070 = vrot.lane.b32.xlu0 %v2841_v31, %s2516_s30 }
 0x253   :  { %1022 = vrot.lane.b32.xlu2 %v2843_v54, %s2515_s27 }
 0x25a   :  { %1097 = vrot.lane.b32.xlu1 %v2843_v54, %s2517_s15  ;;  %1120 = vrot.lane.b32.xlu0 %v2841_v31, %s2518_s1 }
 0x25b   :  { %1024 = vrot.lane.b32.xlu2 %v2845_v56, %s2515_s27 }
 0x262   :  { %1124 = vrot.lane.b32.xlu1 %v2845_v56, %s2518_s1  ;;  %1170 = vrot.lane.b32.xlu0 %v2841_v31, %s2520_s3 }
 0x263   :  { %1045 = vrot.lane.b32.xlu2 %v2841_v31, %s2514_s26 }
 0x26a   :  { %1147 = vrot.lane.b32.xlu1 %v2843_v54, %s2521_s16  ;;  %1211 = vperm.xlu0 %2386, %v2812_v1  }
 0x26b   :  { %1072 = vrot.lane.b32.xlu2 %v2843_v54, %s2516_s30 }
 0x272   :  { %1174 = vrot.lane.b32.xlu1 %v2845_v56, %s2520_s3  ;;  %232 = vrot.lane.b32.xlu0 %v2793_v18, %s2515_s27 }
 0x273   :  { %1095 = vrot.lane.b32.xlu2 %v2841_v31, %s2517_s15 }
 0x27a   :  { %1197 = vrot.lane.b32.xlu1 %v2843_v54, %s2522_s13  ;;  %245 = vrot.lane.b32.xlu0 %v2793_v18, %s2514_s26 }
 0x27b   :  { %1099 = vrot.lane.b32.xlu2 %v2845_v56, %s2517_s15 }
 0x282   :  { %1186 = vperm.xlu1 %2385, %v2812_v1   ;;  %267 = vrot.lane.b32.xlu0 %v2793_v18, %s2516_s30  ;;  %v1037_v1 = vpop.permute.xlu2 %1036 }
 0x283   :  { %1122 = vrot.lane.b32.xlu2 %v2843_v54, %s2518_s1 }
 0x28a   :  { %286 = vrot.lane.b32.xlu0 %v2793_v18, %s2517_s15 }
 0x28b   :  { %1145 = vrot.lane.b32.xlu2 %v2841_v31, %s2521_s16 }
 0x292   :  { %305 = vrot.lane.b32.xlu0 %v2793_v18, %s2518_s1 }
 0x293   :  { %1149 = vrot.lane.b32.xlu2 %v2845_v56, %s2521_s16 }
 0x29a   :  { %324 = vrot.lane.b32.xlu0 %v2793_v18, %s2521_s16 }
 0x29b   :  { %1172 = vrot.lane.b32.xlu2 %v2843_v54, %s2520_s3 }
 0x2a2   :  { %343 = vrot.lane.b32.xlu0 %v2793_v18, %s2520_s3 }
 0x2a3   :  { %1195 = vrot.lane.b32.xlu2 %v2841_v31, %s2522_s13 }
 0x2a5   :  { %v1021_v63 = vpop.permute.xlu2 %1020 }
 0x2aa   :  { %362 = vrot.lane.b32.xlu0 %v2793_v18, %s2522_s13 }
 0x2ab   :  { %1199 = vrot.lane.b32.xlu2 %v2845_v56, %s2522_s13 }
 0x2ad   :  { %v1023_v4 = vpop.permute.xlu2 %1022 }
 0x2ae   :  { %v1027_v6 = vsel %vm236_vm7, %v1021_v63, %v1023_v4 }
 0x2af   :  { %v1033_v7 = vmul.f32 %v1030_v2, %v1027_v6 }
 0x2b1   :  { %v1040_v11 = vmul.f32 %v1037_v1, %v1033_v7 }
 0x2b3   :  { %v2937_v20 = vadd.f32 %v1040_v11, %v1018_v10 }
 0x2b5   :  { %v1025_v19 = vpop.permute.xlu2 %1024 }
 0x2b6   :  { %v1026_v27 = vsel %vm236_vm7, %v1023_v4, %v1025_v19  ;;  %v1028_v25 = vsel %vm236_vm7, %v1025_v19, %v1021_v63  ;;  %v759_v63 = vpop.f32.mrf.mxu2  ;;  %v2966_v4 = vpop.permute.xlu0 %1161  ;;  %v1056_v19 = vperm.slane %v2934_v9, 1 }
 0x2b7   :  { %v1032_v28 = vmul.f32 %v1029_v22, %v1028_v25  ;;  %v1034_v29 = vmul.f32 %v1031_v24, %v1026_v27  ;;  %v1055_v25 = vperm.slane %v2916_v0, 1 }
 0x2b9   :  { %v1039_v42 = vmul.f32 %v1037_v1, %v1032_v28  ;;  %v1041_v43 = vmul.f32 %v1037_v1, %v1034_v29  ;;  %v2236_v1 = vld [vmem:[%s4291_s4 + $0x8] sm:$0x3f]  ;;  %s2214_s4 = sld [smem:[#allocation3 + $0x9]] }
 0x2ba   :  { %2237 = vmatpush.msk.msrb.mxu2 %vm767_vm9, %v2236_v1 }
 0x2bb   :  { %v1042_v14 = vadd.f32 %v1039_v42, %v1017_v33  ;;  %v1044_v49 = vadd.f32 %v1041_v43, %v1019_v34  ;;  %2238 = vmatmul.msk.f32.vlgmr.msrb.gmra.mxu2 %vm763_vm10, %v759_v63  ;;  %v1081_v43 = vperm.slane %v2934_v9, 2 }
 0x2bc   :  { %v1050_v52 = vpop.permute.xlu1 %1049 }
 0x2bd   :  { %v1046_v55 = vpop.permute.xlu2 %1045 }
 0x2be   :  { %v1053_v13 = vsel %vm249_vm8, %v1050_v52, %v1046_v55  ;;  %v1048_v10 = vpop.permute.xlu0 %1047 }
 0x2bf   :  { %v1057_v3 = vmul.f32 %v1054_v51, %v1053_v13  ;;  %v1051_v27 = vsel %vm249_vm8, %v1048_v10, %v1050_v52  ;;  %v1052_v33 = vsel %vm249_vm8, %v1046_v55, %v1048_v10  ;;  %v1080_v51 = vperm.slane %v2916_v0, 2 }
 0x2c0   :  { %v1059_v34 = vmul.f32 %v1056_v19, %v1051_v27  ;;  %v1058_v42 = vmul.f32 %v1055_v25, %v1052_v33  ;;  %v1106_v55 = vperm.slane %v2934_v9, 3  ;;  %v1079_v27 = vperm.slane %v2929_v8, 2 }
 0x2c1   :  { %v1064_v37 = vmul.f32 %v1062_v15, %v1057_v3 }
 0x2c2   :  { %v1066_v52 = vmul.f32 %v1062_v15, %v1059_v34  ;;  %v1104_v34 = vperm.slane %v2929_v8, 3 }
 0x2c3   :  { %v2951_v30 = vadd.f32 %v1064_v37, %v1042_v14  ;;  %v1065_v37 = vmul.f32 %v1062_v15, %v1058_v42 }
 0x2c4   :  { %v1075_v53 = vpop.permute.xlu1 %1074  ;;  %v1069_v15 = vadd.f32 %v1066_v52, %v1044_v49  ;;  %v1156_v49 = vperm.slane %v2934_v9, 6 }
 0x2c5   :  { %v1073_v21 = vpop.permute.xlu2 %1072 }
 0x2c6   :  { %v1071_v24 = vpop.permute.xlu0 %1070  ;;  %v1076_v14 = vsel %vm271_vm11, %v1073_v21, %v1075_v53 }
 0x2c7   :  { %v1077_v13 = vsel %vm271_vm11, %v1071_v24, %v1073_v21  ;;  %v1084_v10 = vmul.f32 %v1081_v43, %v1076_v14  ;;  %v1131_v21 = vperm.slane %v2934_v9, 5  ;;  %v1068_v43 = vadd.f32 %v1065_v37, %v2937_v20 }
 0x2c8   :  { %v1083_v25 = vmul.f32 %v1080_v51, %v1077_v13 }
 0x2c9   :  { %v1091_v51 = vmul.f32 %v2832_v50, %v1084_v10 }
 0x2ca   :  { %v1090_v52 = vmul.f32 %v2832_v50, %v1083_v25  ;;  %v1180_v25 = vperm.slane %v2916_v0, 7 }
 0x2cb   :  { %v1094_v45 = vadd.f32 %v1091_v51, %v1069_v15  ;;  %v1154_v15 = vperm.slane %v2929_v8, 6 }
 0x2cc   :  { %v1098_v62 = vpop.permute.xlu1 %1097 }
 0x2cd   :  { %v1096_v61 = vpop.permute.xlu2 %1095 }
 0x2ce   :  { %v1121_v3 = vpop.permute.xlu0 %1120  ;;  %v1102_v19 = vsel %vm290_vm12, %v1096_v61, %v1098_v62 }
 0x2cf   :  { %v1108_v14 = vmul.f32 %v1105_v41, %v1102_v19 }
 0x2d1   :  { %v1115_v10 = vmul.f32 %v2960_v39, %v1108_v14 }
 0x2d4   :  { %v1125_v6 = vpop.permute.xlu1 %1124 }
 0x2d5   :  { %v1100_v2 = vpop.permute.xlu2 %1099  ;;  %v1128_v20 = vsel %vm309_vm13, %v1125_v6, %v1121_v3 }
 0x2d6   :  { %v1101_v1 = vsel %vm290_vm12, %v1098_v62, %v1100_v2  ;;  %v1078_v62 = vsel %vm271_vm11, %v1075_v53, %v1071_v24  ;;  %v1155_v24 = vperm.slane %v2916_v0, 6  ;;  %v1103_v37 = vsel %vm290_vm12, %v1100_v2, %v1096_v61 }
 0x2d7   :  { %v1109_v42 = vmul.f32 %v1106_v55, %v1101_v1  ;;  %v1082_v55 = vmul.f32 %v1079_v27, %v1078_v62  ;;  %v1134_v58 = vmul.f32 %v1131_v21, %v1128_v20  ;;  %v1171_v27 = vpop.permute.xlu0 %1170  ;;  %v1093_v2 = vadd.f32 %v1090_v52, %v1068_v43 }
 0x2d9   :  { %v1116_v41 = vmul.f32 %v2960_v39, %v1109_v42  ;;  %v1107_v42 = vmul.f32 %v1104_v34, %v1103_v37  ;;  %v1118_v21 = vadd.f32 %v1115_v10, %v1093_v2  ;;  %v1141_v52 = vmul.f32 %v2835_v17, %v1134_v58 }
 0x2dc   :  { %v2970_v11 = vpop.permute.xlu1 %1147 }
 0x2dd   :  { %v2968_v7 = vpop.permute.xlu2 %1122 }
 0x2de   :  { %v1126_v13 = vsel %vm309_vm13, %v2968_v7, %v1125_v6  ;;  %v1181_v6 = vperm.slane %v2934_v9, 7  ;;  %v1127_v51 = vsel %vm309_vm13, %v1121_v3, %v2968_v7 }
 0x2df   :  { %v1133_v19 = vmul.f32 %v1130_v40, %v1126_v13  ;;  %v1089_v40 = vmul.f32 %v2832_v50, %v1082_v55  ;;  %v1119_v13 = vadd.f32 %v1116_v41, %v1094_v45  ;;  %v1179_v45 = vperm.slane %v2929_v8, 7 }
 0x2e0   :  { %v1114_v50 = vmul.f32 %v2960_v39, %v1107_v42  ;;  %v1206_v55 = vperm.slane %v2700_v36, 0  ;;  %v1132_v7 = vmul.f32 %v1129_v48, %v1127_v51  ;;  %v1204_v39 = vperm.slane %v2706_v38, 0 }
 0x2e1   :  { %v1144_v58 = vadd.f32 %v1141_v52, %v1119_v13  ;;  %v1092_v2 = vadd.f32 %v1089_v40, %v2951_v30 }
 0x2e2   :  { %v1139_v42 = vmul.f32 %v2835_v17, %v1132_v7 }
 0x2e4   :  { %v1175_v28 = vpop.permute.xlu1 %1174 }
 0x2e5   :  { %v2972_v22 = vpop.permute.xlu2 %1145 }
 0x2e6   :  { %v1152_v3 = vsel %vm328_vm15, %v2972_v22, %v2970_v11 }
 0x2ec   :  { %v2999_v33 = vpop.permute.xlu1 %1197 }
 0x2ed   :  { %v1150_v29 = vpop.permute.xlu2 %1149 }
 0x2ee   :  { %v1153_v53 = vsel %vm328_vm15, %v1150_v29, %v2972_v22  ;;  %v1151_v1 = vsel %vm328_vm15, %v2970_v11, %v1150_v29  ;;  %v1178_v29 = vsel %vm347_vm14, %v1175_v28, %v1171_v27  ;;  %v1157_v22 = vmul.f32 %v1154_v15, %v1152_v3 }
 0x2ef   :  { %v1159_v62 = vmul.f32 %v1156_v49, %v1153_v53  ;;  %v1158_v14 = vmul.f32 %v1155_v24, %v1151_v1  ;;  %v1140_v49 = vmul.f32 %v2835_v17, %v1133_v19  ;;  %v1205_v24 = vperm.slane %v2695_v35, 0 }
 0x2f0   :  { %v1164_v15 = vmul.f32 %v2966_v4, %v1157_v22  ;;  %v258_v22 = vrot.slane %v2934_v9, 1 }
 0x2f1   :  { %v1166_v20 = vmul.f32 %v2966_v4, %v1159_v62  ;;  %v1165_v53 = vmul.f32 %v2966_v4, %v1158_v14  ;;  %v1143_v41 = vadd.f32 %v1140_v49, %v1118_v21  ;;  %v1117_v49 = vadd.f32 %v1114_v50, %v1092_v2  ;;  %v788_v4 = vpop.f32.mrf.mxu2 }
 0x2f3   :  { %v1169_v19 = vadd.f32 %v1166_v20, %v1144_v58  ;;  %v1142_v20 = vadd.f32 %v1139_v42, %v1117_v49  ;;  %v3126_v42 = vstv %s2215_s25  ;;  %v4331_v49 = vperm.slane %v2700_v36, 2  ;;  %s3398_s25 = sld [smem:[#allocation3 + $0x1a]] }
 0x2f4   :  { %v1187_v43 = vpop.permute.xlu1 %1186 }
 0x2f5   :  { %v2992_v63 = vpop.permute.xlu2 %1172  ;;  %v1167_v17 = vadd.f32 %v1164_v15, %v1142_v20 }
 0x2f6   :  { %v1176_v61 = vsel %vm347_vm14, %v2992_v63, %v1175_v28  ;;  %v1184_v28 = vmul.f32 %v1181_v6, %v1178_v29  ;;  %v1177_v6 = vsel %vm347_vm14, %v1171_v27, %v2992_v63  ;;  %v1212_v29 = vpop.permute.xlu0 %1211 }
 0x2f7   :  { %v1183_v34 = vmul.f32 %v1180_v25, %v1176_v61  ;;  %v1168_v25 = vadd.f32 %v1165_v53, %v1143_v41  ;;  %v1182_v27 = vmul.f32 %v1179_v45, %v1177_v6 }
 0x2f8   :  { %v1191_v37 = vmul.f32 %v1187_v43, %v1184_v28 }
 0x2f9   :  { %v1190_v1 = vmul.f32 %v1187_v43, %v1183_v34  ;;  %v1189_v30 = vmul.f32 %v1187_v43, %v1182_v27 }
 0x2fa   :  { %v1194_v14 = vadd.f32 %v1191_v37, %v1169_v19 }
 0x2fb   :  { %v1193_v51 = vadd.f32 %v1190_v1, %v1168_v25  ;;  %v1192_v53 = vadd.f32 %v1189_v30, %v1167_v17  ;;  %v3117_v25 = vstv %s2214_s4  ;;  %v3162_v17 = vstv %s2216_s7  ;;  %s3390_s4 = sld [smem:[#allocation3 + $0x11]] }
 0x2fc   :  { %s3427_s7 = sld [smem:[#allocation3 + $0x8]] }
 0x2fd   :  { %v1196_v46 = vpop.permute.xlu2 %1195 }
 0x2fe   :  { %v1202_v63 = vsel %vm366_vm3, %v1196_v46, %v2999_v33  ;;  %v233_v58 = vpop.permute.xlu0 %232 }
 0x2ff   :  { %v1207_v34 = vmul.f32 %v1204_v39, %v1202_v63 }
 0x301   :  { %v1214_v40 = vmul.f32 %v1212_v29, %v1207_v34 }
 0x305   :  { %v1200_v10 = vpop.permute.xlu2 %1199 }
 0x306   :  { %v1201_v48 = vsel %vm366_vm3, %v2999_v33, %v1200_v10  ;;  %v1203_v11 = vsel %vm366_vm3, %v1200_v10, %v1196_v46  ;;  %v1217_v46 = vadd.f32 %v1214_v40, %v1192_v53  ;;  %v792_v33 = vrot.slane %v788_v4, 4  ;;  %v3108_v39 = vpop.permute.xlu0 %245 }
 0x307   :  { %v1208_v62 = vmul.f32 %v1205_v24, %v1201_v48  ;;  %v1209_v61 = vmul.f32 %v1206_v55, %v1203_v11  ;;  %v4327_v10 = vperm.slane %v2706_v38, 2 }
 0x308   :  { %v794_v43 = vadd.f32 %v792_v33, %v2956_v44  ;;  %v256_v33 = vrot.slane %v2929_v8, 1 }
 0x309   :  { %v1215_v13 = vmul.f32 %v1212_v29, %v1208_v62  ;;  %v1216_v21 = vmul.f32 %v1212_v29, %v1209_v61 }
 0x30b   :  { %v1219_v52 = vadd.f32 %v1216_v21, %v1194_v14  ;;  %v1218_v28 = vadd.f32 %v1215_v13, %v1193_v51  ;;  %v4330_v21 = vperm.slane %v2695_v35, 2 }
 0x30d   :  { %1224 = vrot.lane.b32.xlu1 %v1219_v52, %s2503_s19  ;;  %1222 = vrot.lane.b32.xlu2 %v1218_v28, %s2503_s19  ;;  %v277_v28 = vrot.slane %v2934_v9, 2 }
 0x30e   :  { %v3112_v48 = vpop.permute.xlu0 %267 }
 0x315   :  { %230 = vrot.lane.b32.xlu1 %v2791_v16, %s2515_s27  ;;  %1220 = vrot.lane.b32.xlu2 %v1217_v46, %s2503_s19 }
 0x316   :  { %v3148_v20 = vpop.permute.xlu0 %286 }
 0x31d   :  { %243 = vrot.lane.b32.xlu1 %v2791_v16, %s2514_s26  ;;  %234 = vrot.lane.b32.xlu2 %v2797_v26, %s2515_s27  ;;  %s3150_s27 = sld [smem:[#allocation3 + $0x16]] }
 0x325   :  { %265 = vrot.lane.b32.xlu1 %v2791_v16, %s2516_s30  ;;  %247 = vrot.lane.b32.xlu2 %v2797_v26, %s2514_s26  ;;  %s3146_s26 = sld [smem:[#allocation3 + $0xd]] }
 0x32d   :  { %284 = vrot.lane.b32.xlu1 %v2791_v16, %s2517_s15  ;;  %269 = vrot.lane.b32.xlu2 %v2797_v26, %s2516_s30  ;;  %s2217_s30 = sld [smem:[#allocation3 + $0xc]] }
 0x335   :  { %303 = vrot.lane.b32.xlu1 %v2791_v16, %s2518_s1  ;;  %288 = vrot.lane.b32.xlu2 %v2797_v26, %s2517_s15  ;;  %s3166_s15 = sld [smem:[#allocation3 + $0x1]] }
 0x33d   :  { %322 = vrot.lane.b32.xlu1 %v2791_v16, %s2521_s16  ;;  %307 = vrot.lane.b32.xlu2 %v2797_v26, %s2518_s1  ;;  %s3168_s1 = sld [smem:[#allocation3 + $0x13]] }
 0x33e   :  { %v820_v45 = vpop.f32.mrf.mxu2 }
 0x33f   :  { %v824_v50 = vrot.slane %v820_v45, 4  ;;  %v296_v45 = vrot.slane %v2934_v9, 3 }
 0x341   :  { %v826_v24 = vadd.f32 %v824_v50, %v794_v43  ;;  %v257_v43 = vrot.slane %v2916_v0, 1 }
 0x343   :  { %v827_v55 = vmax.f32 %v826_v24, 0.0 }
 0x345   :  { %341 = vrot.lane.b32.xlu1 %v2791_v16, %s2520_s3  ;;  %326 = vrot.lane.b32.xlu2 %v2797_v26, %s2521_s16  ;;  %v837_v7 = vrot.slane %v827_v55, 4  ;;  %s3178_s16 = sld [smem:[#allocation3 + $0x14]] }
 0x347   :  { %2239 = vmatpush.msk.msra.mxu2 %vm863_vm2, %v837_v7 }
 0x34d   :  { %360 = vrot.lane.b32.xlu1 %v2791_v16, %s2522_s13  ;;  %345 = vrot.lane.b32.xlu2 %v2797_v26, %s2520_s3  ;;  %s3174_s3 = sld [smem:[#allocation3 + $0x2]] }
 0x355   :  { %364 = vrot.lane.b32.xlu2 %v2797_v26, %s2522_s13  ;;  %s3183_s13 = sld [smem:[#allocation3 + $0x3]] }
 0x367   :  { %v1223_v3 = vpop.permute.xlu2 %1222 }
 0x36f   :  { %v1221_v37 = vpop.permute.xlu2 %1220 }
 0x370   :  { %v1227_v41 = vsel %vm79_vm0, %v1221_v37, %v1223_v3 }
 0x371   :  { %v1229_v1 = vsub.f32 %v1227_v41, %v2841_v31  ;;  %v3199_v41 = vpop.permute.xlu0 %305 }
 0x373   :  { %v1232_v44 = vmul.f32 %v1229_v1, %v4327_v10 }
 0x375   :  { %v1235_v19 = vpack.c.bf16 %v1232_v44, %v1232_v44 }
 0x377   :  { %1246 = vmatmul.bf16.vlgmr.msrb.gmra.mxu1 %v1235_v19  ;;  %v235_v6 = vpop.permute.xlu2 %234 }
 0x378   :  { %v237_v11 = vsel %vm236_vm7, %v233_v58, %v235_v6 }
 0x379   :  { %v3120_v31 = vmul.f32 %v237_v11, %v2934_v9  ;;  %v3216_v11 = vstv %s2217_s30 }
 0x37b   :  { %4328 = vst [vmem:[#allocation15_spill] sm:$0xff] %v3120_v31  ;;  %v446_v13 = vmul.f32 %v3117_v25, %v3120_v31 }
 0x37f   :  { %v1225_v62 = vpop.permute.xlu1 %1224  ;;  %v248_v38 = vpop.permute.xlu2 %247 }
 0x380   :  { %v1226_v61 = vsel %vm79_vm0, %v1223_v3, %v1225_v62  ;;  %v1228_v2 = vsel %vm79_vm0, %v1225_v62, %v1221_v37  ;;  %v250_v29 = vsel %vm249_vm8, %v3108_v39, %v248_v38  ;;  %v472_v37 = vstv %s3146_s26 }
 0x381   :  { %v1230_v14 = vsub.f32 %v1226_v61, %v2843_v54  ;;  %v1231_v63 = vsub.f32 %v1228_v2, %v2845_v56  ;;  %v3133_v27 = vmul.f32 %v258_v22, %v250_v29  ;;  %v3229_v62 = vstv %s3150_s27 }
 0x382   :  { %v3236_v61 = vmul.f32 %v472_v37, %v2791_v16 }
 0x383   :  { %4329 = vst [vmem:[#allocation16_spill] sm:$0xff] %v3133_v27  ;;  %v1233_v51 = vmul.f32 %v1230_v14, %v4330_v21  ;;  %v1234_v15 = vmul.f32 %v1231_v63, %v4331_v49  ;;  %v451_v34 = vmul.f32 %v3126_v42, %v3133_v27 }
 0x385   :  { %v1236_v54 = vpack.c.bf16 %v1233_v51, %v1233_v51  ;;  %v1237_v52 = vpack.c.bf16 %v1234_v15, %v1234_v15  ;;  %v454_v56 = vadd.f32 %v451_v34, %v446_v13  ;;  %v3249_v13 = vstv %s3166_s15 }
 0x386   :  { %v3254_v51 = vmul.f32 %v472_v37, %v2793_v18  ;;  %v275_v15 = vrot.slane %v2929_v8, 2  ;;  %v276_v34 = vrot.slane %v2916_v0, 2 }
 0x387   :  { %v231_v35 = vpop.permute.xlu1 %230  ;;  %1259 = vmatmul.bf16.vlgmr.msrb.gmra.mxu3 %v1236_v54  ;;  %1272 = vmatmul.bf16.vlgmr.msrb.gmra.mxu0 %v1237_v52  ;;  %v3154_v36 = vpop.permute.xlu2 %269  ;;  %v374_v54 = vstv %s3152_s28  ;;  %v3268_v52 = vstv %s3156_s29 }
 0x388   :  { %v272_v30 = vsel %vm271_vm11, %v3112_v48, %v3154_v36  ;;  %v238_v53 = vsel %vm236_vm7, %v231_v35, %v233_v58  ;;  %v239_v46 = vsel %vm236_vm7, %v235_v6, %v231_v35  ;;  %v3196_v58 = vstv %s3143_s8  ;;  %4334 = vst [vmem:[#allocation19_spill] sm:$0xff] %v3268_v52 }
 0x389   :  { %v3164_v40 = vmul.f32 %v277_v28, %v272_v30  ;;  %v3186_v24 = vmul.f32 %v239_v46, %v2929_v8  ;;  %v3189_v55 = vmul.f32 %v238_v53, %v2916_v0  ;;  %v3273_v28 = vmul.f32 %v472_v37, %v2797_v26 }
 0x38a   :  { %v3279_v35 = vstv %s3174_s3  ;;  %v3282_v30 = vstv %s3178_s16  ;;  %v3285_v53 = vstv %s3183_s13 }
 0x38b   :  { %4332 = vst [vmem:[#allocation17_spill] sm:$0xff] %v3164_v40  ;;  %v459_v4 = vmul.f32 %v3162_v17, %v3164_v40  ;;  %v444_v2 = vmul.f32 %v3117_v25, %v3186_v24  ;;  %v445_v29 = vmul.f32 %v3117_v25, %v3189_v55  ;;  %v3258_v25 = vmul.f32 %v3229_v62, %v2793_v18 }
 0x38c   :  { %v376_v57 = vmul.f32 %v374_v54, %v3189_v55 }
 0x38d   :  { %v462_v50 = vadd.f32 %v459_v4, %v454_v56 }
 0x38f   :  { %v244_v7 = vpop.permute.xlu1 %243  ;;  %v3193_v3 = vpop.permute.xlu2 %288 }
 0x390   :  { %v251_v1 = vsel %vm249_vm8, %v244_v7, %v3108_v39  ;;  %v252_v10 = vsel %vm249_vm8, %v248_v38, %v244_v7  ;;  %v291_v44 = vsel %vm290_vm12, %v3148_v20, %v3193_v3  ;;  %v3226_v39 = vmul.f32 %v3196_v58, %v2793_v18 }
 0x391   :  { %v3212_v19 = vmul.f32 %v256_v33, %v252_v10  ;;  %v3214_v6 = vmul.f32 %v257_v43, %v251_v1  ;;  %v3218_v22 = vmul.f32 %v296_v45, %v291_v44  ;;  %v3233_v38 = vmul.f32 %v3196_v58, %v2791_v16  ;;  %v3304_v44 = vpop.permute.xlu0 %324 }
 0x392   :  { %v3276_v18 = vstv %s3168_s1  ;;  %v382_v33 = vmul.f32 %v3249_v13, %v3133_v27  ;;  %v3292_v43 = vstv %s3191_s17  ;;  %v377_v7 = vmul.f32 %v374_v54, %v3120_v31 }
 0x393   :  { %4333 = vst [vmem:[#allocation18_spill] sm:$0xff] %v3233_v38  ;;  %v449_v14 = vmul.f32 %v3126_v42, %v3212_v19  ;;  %v450_v63 = vmul.f32 %v3126_v42, %v3214_v6  ;;  %v467_v21 = vmul.f32 %v3216_v11, %v3218_v22  ;;  %v314_v10 = vrot.slane %v2916_v0, 5 }
 0x394   :  { %v313_v38 = vrot.slane %v2929_v8, 5 }
 0x395   :  { %v452_v42 = vadd.f32 %v449_v14, %v444_v2  ;;  %v453_v49 = vadd.f32 %v450_v63, %v445_v29  ;;  %v3270_v56 = vadd.f32 %v467_v21, %v462_v50  ;;  %v3307_v2 = vstv %s3210_s18 }
 0x396   :  { %v3310_v29 = vstv %s3220_s2  ;;  %v381_v14 = vmul.f32 %v3249_v13, %v3214_v6 }
 0x397   :  { %v266_v46 = vpop.permute.xlu1 %265  ;;  %v3287_v4 = vpop.permute.xlu2 %307 }
 0x398   :  { %v273_v45 = vsel %vm271_vm11, %v266_v46, %v3112_v48  ;;  %v274_v50 = vsel %vm271_vm11, %v3154_v36, %v266_v46  ;;  %v3313_v48 = vstv %s3222_s20  ;;  %v294_v36 = vrot.slane %v2929_v8, 3 }
 0x399   :  { %v3301_v37 = vmul.f32 %v275_v15, %v274_v50  ;;  %v282_v1 = vmul.f32 %v276_v34, %v273_v45  ;;  %v295_v15 = vrot.slane %v2916_v0, 3  ;;  %v385_v34 = vadd.f32 %v382_v33, %v377_v7 }
 0x39a   :  { %v333_v46 = vrot.slane %v2916_v0, 6  ;;  %v3324_v45 = vstv %s3246_s21  ;;  %v3327_v50 = vstv %s3260_s6  ;;  %v390_v33 = vmul.f32 %v3279_v35, %v3164_v40 }
 0x39b   :  { %v457_v63 = vmul.f32 %v3162_v17, %v3301_v37  ;;  %v458_v21 = vmul.f32 %v3162_v17, %v282_v1  ;;  %v3338_v17 = vmul.f32 %v374_v54, %v3186_v24  ;;  %v519_v7 = vmul.f32 %v3276_v18, %v3214_v6 }
 0x39c   :  { %v389_v12 = vmul.f32 %v3279_v35, %v282_v1  ;;  %v310_v54 = vsel %vm309_vm13, %v3199_v41, %v3287_v4  ;;  %v527_v6 = vmul.f32 %v3282_v30, %v282_v1  ;;  %v315_v1 = vrot.slane %v2934_v9, 5 }
 0x39d   :  { %v460_v59 = vadd.f32 %v457_v63, %v452_v42  ;;  %v461_v47 = vadd.f32 %v458_v21, %v453_v49  ;;  %v3349_v42 = vmul.f32 %v3268_v52, %v3186_v24  ;;  %v514_v49 = vmul.f32 %v3268_v52, %v3189_v55 }
 0x39e   :  { %v384_v63 = vadd.f32 %v381_v14, %v376_v57  ;;  %v3374_v40 = vadd.f32 %v390_v33, %v385_v34  ;;  %v320_v31 = vmul.f32 %v314_v10, %v310_v54  ;;  %v352_v34 = vrot.slane %v2916_v0, 7 }
 0x39f   :  { %v285_v21 = vpop.permute.xlu1 %284  ;;  %v3357_v5 = vpop.permute.xlu2 %326  ;;  %v3385_v33 = vstv %s3329_s9  ;;  %v332_v54 = vrot.slane %v2929_v8, 6  ;;  %v518_v0 = vmul.f32 %v3276_v18, %v3212_v19 }
 0x3a0   :  { %v292_v23 = vsel %vm290_vm12, %v285_v21, %v3148_v20  ;;  %v293_v24 = vsel %vm290_vm12, %v3193_v3, %v285_v21  ;;  %v329_v57 = vsel %vm328_vm15, %v3304_v44, %v3357_v5  ;;  %v522_v20 = vadd.f32 %v519_v7, %v514_v49 }
 0x3a1   :  { %v3370_v55 = vmul.f32 %v294_v36, %v293_v24  ;;  %v301_v14 = vmul.f32 %v295_v15, %v292_v23  ;;  %v392_v52 = vadd.f32 %v389_v12, %v384_v63  ;;  %v339_v24 = vmul.f32 %v333_v46, %v329_v57  ;;  %v3380_v23 = vpop.permute.xlu0 %343 }
 0x3a2   :  { %v530_v15 = vadd.f32 %v527_v6, %v522_v20  ;;  %v3388_v49 = vstv %s3335_s23  ;;  %v3395_v63 = vstv %s3345_s24 }
 0x3a3   :  { %v397_v3 = vmul.f32 %v3285_v53, %v301_v14  ;;  %v465_v21 = vmul.f32 %v3216_v11, %v3370_v55  ;;  %v466_v36 = vmul.f32 %v3216_v11, %v301_v14  ;;  %v535_v27 = vmul.f32 %v3292_v43, %v301_v14 }
 0x3a4   :  { %v380_v11 = vmul.f32 %v3249_v13, %v3212_v19 }
 0x3a5   :  { %v400_v12 = vadd.f32 %v397_v3, %v392_v52  ;;  %v468_v10 = vadd.f32 %v465_v21, %v460_v59  ;;  %v469_v7 = vadd.f32 %v466_v36, %v461_v47  ;;  %v538_v46 = vadd.f32 %v535_v27, %v530_v15 }
 0x3a6   :  { %v482_v59 = vmul.f32 %v3310_v29, %v320_v31  ;;  %v490_v52 = vmul.f32 %v3327_v50, %v339_v24  ;;  %v551_v21 = vmul.f32 %v3313_v48, %v320_v31  ;;  %v334_v36 = vrot.slane %v2934_v9, 6 }
 0x3a7   :  { %v477_v47 = vadd.f32 %v3254_v51, %v469_v7  ;;  %v304_v6 = vpop.permute.xlu1 %303  ;;  %v3405_v57 = vpop.permute.xlu2 %345  ;;  %v408_v27 = vadd.f32 %v3226_v39, %v400_v12  ;;  %v546_v13 = vadd.f32 %v3258_v25, %v538_v46  ;;  %v398_v25 = vmul.f32 %v3285_v53, %v3218_v22 }
 0x3a8   :  { %v311_v14 = vsel %vm309_vm13, %v304_v6, %v3199_v41  ;;  %v312_v19 = vsel %vm309_vm13, %v3287_v4, %v304_v6  ;;  %v348_v39 = vsel %vm347_vm14, %v3380_v23, %v3405_v57  ;;  %v383_v12 = vadd.f32 %v380_v11, %v3338_v17 }
 0x3a9   :  { %v485_v20 = vadd.f32 %v482_v59, %v477_v47  ;;  %v3415_v3 = vmul.f32 %v313_v38, %v311_v14  ;;  %v3417_v51 = vmul.f32 %v315_v1, %v312_v19  ;;  %v358_v41 = vmul.f32 %v352_v34, %v348_v39  ;;  %v3440_v6 = vpop.permute.xlu0 %362 }
 0x3aa   :  { %v413_v38 = vmul.f32 %v3307_v2, %v320_v31  ;;  %v476_v1 = vadd.f32 %v3236_v61, %v468_v10  ;;  %v478_v7 = vadd.f32 %v3273_v28, %v3270_v56  ;;  %v554_v46 = vadd.f32 %v551_v21, %v546_v13  ;;  %v3469_v21 = vld [vmem:[%s4299_s12 + $0x20] sm:$0x7] }
 0x3ab   :  { %v493_v4 = vadd.f32 %v490_v52, %v485_v20  ;;  %v481_v15 = vmul.f32 %v3310_v29, %v3415_v3  ;;  %v483_v34 = vmul.f32 %v3310_v29, %v3417_v51  ;;  %v521_v59 = vadd.f32 %v518_v0, %v3349_v42 }
 0x3ac   :  { %v498_v31 = vmul.f32 %v3388_v49, %v358_v41  ;;  %v416_v52 = vadd.f32 %v413_v38, %v408_v27  ;;  %v559_v61 = vmul.f32 %v3333_v60, %v339_v24  ;;  %v3444_v14 = vstv %s3390_s4 }
 0x3ad   :  { %v484_v47 = vadd.f32 %v481_v15, %v476_v1  ;;  %v486_v10 = vadd.f32 %v483_v34, %v478_v7  ;;  %v3447_v17 = vstv %s3398_s25  ;;  %v421_v56 = vmul.f32 %v3324_v45, %v339_v24 }
 0x3ae   :  { %v429_v28 = vmul.f32 %v3385_v33, %v358_v41  ;;  %v567_v29 = vmul.f32 %v3395_v63, %v358_v41  ;;  %v501_v0 = vadd.f32 %v498_v31, %v493_v4  ;;  %v562_v19 = vadd.f32 %v559_v61, %v554_v46 }
 0x3af   :  { %v323_v42 = vpop.permute.xlu1 %322  ;;  %v3452_v11 = vpop.permute.xlu2 %364  ;;  %v424_v41 = vadd.f32 %v421_v56, %v416_v52  ;;  %v351_v38 = vrot.slane %v2929_v8, 7  ;;  %v353_v4 = vrot.slane %v2934_v9, 7  ;;  %v3477_v1 = vstv %s3427_s7 }
 0x3b0   :  { %v330_v27 = vsel %vm328_vm15, %v323_v42, %v3304_v44  ;;  %v331_v13 = vsel %vm328_vm15, %v3357_v5, %v323_v42  ;;  %v367_v24 = vsel %vm366_vm3, %v3440_v6, %v3452_v11  ;;  %v526_v5 = vmul.f32 %v3282_v30, %v3301_v37 }
 0x3b1   :  { %v338_v20 = vmul.f32 %v332_v54, %v330_v27  ;;  %v3464_v39 = vmul.f32 %v334_v36, %v331_v13  ;;  %v371_v44 = vmul.f32 %v3469_v21, %v367_v24  ;;  %v388_v54 = vmul.f32 %v3279_v35, %v3301_v37 }
 0x3b2   :  { %v396_v36 = vmul.f32 %v3285_v53, %v3370_v55  ;;  %v534_v34 = vmul.f32 %v3292_v43, %v3370_v55  ;;  %v570_v46 = vadd.f32 %v567_v29, %v562_v19  ;;  %v432_v61 = vadd.f32 %v429_v28, %v424_v41  ;;  %v4338_v19 = vld [vmem:[#allocation17_spill] sm:$0xff] }
 0x3b3   :  { %v489_v15 = vmul.f32 %v3327_v50, %v338_v20  ;;  %v491_v7 = vmul.f32 %v3327_v50, %v3464_v39  ;;  %v506_v8 = vmul.f32 %v3444_v14, %v371_v44  ;;  %v575_v9 = vmul.f32 %v3447_v17, %v371_v44 }
 0x3b4   :  { %v437_v35 = vmul.f32 %v3477_v1, %v371_v44  ;;  %v401_v53 = vadd.f32 %v398_v25, %v3374_v40  ;;  %v529_v37 = vadd.f32 %v526_v5, %v521_v59  ;;  %v542_v56 = vmul.f32 %v3229_v62, %v2791_v16 }
 0x3b5   :  { %v492_v31 = vadd.f32 %v489_v15, %v484_v47  ;;  %v494_v52 = vadd.f32 %v491_v7, %v486_v10  ;;  %v578_v50 = vadd.f32 %v575_v9, %v570_v46  ;;  %v391_v42 = vadd.f32 %v388_v54, %v383_v12  ;;  %v4335_v47 = vld [vmem:[#allocation16_spill] sm:$0xff]  ;;  %v4339_v7 = vld [vmem:[#allocation18_spill] sm:$0xff] }
 0x3b6   :  { %v406_v55 = vmul.f32 %v3196_v58, %v2797_v26  ;;  %v440_v29 = vadd.f32 %v437_v35, %v432_v61  ;;  %v3496_v13 = vadd.f32 %v506_v8, %v501_v0  ;;  %v520_v10 = vmul.f32 %v3276_v18, %v4335_v47  ;;  %v4336_v18 = vld [vmem:[#allocation15_spill] sm:$0xff] }
 0x3b7   :  { %v342_v27 = vpop.permute.xlu1 %341  ;;  %v537_v28 = vadd.f32 %v534_v34, %v529_v37  ;;  %606 = vrot.lane.b32.xlu2 %v578_v50, %s2503_s19  ;;  %v399_v25 = vadd.f32 %v396_v36, %v391_v42  ;;  %v414_v58 = vmul.f32 %v3307_v2, %v3417_v51  ;;  %v4337_v0 = vld [vmem:[#allocation19_spill] sm:$0xff]  ;;  %v412_v41 = vmul.f32 %v3307_v2, %v3415_v3 }
 0x3b8   :  { %v349_v40 = vsel %vm347_vm14, %v342_v27, %v3380_v23  ;;  %v350_v16 = vsel %vm347_vm14, %v3405_v57, %v342_v27  ;;  %582 = vrot.lane.b32.xlu0 %v440_v29, %s2503_s19  ;;  %v515_v24 = vmul.f32 %v4337_v0, %v4336_v18  ;;  %v528_v23 = vmul.f32 %v3282_v30, %v4338_v19 }
 0x3b9   :  { %v357_v12 = vmul.f32 %v351_v38, %v349_v40  ;;  %v359_v59 = vmul.f32 %v353_v4, %v350_v16  ;;  %v409_v44 = vadd.f32 %v406_v55, %v401_v53  ;;  %v550_v57 = vmul.f32 %v3313_v48, %v3415_v3 }
 0x3ba   :  { %v422_v5 = vmul.f32 %v3324_v45, %v3464_v39  ;;  %v523_v54 = vadd.f32 %v520_v10, %v515_v24  ;;  %v536_v36 = vmul.f32 %v3292_v43, %v3218_v22  ;;  %v545_v15 = vadd.f32 %v542_v56, %v537_v28 }
 0x3bb   :  { %v497_v38 = vmul.f32 %v3388_v49, %v357_v12  ;;  %v499_v4 = vmul.f32 %v3388_v49, %v359_v59  ;;  %v558_v30 = vmul.f32 %v3333_v60, %v338_v20  ;;  %v407_v34 = vadd.f32 %v4339_v7, %v399_v25  ;;  %v1278_v7 = vld [vmem:[%s4297_s10] sm:$0xff] }
 0x3bc   :  { %v417_v8 = vadd.f32 %v414_v58, %v409_v44  ;;  %v553_v2 = vadd.f32 %v550_v57, %v545_v15  ;;  %v420_v3 = vmul.f32 %v3324_v45, %v338_v20  ;;  %v430_v61 = vmul.f32 %v3385_v33, %v359_v59  ;;  %v3539_v45 = vld [vmem:[%s4299_s12 + $0x18] sm:$0x7]  ;;  %v832_v57 = vld [vmem:[%s4292_s5 + $0x20] sm:$0xff]  ;;  %v834_v15 = vld [vmem:[%s4292_s5 + $0x30] sm:$0xff] }
 0x3bd   :  { %v502_v46 = vadd.f32 %v499_v4, %v494_v52  ;;  %v500_v9 = vadd.f32 %v497_v38, %v492_v31  ;;  %v566_v35 = vmul.f32 %v3395_v63, %v357_v12  ;;  %v531_v49 = vadd.f32 %v528_v23, %v523_v54 }
 0x3be   :  { %v415_v53 = vadd.f32 %v412_v41, %v407_v34  ;;  %v425_v50 = vadd.f32 %v422_v5, %v417_v8  ;;  %v428_v22 = vmul.f32 %v3385_v33, %v357_v12  ;;  %v561_v52 = vadd.f32 %v558_v30, %v553_v2  ;;  %v3545_v33 = vld [vmem:[%s4299_s12 + $0x28] sm:$0x7]  ;;  %v835_v8 = vld [vmem:[%s4292_s5 + $0x38] sm:$0xff] }
 0x3bf   :  { %v361_v37 = vpop.permute.xlu1 %360  ;;  %v544_v28 = vmul.f32 %v3229_v62, %v2797_v26  ;;  %v552_v40 = vmul.f32 %v3313_v48, %v3417_v51  ;;  %v560_v24 = vmul.f32 %v3333_v60, %v3464_v39  ;;  %v568_v62 = vmul.f32 %v3395_v63, %v359_v59  ;;  %v828_v60 = vld [vmem:[%s4292_s5] sm:$0xff]  ;;  %v829_v63 = vld [vmem:[%s4292_s5 + $0x8] sm:$0xff]  ;;  %v831_v59 = vld [vmem:[%s4292_s5 + $0x18] sm:$0xff] }
 0x3c0   :  { %v368_v43 = vsel %vm366_vm3, %v361_v37, %v3440_v6  ;;  %v369_v31 = vsel %vm366_vm3, %v3452_v11, %v361_v37  ;;  %v539_v6 = vadd.f32 %v536_v36, %v531_v49  ;;  %v433_v42 = vadd.f32 %v430_v61, %v425_v50  ;;  %2240 = vmatmul.msk.f32.vlgmr.msra.gmra.mxu2 %vm838_vm4, %v828_v60  ;;  %v833_v5 = vld [vmem:[%s4292_s5 + $0x28] sm:$0xff]  ;;  %v1281_v2 = vld [vmem:[%s4297_s10 + $0x18] sm:$0xff] }
 0x3c1   :  { %v370_v20 = vmul.f32 %v3539_v45, %v368_v43  ;;  %v372_v56 = vmul.f32 %v3545_v33, %v369_v31  ;;  %v569_v55 = vadd.f32 %v566_v35, %v561_v52  ;;  %v423_v27 = vadd.f32 %v420_v3, %v415_v53  ;;  %v1282_v3 = vld [vmem:[%s4297_s10 + $0x20] sm:$0xff]  ;;  %v1283_v61 = vld [vmem:[%s4297_s10 + $0x28] sm:$0xff]  ;;  %v1284_v35 = vld [vmem:[%s4297_s10 + $0x30] sm:$0xff] }
 0x3c2   :  { %v1285_v49 = vld [vmem:[%s4297_s10 + $0x38] sm:$0xff] }
 0x3c3   :  { %v505_v11 = vmul.f32 %v3444_v14, %v370_v20  ;;  %v507_v29 = vmul.f32 %v3444_v14, %v372_v56  ;;  %v438_v47 = vmul.f32 %v3477_v1, %v372_v56  ;;  %v574_v10 = vmul.f32 %v3447_v17, %v370_v20 }
 0x3c4   :  { %v431_v16 = vadd.f32 %v428_v22, %v423_v27  ;;  %v436_v25 = vmul.f32 %v3477_v1, %v370_v20  ;;  %v547_v14 = vadd.f32 %v544_v28, %v539_v6  ;;  %v576_v51 = vmul.f32 %v3447_v17, %v372_v56  ;;  %v830_v17 = vld [vmem:[%s4292_s5 + $0x10] sm:$0xff] }
 0x3c5   :  { %v441_v58 = vadd.f32 %v438_v47, %v433_v42  ;;  %v577_v12 = vadd.f32 %v574_v10, %v569_v55  ;;  %v3557_v18 = vadd.f32 %v507_v29, %v502_v46  ;;  %v3559_v0 = vadd.f32 %v505_v11, %v500_v9  ;;  %v1279_v46 = vld [vmem:[%s4297_s10 + $0x8] sm:$0xff]  ;;  %v1280_v9 = vld [vmem:[%s4297_s10 + $0x10] sm:$0xff] }
 0x3c6   :  { %v439_v19 = vadd.f32 %v436_v25, %v431_v16  ;;  %v555_v26 = vadd.f32 %v552_v40, %v547_v14 }
 0x3c7   :  { %584 = vrot.lane.b32.xlu0 %v441_v58, %s2503_s19  ;;  %604 = vrot.lane.b32.xlu2 %v577_v12, %s2503_s19 }
 0x3c8   :  { %580 = vrot.lane.b32.xlu1 %v439_v19, %s2503_s19  ;;  %v563_v48 = vadd.f32 %v560_v24, %v555_v26  ;;  %2241 = vmatmul.msk.f32.gmra.mxu2 %vm838_vm4, %v829_v63  ;;  %v4341_v63 = vld [vmem:[#allocation6_spill] sm:$0xff] }
 0x3ca   :  { %v571_v1 = vadd.f32 %v568_v62, %v563_v48 }
 0x3cc   :  { %v579_v23 = vadd.f32 %v576_v51, %v571_v1  ;;  %v4340_v51 = vld [vmem:[#allocation7_spill] sm:$0xff] }
 0x3d0   :  { %608 = vrot.lane.b32.xlu1 %v579_v23, %s2503_s19  ;;  %2242 = vmatmul.msk.f32.gmra.mxu2 %vm838_vm4, %v830_v17 }
 0x3d8   :  { %2243 = vmatmul.msk.f32.gmra.mxu2 %vm838_vm4, %v831_v59 }
 0x3e0   :  { %2244 = vmatmul.msk.f32.gmra.mxu2 %vm838_vm4, %v832_v57 }
 0x3e8   :  { %2245 = vmatmul.msk.f32.gmra.mxu2 %vm838_vm4, %v833_v5 }
 0x3f0   :  { %2246 = vmatmul.msk.f32.gmra.mxu2 %vm838_vm4, %v834_v15 }
 0x3f4   :  { %v1247_v39 = vpop.f32.mrf.mxu1 }
 0x3f8   :  { %2247 = vmatmul.msk.f32.gmra.mxu2 %vm838_vm4, %v835_v8 }
 0x3fc   :  { %v1249_v44 = vpop.f32.mrf.mxu1 }
 0x404   :  { %v1273_v41 = vpop.f32.mrf.mxu0 }
 0x40a   :  { %v1260_v38 = vpop.f32.mrf.mxu3 }
 0x40b   :  { %v1261_v4 = vadd.f32 %v1260_v38, %v1247_v39  ;;  %v4342_v39 = vld [vmem:[#allocation14_spill] sm:$0xff] }
 0x40c   :  { %v1275_v54 = vpop.f32.mrf.mxu0 }
 0x40d   :  { %v1274_v36 = vadd.f32 %v1273_v41, %v1261_v4 }
 0x40f   :  { %v1277_v30 = vmul.f32 0.015625, %v1274_v36 }
 0x411   :  { %2251 = vmatpush.msk.msra.mxu1 %vm863_vm2, %v1277_v30  ;;  %vm1682_vm2 = vcmask 1042432  }
 0x412   :  { %v1262_v34 = vpop.f32.mrf.mxu3  ;;  %2252 = vmatmul.msk.f32.vlgmr.msra.gmra.mxu1 %vm838_vm4, %v1278_v7  ;;  %v1690_v1 = vsel %vm1682_vm2, %v4340_v51, 0  ;;  %v1684_v17 = vsel %vm1682_vm2, %v4341_v63, 0  ;;  %v1687_v59 = vsel %vm1682_vm2, %v4342_v39, 0 }
 0x413   :  { %1757 = vmatpush.bf16.msrb.mxu2 %v1690_v1  ;;  %1699 = vmatpush.bf16.msra.mxu3 %v1684_v17 }
 0x414   :  { %1728 = vmatpush.bf16.msra.mxu0 %v1687_v59 }
 0x41a   :  { %2253 = vmatmul.msk.f32.gmra.mxu1 %vm838_vm4, %v1279_v46 }
 0x422   :  { %2254 = vmatmul.msk.f32.gmra.mxu1 %vm838_vm4, %v1280_v9 }
 0x42a   :  { %2255 = vmatmul.msk.f32.gmra.mxu1 %vm838_vm4, %v1281_v2 }
 0x432   :  { %2256 = vmatmul.msk.f32.gmra.mxu1 %vm838_vm4, %v1282_v3 }
 0x43a   :  { %2257 = vmatmul.msk.f32.gmra.mxu1 %vm838_vm4, %v1283_v61 }
 0x442   :  { %2258 = vmatmul.msk.f32.gmra.mxu1 %vm838_vm4, %v1284_v35 }
 0x443   :  { %v883_v53 = vpop.f32.mrf.mxu2 }
 0x444   :  { %v2260_v50 = vmul.f32 -1.442695, %v883_v53 }
 0x446   :  { %2391 = vpow2.f32 %v2260_v50 }
 0x44a   :  { %2259 = vmatmul.msk.f32.gmra.mxu1 %vm838_vm4, %v1285_v49 }
 0x44b   :  { %v886_v37 = vpop.f32.mrf.mxu2 }
 0x44c   :  { %v2261_v22 = vmul.f32 -1.442695, %v886_v37  ;;  %v2392_v31 = vpop.eup %2391 }
 0x44d   :  { %v3634_v20 = vadd.f32 1.0, %v2392_v31 }
 0x44e   :  { %2393 = vpow2.f32 %v2261_v22 }
 0x44f   :  { %2395 = vrcp.f32 %v3634_v20  ;;  %vm1391_vm5 = vweird.f32 %v3634_v20  ;;  %v1395_v5 = vand.u32 2147483647, %v3634_v20  ;;  %v1397_v36 = vand.u32 2147483648, %v3634_v20 }
 0x451   :  { %v1398_v49 = vor.u32 1.1754944e-38, %v1397_v36  ;;  %vm3695_vm12 = vcmp.eq.f32.partialorder %v1395_v5, 8.507059e+37 }
 0x453   :  { %v889_v43 = vpop.f32.mrf.mxu2 }
 0x454   :  { %v2394_v52 = vpop.eup %2393  ;;  %v2262_v42 = vmul.f32 -1.442695, %v889_v43 }
 0x455   :  { %v3636_v6 = vadd.f32 1.0, %v2394_v52  ;;  %v3640_v29 = vpop.eup %2395 }
 0x456   :  { %v1387_v40 = vmul.f32 %v3640_v29, %v3634_v20  ;;  %vm1392_vm6 = vweird.f32 %v3640_v29 }
 0x457   :  { %2397 = vrcp.f32 %v3636_v6  ;;  %vm1406_vm7 = vweird.f32 %v3636_v6  ;;  %vm3679_vm9 = vmor %vm1391_vm5, %vm1392_vm6  ;;  %v1410_v46 = vand.u32 2147483647, %v3636_v6  ;;  %v1412_v9 = vand.u32 2147483648, %v3636_v6 }
 0x458   :  { %2399 = vpow2.f32 %v2262_v42  ;;  %v1388_v26 = vsub.f32 1.0, %v1387_v40 }
 0x459   :  { %vm3705_vm13 = vcmp.eq.f32.partialorder %v1410_v46, 8.507059e+37  ;;  %v1413_v20 = vor.u32 1.1754944e-38, %v1412_v9 }
 0x45a   :  { %v1389_v44 = vmul.f32 %v3640_v29, %v1388_v26 }
 0x45b   :  { %v892_v56 = vpop.f32.mrf.mxu2 }
 0x45c   :  { %v2263_v11 = vmul.f32 -1.442695, %v892_v56  ;;  %v1390_v7 = vadd.f32 %v3640_v29, %v1389_v44 }
 0x45d   :  { %v3642_v10 = vpop.eup %2397 }
 0x45e   :  { %v2400_v28 = vpop.eup %2399  ;;  %v1402_v58 = vmul.f32 %v3642_v10, %v3636_v6  ;;  %vm1407_vm8 = vweird.f32 %v3642_v10  ;;  %v1394_v43 = vsel %vm3679_vm9, %v3640_v29, %v1390_v7 }
 0x45f   :  { %v3648_v12 = vadd.f32 1.0, %v2400_v28  ;;  %vm3689_vm11 = vmor %vm1406_vm7, %vm1407_vm8  ;;  %v1399_v40 = vsel %vm3695_vm12, %v1398_v49, %v1394_v43 }
 0x460   :  { %v1403_v48 = vsub.f32 1.0, %v1402_v58 }
 0x461   :  { %vm1421_vm4 = vweird.f32 %v3648_v12  ;;  %v1427_v1 = vand.u32 2147483648, %v3648_v12 }
 0x462   :  { %v1404_v38 = vmul.f32 %v3642_v10, %v1403_v48 }
 0x463   :  { %v895_v47 = vpop.f32.mrf.mxu2 }
 0x464   :  { %v2264_v62 = vmul.f32 -1.442695, %v895_v47  ;;  %v1405_v2 = vadd.f32 %v3642_v10, %v1404_v38 }
 0x46b   :  { %v898_v60 = vpop.f32.mrf.mxu2 }
 0x46c   :  { %v2265_v61 = vmul.f32 -1.442695, %v898_v60 }
 0x473   :  { %v901_v6 = vpop.f32.mrf.mxu2 }
 0x47b   :  { %v904_v8 = vpop.f32.mrf.mxu2 }
 0x48f   :  { %v1330_v55 = vpop.f32.mrf.mxu1 }
 0x490   :  { %v2268_v27 = vmul.f32 -1.442695, %v1330_v55 }
 0x492   :  { %2401 = vpow2.f32 %v2268_v27 }
 0x493   :  { %2403 = vpow2.f32 %v2263_v11  ;;  %v1409_v11 = vsel %vm3689_vm11, %v3642_v10, %v1405_v2 }
 0x494   :  { %v1414_v10 = vsel %vm3705_vm13, %v1413_v20, %v1409_v11 }
 0x497   :  { %v1333_v16 = vpop.f32.mrf.mxu1 }
 0x498   :  { %v2402_v25 = vpop.eup %2401  ;;  %v2269_v14 = vmul.f32 -1.442695, %v1333_v16 }
 0x499   :  { %v3650_v24 = vadd.f32 1.0, %v2402_v25  ;;  %v2404_v19 = vpop.eup %2403 }
 0x49a   :  { %2405 = vpow2.f32 %v2269_v14  ;;  %v3655_v23 = vadd.f32 1.0, %v2404_v19 }
 0x49b   :  { %2407 = vrcp.f32 %v3650_v24  ;;  %v1549_v58 = vand.u32 2147483648, %v3650_v24  ;;  %vm1543_vm15 = vweird.f32 %v3650_v24  ;;  %v1547_v19 = vand.u32 2147483647, %v3650_v24 }
 0x49c   :  { %2409 = vrcp.f32 %v3648_v12  ;;  %vm1436_vm12 = vweird.f32 %v3655_v23 }
 0x49d   :  { %2411 = vpow2.f32 %v2264_v62  ;;  %v1550_v39 = vor.u32 1.1754944e-38, %v1549_v58  ;;  %vm1548_vm6 = vcmp.eq.f32.partialorder %v1547_v19, 8.507059e+37  ;;  %v1440_v19 = vand.u32 2147483647, %v3655_v23 }
 0x49e   :  { %2413 = vrcp.f32 %v3655_v23 }
 0x49f   :  { %v1336_v57 = vpop.f32.mrf.mxu1 }
 0x4a0   :  { %v2406_v41 = vpop.eup %2405  ;;  %v2270_v4 = vmul.f32 -1.442695, %v1336_v57  ;;  %v2266_v57 = vmul.f32 -1.442695, %v901_v6  ;;  %v1428_v6 = vor.u32 1.1754944e-38, %v1427_v1 }
 0x4a1   :  { %v3664_v54 = vpop.eup %2407  ;;  %v3668_v15 = vadd.f32 1.0, %v2406_v41 }
 0x4a2   :  { %v3671_v30 = vpop.eup %2409  ;;  %v1539_v34 = vmul.f32 %v3664_v54, %v3650_v24  ;;  %2415 = vpow2.f32 %v2270_v4  ;;  %vm1544_vm14 = vweird.f32 %v3664_v54 }
 0x4a3   :  { %2417 = vrcp.f32 %v3668_v15  ;;  %v2412_v35 = vpop.eup %2411  ;;  %v1417_v37 = vmul.f32 %v3671_v30, %v3648_v12  ;;  %vm3730_vm3 = vmor %vm1543_vm15, %vm1544_vm14  ;;  %v1564_v48 = vand.u32 2147483648, %v3668_v15  ;;  %v1562_v24 = vand.u32 2147483647, %v3668_v15 }
 0x4a4   :  { %v1540_v3 = vsub.f32 1.0, %v1539_v34  ;;  %v3703_v31 = vpop.eup %2413  ;;  %v3709_v55 = vadd.f32 1.0, %v2412_v35  ;;  %2419 = vpow2.f32 %v2265_v61  ;;  %vm1422_vm5 = vweird.f32 %v3671_v30 }
 0x4a5   :  { %v1418_v29 = vsub.f32 1.0, %v1417_v37  ;;  %v1432_v14 = vmul.f32 %v3703_v31, %v3655_v23  ;;  %vm1558_vm7 = vweird.f32 %v3668_v15  ;;  %v1565_v36 = vor.u32 1.1754944e-38, %v1564_v48  ;;  %vm3763_vm11 = vmor %vm1421_vm4, %vm1422_vm5 }
 0x4a6   :  { %v1541_v22 = vmul.f32 %v3664_v54, %v1540_v3  ;;  %vm1563_vm9 = vcmp.eq.f32.partialorder %v1562_v24, 8.507059e+37  ;;  %v1425_v61 = vand.u32 2147483647, %v3648_v12  ;;  %v2267_v37 = vmul.f32 -1.442695, %v904_v8 }
 0x4a7   :  { %v1339_v56 = vpop.f32.mrf.mxu1  ;;  %v1419_v51 = vmul.f32 %v3671_v30, %v1418_v29  ;;  %v1433_v59 = vsub.f32 1.0, %v1432_v14  ;;  %vm1437_vm13 = vweird.f32 %v3703_v31  ;;  %v1455_v11 = vand.u32 2147483647, %v3709_v55 }
 0x4a8   :  { %v2416_v42 = vpop.eup %2415  ;;  %v2271_v27 = vmul.f32 -1.442695, %v1339_v56  ;;  %v1542_v16 = vadd.f32 %v3664_v54, %v1541_v22  ;;  %vm3777_vm14 = vcmp.eq.f32.partialorder %v1425_v61, 8.507059e+37  ;;  %vm3791_vm15 = vmor %vm1436_vm12, %vm1437_vm13  ;;  %vm1451_vm12 = vweird.f32 %v3709_v55 }
 0x4a9   :  { %v2418_v47 = vpop.eup %2417  ;;  %v3714_v28 = vadd.f32 1.0, %v2416_v42  ;;  %v1420_v3 = vadd.f32 %v3671_v30, %v1419_v51  ;;  %v1434_v43 = vmul.f32 %v3703_v31, %v1433_v59 }
 0x4aa   :  { %v1554_v25 = vmul.f32 %v2418_v47, %v3668_v15  ;;  %2421 = vpow2.f32 %v2271_v27  ;;  %v2420_v60 = vpop.eup %2419  ;;  %vm1559_vm2 = vweird.f32 %v2418_v47  ;;  %v1546_v17 = vsel %vm3730_vm3, %v3664_v54, %v1542_v16 }
 0x4ab   :  { %2423 = vrcp.f32 %v3714_v28  ;;  %vm1560_vm8 = vmor %vm1558_vm7, %vm1559_vm2  ;;  %v3748_v34 = vadd.f32 1.0, %v2420_v60  ;;  %v1551_v54 = vsel %vm1548_vm6, %v1550_v39, %v1546_v17  ;;  %v1424_v12 = vsel %vm3763_vm11, %v3671_v30, %v1420_v3 }
 0x4ac   :  { %v1555_v26 = vsub.f32 1.0, %v1554_v25  ;;  %2425 = vrcp.f32 %v3709_v55  ;;  %v1658_v49 = vadd.f32 %v1551_v54, %v1399_v40  ;;  %v1435_v16 = vadd.f32 %v3703_v31, %v1434_v43 }
 0x4ad   :  { %v1442_v25 = vand.u32 2147483648, %v3655_v23  ;;  %v1429_v51 = vsel %vm3777_vm14, %v1428_v6, %v1424_v12  ;;  %vm1573_vm4 = vweird.f32 %v3714_v28  ;;  %v1577_v1 = vand.u32 2147483647, %v3714_v28 }
 0x4ae   :  { %v1556_v63 = vmul.f32 %v2418_v47, %v1555_v26  ;;  %v1579_v26 = vand.u32 2147483648, %v3714_v28  ;;  %v1439_v60 = vsel %vm3791_vm15, %v3703_v31, %v1435_v16  ;;  %vm3823_vm6 = vcmp.eq.f32.partialorder %v1440_v19, 8.507059e+37 }
 0x4af   :  { %v1342_v44 = vpop.f32.mrf.mxu1  ;;  %vm1578_vm7 = vcmp.eq.f32.partialorder %v1577_v1, 8.507059e+37  ;;  %v1457_v43 = vand.u32 2147483648, %v3709_v55  ;;  %vm1466_vm14 = vweird.f32 %v3748_v34  ;;  %v1472_v19 = vand.u32 2147483648, %v3748_v34 }
 0x4b0   :  { %v2422_v41 = vpop.eup %2421  ;;  %v1557_v5 = vadd.f32 %v2418_v47, %v1556_v63  ;;  %v2272_v38 = vmul.f32 -1.442695, %v1342_v44  ;;  %v1443_v63 = vor.u32 1.1754944e-38, %v1442_v25  ;;  %v1470_v1 = vand.u32 2147483647, %v3748_v34 }
 0x4b1   :  { %v3744_v4 = vpop.eup %2423  ;;  %v3746_v7 = vadd.f32 1.0, %v2422_v41  ;;  %v1458_v16 = vor.u32 1.1754944e-38, %v1457_v43 }
 0x4b2   :  { %v3750_v46 = vpop.eup %2425  ;;  %v1569_v9 = vmul.f32 %v3744_v4, %v3714_v28  ;;  %2427 = vpow2.f32 %v2272_v38  ;;  %v1561_v2 = vsel %vm1560_vm8, %v2418_v47, %v1557_v5  ;;  %vm1574_vm3 = vweird.f32 %v3744_v4 }
 0x4b3   :  { %2429 = vrcp.f32 %v3746_v7  ;;  %v1566_v15 = vsel %vm1563_vm9, %v1565_v36, %v1561_v2  ;;  %v1447_v50 = vmul.f32 %v3750_v46, %v3709_v55  ;;  %vm3809_vm2 = vmor %vm1573_vm4, %vm1574_vm3  ;;  %v1594_v23 = vand.u32 2147483648, %v3746_v7 }
 0x4b4   :  { %v1570_v35 = vsub.f32 1.0, %v1569_v9  ;;  %v1659_v53 = vadd.f32 %v1566_v15, %v1414_v10  ;;  %2431 = vpow2.f32 %v2266_v57  ;;  %v1592_v28 = vand.u32 2147483647, %v3746_v7 }
 0x4b5   :  { %2433 = vrcp.f32 %v3748_v34  ;;  %v1448_v29 = vsub.f32 1.0, %v1447_v50  ;;  %v1580_v38 = vor.u32 1.1754944e-38, %v1579_v26  ;;  %vm1588_vm8 = vweird.f32 %v3746_v7 }
 0x4b6   :  { %v1666_v52 = vpack.c.bf16 %v1659_v53, %v1658_v49  ;;  %v1571_v20 = vmul.f32 %v3744_v4, %v1570_v35  ;;  %2435 = vpow2.f32 %v2267_v37  ;;  %v1595_v3 = vor.u32 1.1754944e-38, %v1594_v23 }
 0x4b7   :  { %v1345_v56 = vpop.f32.mrf.mxu1  ;;  %v1449_v17 = vmul.f32 %v3750_v46, %v1448_v29  ;;  %vm1593_vm11 = vcmp.eq.f32.partialorder %v1592_v28, 8.507059e+37  ;;  %vm1452_vm13 = vweird.f32 %v3750_v46  ;;  %v1473_v28 = vor.u32 1.1754944e-38, %v1472_v19 }
 0x4b8   :  { %v2428_v42 = vpop.eup %2427  ;;  %v2273_v27 = vmul.f32 -1.442695, %v1345_v56  ;;  %2276 = vmatmul.msk.bf16.vlgmr.msra.gmra.mxu3 %vm763_vm10, %v1666_v52  ;;  %2280 = vmatmul.msk.bf16.vlgmr.msra.gmra.mxu0 %vm763_vm10, %v1666_v52  ;;  %v1572_v14 = vadd.f32 %v3744_v4, %v1571_v20  ;;  %vm3863_vm3 = vmor %vm1451_vm12, %vm1452_vm13  ;;  %v593_v5 = vrot.slane %v3469_v21, 1 }
 0x4b9   :  { %v2430_v47 = vpop.eup %2429  ;;  %v3781_v40 = vadd.f32 1.0, %v2428_v42  ;;  %2284 = vmatmul.msk.bf16.vlgmr.msrb.gmra.mxu2 %vm763_vm10, %v1666_v52  ;;  %v1450_v12 = vadd.f32 %v3750_v46, %v1449_v17 }
 0x4ba   :  { %v1584_v58 = vmul.f32 %v2430_v47, %v3746_v7  ;;  %2437 = vpow2.f32 %v2273_v27  ;;  %v2432_v10 = vpop.eup %2431  ;;  %v1576_v59 = vsel %vm3809_vm2, %v3744_v4, %v1572_v14  ;;  %vm1589_vm5 = vweird.f32 %v2430_v47 }
 0x4bb   :  { %2439 = vrcp.f32 %v3781_v40  ;;  %v3800_v62 = vpop.eup %2433  ;;  %v3821_v57 = vadd.f32 1.0, %v2432_v10  ;;  %v1581_v15 = vsel %vm1578_vm7, %v1580_v38, %v1576_v59  ;;  %vm1590_vm9 = vmor %vm1588_vm8, %vm1589_vm5  ;;  %v1444_v7 = vsel %vm3823_vm6, %v1443_v63, %v1439_v60 }
 0x4bc   :  { %v1585_v48 = vsub.f32 1.0, %v1584_v58  ;;  %v2436_v39 = vpop.eup %2435  ;;  %v1462_v31 = vmul.f32 %v3800_v62, %v3748_v34  ;;  %v1660_v50 = vadd.f32 %v1581_v15, %v1429_v51  ;;  %vm1467_vm15 = vweird.f32 %v3800_v62 }
 0x4bd   :  { %v3832_v2 = vadd.f32 1.0, %v2436_v39  ;;  %v1609_v26 = vand.u32 2147483648, %v3781_v40  ;;  %vm3875_vm2 = vmor %vm1466_vm14, %vm1467_vm15  ;;  %vm1603_vm5 = vweird.f32 %v3781_v40  ;;  %v1607_v60 = vand.u32 2147483647, %v3781_v40 }
 0x4be   :  { %v1586_v44 = vmul.f32 %v2430_v47, %v1585_v48  ;;  %v1463_v49 = vsub.f32 1.0, %v1462_v31  ;;  %v1454_v24 = vsel %vm3863_vm3, %v3750_v46, %v1450_v12  ;;  %vm3887_vm6 = vcmp.eq.f32.partialorder %v1455_v11, 8.507059e+37 }
 0x4bf   :  { %v1348_v41 = vpop.f32.mrf.mxu1  ;;  %v1610_v31 = vor.u32 1.1754944e-38, %v1609_v26  ;;  %vm1481_vm15 = vweird.f32 %v3821_v57  ;;  %v1487_v11 = vand.u32 2147483648, %v3821_v57 }
 0x4c0   :  { %v2438_v36 = vpop.eup %2437  ;;  %v2274_v54 = vmul.f32 -1.442695, %v1348_v41  ;;  %v1587_v8 = vadd.f32 %v2430_v47, %v1586_v44  ;;  %v1464_v6 = vmul.f32 %v3800_v62, %v1463_v49 }
 0x4c1   :  { %v3828_v4 = vpop.eup %2439  ;;  %v3830_v9 = vadd.f32 1.0, %v2438_v36 }
 0x4c2   :  { %v1599_v61 = vmul.f32 %v3828_v4, %v3781_v40  ;;  %2441 = vpow2.f32 %v2274_v54  ;;  %v1591_v35 = vsel %vm1590_vm9, %v2430_v47, %v1587_v8  ;;  %vm1604_vm4 = vweird.f32 %v3828_v4 }
 0x4c3   :  { %2443 = vrcp.f32 %v3830_v9  ;;  %v1596_v53 = vsel %vm1593_vm11, %v1595_v3, %v1591_v35  ;;  %v1465_v10 = vadd.f32 %v3800_v62, %v1464_v6  ;;  %vm3891_vm7 = vmor %vm1603_vm5, %vm1604_vm4  ;;  %v1624_v34 = vand.u32 2147483648, %v3830_v9 }
 0x4c4   :  { %v1600_v37 = vsub.f32 1.0, %v1599_v61  ;;  %2445 = vrcp.f32 %v3821_v57  ;;  %v1661_v22 = vadd.f32 %v1596_v53, %v1444_v7  ;;  %v1622_v59 = vand.u32 2147483647, %v3830_v9 }
 0x4c5   :  { %2447 = vrcp.f32 %v3832_v2  ;;  %v1469_v44 = vsel %vm3875_vm2, %v3800_v62, %v1465_v10  ;;  %vm3905_vm9 = vcmp.eq.f32.partialorder %v1470_v1, 8.507059e+37  ;;  %vm1608_vm11 = vcmp.eq.f32.partialorder %v1607_v60, 8.507059e+37 }
 0x4c6   :  { %v1667_v52 = vpack.c.bf16 %v1661_v22, %v1660_v50  ;;  %v1601_v20 = vmul.f32 %v3828_v4, %v1600_v37  ;;  %vm1618_vm12 = vweird.f32 %v3830_v9  ;;  %v1625_v15 = vor.u32 1.1754944e-38, %v1624_v34 }
 0x4c7   :  { %v1351_v56 = vpop.f32.mrf.mxu1  ;;  %v1459_v3 = vsel %vm3887_vm6, %v1458_v16, %v1454_v24  ;;  %vm1623_vm14 = vcmp.eq.f32.partialorder %v1622_v59, 8.507059e+37  ;;  %v1485_v6 = vand.u32 2147483647, %v3821_v57  ;;  %vm1496_vm4 = vweird.f32 %v3832_v2 }
 0x4c8   :  { %v2442_v42 = vpop.eup %2441  ;;  %v2275_v27 = vmul.f32 -1.442695, %v1351_v56  ;;  %2277 = vmatmul.msk.bf16.gmra.mxu3 %vm763_vm10, %v1667_v52  ;;  %2281 = vmatmul.msk.bf16.gmra.mxu0 %vm763_vm10, %v1667_v52  ;;  %v1602_v14 = vadd.f32 %v3828_v4, %v1601_v20  ;;  %v1502_v16 = vand.u32 2147483648, %v3832_v2  ;;  %v1500_v10 = vand.u32 2147483647, %v3832_v2 }
 0x4c9   :  { %v2444_v47 = vpop.eup %2443  ;;  %v3851_v29 = vadd.f32 1.0, %v2442_v42  ;;  %2285 = vmatmul.msk.bf16.gmra.mxu2 %vm763_vm10, %v1667_v52  ;;  %v1488_v60 = vor.u32 1.1754944e-38, %v1487_v11 }
 0x4ca   :  { %v3856_v25 = vpop.eup %2445  ;;  %v1614_v58 = vmul.f32 %v2444_v47, %v3830_v9  ;;  %2449 = vpow2.f32 %v2275_v27  ;;  %v1606_v40 = vsel %vm3891_vm7, %v3828_v4, %v1602_v14  ;;  %vm1619_vm8 = vweird.f32 %v2444_v47 }
 0x4cb   :  { %2451 = vrcp.f32 %v3851_v29  ;;  %v3873_v48 = vpop.eup %2447  ;;  %v1477_v63 = vmul.f32 %v3856_v25, %v3821_v57  ;;  %v1611_v4 = vsel %vm1608_vm11, %v1610_v31, %v1606_v40  ;;  %vm1620_vm13 = vmor %vm1618_vm12, %vm1619_vm8  ;;  %v1474_v9 = vsel %vm3905_vm9, %v1473_v28, %v1469_v44  ;;  %v581_v28 = vpop.permute.xlu1 %580 }
 0x4cc   :  { %v1615_v51 = vsub.f32 1.0, %v1614_v58  ;;  %v1492_v46 = vmul.f32 %v3873_v48, %v3832_v2  ;;  %v1662_v53 = vadd.f32 %v1611_v4, %v1459_v3  ;;  %vm1482_vm3 = vweird.f32 %v3856_v25  ;;  %v583_v31 = vpop.permute.xlu0 %582 }
 0x4cd   :  { %v1478_v54 = vsub.f32 1.0, %v1477_v63  ;;  %vm1497_vm2 = vweird.f32 %v3873_v48  ;;  %vm3931_vm5 = vmor %vm1481_vm15, %vm1482_vm3  ;;  %v1639_v58 = vand.u32 2147483648, %v3851_v29  ;;  %vm1633_vm8 = vweird.f32 %v3851_v29 }
 0x4ce   :  { %v1616_v39 = vmul.f32 %v2444_v47, %v1615_v51  ;;  %v1493_v35 = vsub.f32 1.0, %v1492_v46  ;;  %vm3939_vm7 = vmor %vm1496_vm4, %vm1497_vm2  ;;  %v1637_v19 = vand.u32 2147483647, %v3851_v29  ;;  %vm3949_vm9 = vcmp.eq.f32.partialorder %v1485_v6, 8.507059e+37 }
 0x4cf   :  { %v1479_v50 = vmul.f32 %v3856_v25, %v1478_v54  ;;  %v1503_v63 = vor.u32 1.1754944e-38, %v1502_v16  ;;  %v1640_v24 = vor.u32 1.1754944e-38, %v1639_v58 }
 0x4d0   :  { %v2450_v41 = vpop.eup %2449  ;;  %v1617_v38 = vadd.f32 %v2444_v47, %v1616_v39  ;;  %v1494_v52 = vmul.f32 %v3873_v48, %v1493_v35  ;;  %v594_v35 = vrot.slane %v3545_v33, 1 }
 0x4d1   :  { %v2452_v36 = vpop.eup %2451  ;;  %v3910_v8 = vadd.f32 1.0, %v2450_v41  ;;  %v1480_v56 = vadd.f32 %v3856_v25, %v1479_v50  ;;  %v607_v41 = vpop.permute.xlu2 %606 }
 0x4d2   :  { %v1629_v62 = vmul.f32 %v2452_v36, %v3851_v29  ;;  %v1621_v61 = vsel %vm1620_vm13, %v2444_v47, %v1617_v38  ;;  %vm1634_vm6 = vweird.f32 %v2452_v36  ;;  %v1495_v47 = vadd.f32 %v3873_v48, %v1494_v52 }
 0x4d3   :  { %2453 = vrcp.f32 %v3910_v8  ;;  %v1626_v49 = vsel %vm1623_vm14, %v1625_v15, %v1621_v61  ;;  %v1484_v57 = vsel %vm3931_vm5, %v3856_v25, %v1480_v56  ;;  %vm1635_vm11 = vmor %vm1633_vm8, %vm1634_vm6  ;;  %v1654_v51 = vand.u32 2147483648, %v3910_v8  ;;  %v609_v38 = vpop.permute.xlu1 %608 }
 0x4d4   :  { %v1630_v7 = vsub.f32 1.0, %v1629_v62  ;;  %v1663_v37 = vadd.f32 %v1626_v49, %v1474_v9  ;;  %v1652_v2 = vand.u32 2147483647, %v3910_v8  ;;  %v1499_v29 = vsel %vm3939_vm7, %v3873_v48, %v1495_v47  ;;  %v585_v54 = vpop.permute.xlu0 %584 }
 0x4d5   :  { %vm1501_vm13 = vcmp.eq.f32.partialorder %v1500_v10, 8.507059e+37  ;;  %vm1638_vm14 = vcmp.eq.f32.partialorder %v1637_v19, 8.507059e+37  ;;  %vm1648_vm15 = vweird.f32 %v3910_v8  ;;  %v1655_v17 = vor.u32 1.1754944e-38, %v1654_v51 }
 0x4d6   :  { %v1668_v22 = vpack.c.bf16 %v1663_v37, %v1662_v53  ;;  %v1631_v43 = vmul.f32 %v2452_v36, %v1630_v7  ;;  %vm1653_vm4 = vcmp.eq.f32.partialorder %v1652_v2, 8.507059e+37  ;;  %v1489_v40 = vsel %vm3949_vm9, %v1488_v60, %v1484_v57 }
 0x4d7   :  { %v1504_v39 = vsel %vm1501_vm13, %v1503_v63, %v1499_v29  ;;  %v610_v4 = vsel %vm79_vm0, %v607_v41, %v609_v38  ;;  %v592_v15 = vrot.slane %v3539_v45, 1  ;;  %v588_v3 = vsel %vm79_vm0, %v585_v54, %v581_v28 }
 0x4d8   :  { %2278 = vmatmul.msk.bf16.gmra.mxu3 %vm763_vm10, %v1668_v22  ;;  %2282 = vmatmul.msk.bf16.gmra.mxu0 %vm763_vm10, %v1668_v22  ;;  %v1632_v12 = vadd.f32 %v2452_v36, %v1631_v43  ;;  %v586_v49 = vsel %vm79_vm0, %v583_v31, %v585_v54  ;;  %v613_v37 = vrot.slane %v3539_v45, 2 }
 0x4d9   :  { %v2454_v20 = vpop.eup %2453  ;;  %2286 = vmatmul.msk.bf16.gmra.mxu2 %vm763_vm10, %v1668_v22  ;;  %v605_v9 = vpop.permute.xlu2 %604  ;;  %v598_v7 = vmul.f32 %v592_v15, %v588_v3  ;;  %v600_v52 = vmul.f32 %v594_v35, %v586_v49 }
 0x4da   :  { %v1644_v42 = vmul.f32 %v2454_v20, %v3910_v8  ;;  %v1636_v55 = vsel %vm1635_vm11, %v2452_v36, %v1632_v12  ;;  %vm1649_vm12 = vweird.f32 %v2454_v20  ;;  %v587_v36 = vsel %vm79_vm0, %v581_v28, %v583_v31 }
 0x4db   :  { %v1641_v23 = vsel %vm1638_vm14, %v1640_v24, %v1636_v55  ;;  %vm1650_vm3 = vmor %vm1648_vm15, %vm1649_vm12  ;;  %v614_v8 = vrot.slane %v3469_v21, 2  ;;  %v599_v62 = vmul.f32 %v593_v5, %v587_v36  ;;  %v615_v21 = vrot.slane %v3545_v33, 2 }
 0x4dc   :  { %v1645_v30 = vsub.f32 1.0, %v1644_v42  ;;  %v1664_v46 = vadd.f32 %v1641_v23, %v1489_v40  ;;  %v612_v50 = vsel %vm79_vm0, %v609_v38, %v605_v9  ;;  %v611_v43 = vsel %vm79_vm0, %v605_v9, %v607_v41 }
 0x4dd   :  { %v620_v61 = vmul.f32 %v614_v8, %v610_v4  ;;  %v602_v53 = vadd.f32 %v599_v62, %v3496_v13  ;;  %v621_v56 = vmul.f32 %v615_v21, %v612_v50  ;;  %v619_v6 = vmul.f32 %v613_v37, %v611_v43  ;;  %v4379_v21 = vld [vmem:[#allocation13_spill] sm:$0xff]  ;;  %v4380_v50 = vld [vmem:[#allocation8_spill] sm:$0xff] }
 0x4de   :  { %v1646_v1 = vmul.f32 %v2454_v20, %v1645_v30  ;;  %v603_v27 = vadd.f32 %v600_v52, %v3557_v18 }
 0x4df   :  { %v623_v22 = vadd.f32 %v620_v61, %v602_v53 }
 0x4e0   :  { %v1647_v25 = vadd.f32 %v2454_v20, %v1646_v1  ;;  %v624_v12 = vadd.f32 %v621_v56, %v603_v27 }
 0x4e1   :  { %v2289_v42 = vmul.f32 -1.442695, %v623_v22 }
 0x4e2   :  { %v1651_v34 = vsel %vm1650_vm3, %v2454_v20, %v1647_v25  ;;  %v601_v20 = vadd.f32 %v598_v7, %v3559_v0  ;;  %v2290_v45 = vmul.f32 -1.442695, %v624_v12 }
 0x4e3   :  { %v1656_v59 = vsel %vm1653_vm4, %v1655_v17, %v1651_v34  ;;  %2455 = vpow2.f32 %v2289_v42 }
 0x4e4   :  { %v1665_v44 = vadd.f32 %v1656_v59, %v1504_v39  ;;  %v622_v13 = vadd.f32 %v619_v6, %v601_v20 }
 0x4e6   :  { %v1669_v48 = vpack.c.bf16 %v1665_v44, %v1664_v46  ;;  %v2288_v33 = vmul.f32 -1.442695, %v622_v13 }
 0x4e8   :  { %2279 = vmatmul.msk.bf16.gmra.mxu3 %vm763_vm10, %v1669_v48  ;;  %2283 = vmatmul.msk.bf16.gmra.mxu0 %vm763_vm10, %v1669_v48  ;;  %2457 = vpow2.f32 %v2288_v33 }
 0x4e9   :  { %2287 = vmatmul.msk.bf16.gmra.mxu2 %vm763_vm10, %v1669_v48  ;;  %v2456_v11 = vpop.eup %2455  ;;  %2459 = vpow2.f32 %v2290_v45  ;;  %v4381_v45 = vld [vmem:[#allocation12_spill] sm:$0xff] }
 0x4ea   :  { %v1789_v47 = vadd.f32 1.0, %v2456_v11 }
 0x4ec   :  { %2461 = vrcp.f32 %v1789_v47  ;;  %v1817_v60 = vand.u32 2147483648, %v1789_v47  ;;  %vm1811_vm10 = vweird.f32 %v1789_v47  ;;  %v1815_v63 = vand.u32 2147483647, %v1789_v47 }
 0x4ee   :  { %v2458_v16 = vpop.eup %2457  ;;  %v1818_v23 = vor.u32 1.1754944e-38, %v1817_v60  ;;  %vm1816_vm6 = vcmp.eq.f32.partialorder %v1815_v63, 8.507059e+37 }
 0x4ef   :  { %v2460_v32 = vpop.eup %2459  ;;  %v1788_v58 = vadd.f32 1.0, %v2458_v16 }
 0x4f0   :  { %v1790_v30 = vadd.f32 1.0, %v2460_v32  ;;  %v4383_v32 = vld [vmem:[#allocation9_spill] sm:$0xff] }
 0x4f1   :  { %2463 = vrcp.f32 %v1788_v58  ;;  %v1802_v34 = vand.u32 2147483648, %v1788_v58  ;;  %vm1796_vm8 = vweird.f32 %v1788_v58  ;;  %v1800_v59 = vand.u32 2147483647, %v1788_v58 }
 0x4f2   :  { %v2462_v0 = vpop.eup %2461  ;;  %2465 = vrcp.f32 %v1790_v30  ;;  %v1832_v46 = vand.u32 2147483648, %v1790_v30  ;;  %vm1826_vm11 = vweird.f32 %v1790_v30  ;;  %v1830_v44 = vand.u32 2147483647, %v1790_v30 }
 0x4f3   :  { %v1807_v14 = vmul.f32 %v2462_v0, %v1789_v47  ;;  %vm1812_vm0 = vweird.f32 %v2462_v0  ;;  %v1803_v31 = vor.u32 1.1754944e-38, %v1802_v34  ;;  %vm1801_vm13 = vcmp.eq.f32.partialorder %v1800_v59, 8.507059e+37  ;;  %v4382_v47 = vld [vmem:[#allocation10_spill] sm:$0xff] }
 0x4f4   :  { %vm1813_vm2 = vmor %vm1811_vm10, %vm1812_vm0  ;;  %v1833_v38 = vor.u32 1.1754944e-38, %v1832_v46  ;;  %vm1831_vm14 = vcmp.eq.f32.partialorder %v1830_v44, 8.507059e+37 }
 0x4f5   :  { %v1808_v19 = vsub.f32 1.0, %v1807_v14 }
 0x4f7   :  { %v2464_v10 = vpop.eup %2463  ;;  %v1809_v51 = vmul.f32 %v2462_v0, %v1808_v19 }
 0x4f8   :  { %v2466_v18 = vpop.eup %2465  ;;  %v1792_v57 = vmul.f32 %v2464_v10, %v1788_v58  ;;  %vm1797_vm5 = vweird.f32 %v2464_v10 }
 0x4f9   :  { %v1822_v26 = vmul.f32 %v2466_v18, %v1790_v30  ;;  %v1810_v2 = vadd.f32 %v2462_v0, %v1809_v51  ;;  %vm1827_vm7 = vweird.f32 %v2466_v18  ;;  %vm1798_vm9 = vmor %vm1796_vm8, %vm1797_vm5  ;;  %v4384_v30 = vld [vmem:[#allocation11_spill] sm:$0xff] }
 0x4fa   :  { %v1793_v55 = vsub.f32 1.0, %v1792_v57  ;;  %vm1828_vm12 = vmor %vm1826_vm11, %vm1827_vm7 }
 0x4fb   :  { %v1823_v1 = vsub.f32 1.0, %v1822_v26  ;;  %v1814_v25 = vsel %vm1813_vm2, %v2462_v0, %v1810_v2 }
 0x4fc   :  { %v1794_v29 = vmul.f32 %v2464_v10, %v1793_v55  ;;  %v1819_v40 = vsel %vm1816_vm6, %v1818_v23, %v1814_v25 }
 0x4fd   :  { %v1824_v24 = vmul.f32 %v2466_v18, %v1823_v1  ;;  %v1837_v28 = vperm.slane %v1819_v40, 0 }
 0x4fe   :  { %v1795_v17 = vadd.f32 %v2464_v10, %v1794_v29 }
 0x4ff   :  { %v1825_v39 = vadd.f32 %v2466_v18, %v1824_v24 }
 0x500   :  { %v1799_v48 = vsel %vm1798_vm9, %v2464_v10, %v1795_v17 }
 0x501   :  { %v1829_v41 = vsel %vm1828_vm12, %v2466_v18, %v1825_v39  ;;  %v1804_v54 = vsel %vm1801_vm13, %v1803_v31, %v1799_v48 }
 0x502   :  { %v1834_v8 = vsel %vm1831_vm14, %v1833_v38, %v1829_v41  ;;  %v3985_v4 = vperm.slane %v1804_v54, 0 }
 0x503   :  { %v3987_v15 = vperm.slane %v1834_v8, 0  ;;  %v2470_v8 = vld [vmem:[%s4287_s0 + $0x98] sm:$0xff] }
 0x535   :  { %v1730_v5 = vpop.f32.mrf.mxu0 }
 0x536   :  { %v1840_v36 = vadd.f32 %v1837_v28, %v1730_v5 }
 0x538   :  { %v1864_v49 = vadd.f32 3.0, %v1840_v36 }
 0x53a   :  { %v3992_v37 = vmul.f32 %v1864_v49, %v4379_v21 }
 0x53b   :  { %v1701_v62 = vpop.f32.mrf.mxu3 }
 0x53c   :  { %v1839_v3 = vadd.f32 %v3985_v4, %v1701_v62  ;;  %v1759_v61 = vpop.f32.mrf.mxu2 }
 0x53d   :  { %v1841_v35 = vadd.f32 %v3987_v15, %v1759_v61  ;;  %v1732_v9 = vpop.f32.mrf.mxu0 }
 0x53e   :  { %v1843_v7 = vadd.f32 %v1837_v28, %v1732_v9  ;;  %v1863_v52 = vadd.f32 3.0, %v1839_v3  ;;  %v2471_v3 = vld [vmem:[%s4287_s0 + $0xb0] sm:$0xff] }
 0x53f   :  { %v1865_v42 = vadd.f32 3.0, %v1841_v35 }
 0x540   :  { %v1867_v53 = vadd.f32 3.0, %v1843_v7  ;;  %v4002_v11 = vmul.f32 %v1863_v52, %v4381_v45 }
 0x541   :  { %v4008_v58 = vmul.f32 %v1865_v42, %v4383_v32 }
 0x542   :  { %v3995_v22 = vmul.f32 %v1867_v53, %v4380_v50  ;;  %v2472_v53 = vld [vmem:[%s4287_s0 + $0x80] sm:$0xff] }
 0x543   :  { %v1703_v43 = vpop.f32.mrf.mxu3 }
 0x544   :  { %v1842_v20 = vadd.f32 %v3985_v4, %v1703_v43  ;;  %v1761_v56 = vpop.f32.mrf.mxu2  ;;  %v1928_v6 = vpack.c.bf16 %v3995_v22, %v3992_v37  ;;  %v2348_v37 = vld [vmem:[%s4298_s11 + $0x8] sm:$0xff]  ;;  %v2349_v22 = vld [vmem:[%s4298_s11 + $0x10] sm:$0xff] }
 0x545   :  { %v1844_v27 = vadd.f32 %v3987_v15, %v1761_v56  ;;  %v1735_v13 = vpop.f32.mrf.mxu0 }
 0x546   :  { %v1866_v12 = vadd.f32 3.0, %v1842_v20  ;;  %v1846_v44 = vadd.f32 %v1837_v28, %v1735_v13 }
 0x547   :  { %v1868_v33 = vadd.f32 3.0, %v1844_v27 }
 0x548   :  { %v4005_v16 = vmul.f32 %v1866_v12, %v4382_v47 }
 0x549   :  { %v4011_v0 = vmul.f32 %v1868_v33, %v4384_v30  ;;  %v2473_v33 = vld [vmem:[%s4287_s0 + $0x68] sm:$0xff]  ;;  %v2474_v30 = vld [vmem:[%s4287_s0 + $0x50] sm:$0xff] }
 0x54a   :  { %v1927_v14 = vpack.c.bf16 %v4005_v16, %v4002_v11  ;;  %v2351_v11 = vld [vmem:[%s4298_s11 + $0x20] sm:$0xff]  ;;  %v2352_v16 = vld [vmem:[%s4298_s11 + $0x28] sm:$0xff] }
 0x54b   :  { %v1706_v10 = vpop.f32.mrf.mxu3  ;;  %v1929_v18 = vpack.c.bf16 %v4011_v0, %v4008_v58  ;;  %v2353_v58 = vld [vmem:[%s4298_s11 + $0x30] sm:$0xff]  ;;  %v2354_v0 = vld [vmem:[%s4298_s11 + $0x38] sm:$0xff] }
 0x54c   :  { %v4017_v19 = vpop.f32.mrf.mxu2  ;;  %v1845_v56 = vadd.f32 %v3985_v4, %v1706_v10 }
 0x54d   :  { %v1737_v57 = vpop.f32.mrf.mxu0 }
 0x54e   :  { %v1849_v48 = vadd.f32 %v1837_v28, %v1737_v57 }
 0x550   :  { %v1873_v35 = vadd.f32 3.0, %v1849_v48  ;;  %v2481_v48 = vld [vmem:[%s4287_s0 + $0x88] sm:$0xff] }
 0x552   :  { %v1897_v10 = vmul.f32 %v2474_v30, %v1873_v35 }
 0x553   :  { %v1708_v26 = vpop.f32.mrf.mxu3 }
 0x554   :  { %v1766_v51 = vpop.f32.mrf.mxu2  ;;  %v1848_v12 = vadd.f32 %v3985_v4, %v1708_v26 }
 0x555   :  { %v1740_v55 = vpop.f32.mrf.mxu0  ;;  %v1850_v57 = vadd.f32 %v3987_v15, %v1766_v51  ;;  %v2477_v51 = vld [vmem:[%s4287_s0 + $0xa0] sm:$0xff] }
 0x556   :  { %v1852_v39 = vadd.f32 %v1837_v28, %v1740_v55 }
 0x558   :  { %v1876_v36 = vadd.f32 3.0, %v1852_v39 }
 0x55a   :  { %v1900_v45 = vmul.f32 %v2473_v33, %v1876_v36 }
 0x55b   :  { %v1711_v1 = vpop.f32.mrf.mxu3 }
 0x55c   :  { %v1769_v2 = vpop.f32.mrf.mxu2  ;;  %v1851_v9 = vadd.f32 %v3985_v4, %v1711_v1 }
 0x55d   :  { %v1742_v60 = vpop.f32.mrf.mxu0  ;;  %v1853_v42 = vadd.f32 %v3987_v15, %v1769_v2 }
 0x55e   :  { %v1855_v17 = vadd.f32 %v1837_v28, %v1742_v60  ;;  %v1875_v2 = vadd.f32 3.0, %v1851_v9  ;;  %v2476_v60 = vld [vmem:[%s4287_s0 + $0xa8] sm:$0xff]  ;;  %v2485_v9 = vld [vmem:[%s4287_s0 + $0x58] sm:$0xff] }
 0x560   :  { %v1879_v31 = vadd.f32 3.0, %v1855_v17  ;;  %v2478_v17 = vld [vmem:[%s4287_s0 + $0xb8] sm:$0xff] }
 0x562   :  { %v1903_v21 = vmul.f32 %v2472_v53, %v1879_v31  ;;  %v2486_v53 = vld [vmem:[%s4287_s0 + $0x30] sm:$0xff] }
 0x563   :  { %v1713_v29 = vpop.f32.mrf.mxu3 }
 0x564   :  { %v1771_v63 = vpop.f32.mrf.mxu2  ;;  %v1854_v54 = vadd.f32 %v3985_v4, %v1713_v29 }
 0x565   :  { %v1745_v24 = vpop.f32.mrf.mxu0  ;;  %v1856_v49 = vadd.f32 %v3987_v15, %v1771_v63  ;;  %v1934_v63 = vpack.c.bf16 %v1903_v21, %v1900_v45 }
 0x566   :  { %v1858_v25 = vadd.f32 %v1837_v28, %v1745_v24  ;;  %v1878_v47 = vadd.f32 3.0, %v1854_v54  ;;  %v1847_v24 = vadd.f32 %v3987_v15, %v4017_v19 }
 0x567   :  { %v1880_v55 = vadd.f32 3.0, %v1856_v49 }
 0x568   :  { %v1882_v59 = vadd.f32 3.0, %v1858_v25  ;;  %v1877_v25 = vadd.f32 3.0, %v1853_v42 }
 0x569   :  { %v1904_v31 = vmul.f32 %v2481_v48, %v1880_v55 }
 0x56a   :  { %v1906_v62 = vmul.f32 %v2470_v8, %v1882_v59  ;;  %v1872_v59 = vadd.f32 3.0, %v1848_v12  ;;  %v1871_v8 = vadd.f32 3.0, %v1847_v24 }
 0x56b   :  { %v1716_v23 = vpop.f32.mrf.mxu3 }
 0x56c   :  { %v1774_v34 = vpop.f32.mrf.mxu2  ;;  %v1857_v41 = vadd.f32 %v3985_v4, %v1716_v23 }
 0x56d   :  { %v1747_v40 = vpop.f32.mrf.mxu0  ;;  %v1859_v38 = vadd.f32 %v3987_v15, %v1774_v34 }
 0x56e   :  { %v1861_v46 = vadd.f32 %v1837_v28, %v1747_v40  ;;  %v1870_v28 = vadd.f32 3.0, %v1846_v44  ;;  %v1881_v50 = vadd.f32 3.0, %v1857_v41  ;;  %v2479_v40 = vld [vmem:[%s4287_s0 + $0x38] sm:$0xff]  ;;  %v1874_v44 = vadd.f32 3.0, %v1850_v57 }
 0x56f   :  { %v1883_v27 = vadd.f32 3.0, %v1859_v38  ;;  %v2482_v38 = vld [vmem:[%s4287_s0 + $0x60] sm:$0xff] }
 0x570   :  { %v1885_v5 = vadd.f32 3.0, %v1861_v46  ;;  %v1894_v39 = vmul.f32 %v2479_v40, %v1870_v28  ;;  %v1899_v36 = vmul.f32 %v2482_v38, %v1875_v2  ;;  %v1898_v49 = vmul.f32 %v2485_v9, %v1874_v44 }
 0x571   :  { %v1907_v23 = vmul.f32 %v2477_v51, %v1883_v27 }
 0x572   :  { %v1909_v61 = vmul.f32 %v2471_v3, %v1885_v5  ;;  %v1869_v5 = vadd.f32 3.0, %v1845_v56  ;;  %v1931_v54 = vpack.c.bf16 %v1897_v10, %v1894_v39 }
 0x573   :  { %v1718_v7 = vpop.f32.mrf.mxu3 }
 0x574   :  { %v1937_v43 = vpack.c.bf16 %v1909_v61, %v1906_v62  ;;  %v1860_v52 = vadd.f32 %v3985_v4, %v1718_v7  ;;  %v1776_v20 = vpop.f32.mrf.mxu2  ;;  %v2475_v4 = vld [vmem:[%s4287_s0 + $0x90] sm:$0xff]  ;;  %v2484_v61 = vld [vmem:[%s4287_s0 + $0x48] sm:$0xff]  ;;  %v1893_v21 = vmul.f32 %v2486_v53, %v1869_v5 }
 0x575   :  { %v1862_v13 = vadd.f32 %v3987_v15, %v1776_v20  ;;  %v1905_v26 = vmul.f32 %v2475_v4, %v1881_v50  ;;  %v2480_v15 = vld [vmem:[%s4287_s0 + $0x78] sm:$0xff]  ;;  %v2483_v62 = vld [vmem:[%s4287_s0 + $0x70] sm:$0xff]  ;;  %v1896_v28 = vmul.f32 %v2484_v61, %v1872_v59  ;;  %v2487_v50 = vld [vmem:[%s4287_s0 + $0x40] sm:$0xff] }
 0x576   :  { %v1884_v32 = vadd.f32 3.0, %v1860_v52  ;;  %2056 = vmatpush.bf16.msrb.mxu3 %v1937_v43  ;;  %v1902_v19 = vmul.f32 %v2480_v15, %v1878_v47  ;;  %v1901_v3 = vmul.f32 %v2483_v62, %v1877_v25  ;;  %v1895_v43 = vmul.f32 %v2487_v50, %v1871_v8  ;;  %v2347_v52 = vld [vmem:[%s4298_s11] sm:$0xff] }
 0x577   :  { %v1886_v1 = vadd.f32 3.0, %v1862_v13  ;;  %v1930_v20 = vpack.c.bf16 %v1896_v28, %v1893_v21 }
 0x578   :  { %v1908_v29 = vmul.f32 %v2476_v60, %v1884_v32  ;;  %v1933_v35 = vpack.c.bf16 %v1902_v19, %v1899_v36  ;;  %v1935_v7 = vpack.c.bf16 %v1904_v31, %v1901_v3  ;;  %v1932_v56 = vpack.c.bf16 %v1898_v49, %v1895_v43 }
 0x579   :  { %v1910_v34 = vmul.f32 %v2478_v17, %v1886_v1 }
 0x57a   :  { %v1936_v46 = vpack.c.bf16 %v1908_v29, %v1905_v26  ;;  %2057 = vmatpush.bf16.msrb.mxu3 %v1934_v63 }
 0x57b   :  { %v1938_v41 = vpack.c.bf16 %v1910_v34, %v1907_v23 }
 0x57c   :  { %2007 = vmatpush.bf16.msrb.mxu1 %v1936_v46 }
 0x57d   :  { %2105 = vmatpush.bf16.msrb.mxu0 %v1938_v41 }
 0x57e   :  { %2058 = vmatpush.bf16.msrb.mxu3 %v1931_v54 }
 0x580   :  { %2008 = vmatpush.bf16.msrb.mxu1 %v1933_v35 }
 0x581   :  { %2106 = vmatpush.bf16.msrb.mxu0 %v1935_v7 }
 0x582   :  { %2059 = vmatpush.bf16.msrb.mxu3 %v1928_v6  ;;  %v2350_v6 = vld [vmem:[%s4298_s11 + $0x18] sm:$0xff] }
 0x584   :  { %2009 = vmatpush.bf16.msrb.mxu1 %v1930_v20 }
 0x585   :  { %2107 = vmatpush.bf16.msrb.mxu0 %v1932_v56  ;;  %2331 = vmatmul.msk.bf16.vlgmr.msrb.gmra.mxu3 %vm187_vm1, %v2347_v52 }
 0x588   :  { %2010 = vmatpush.bf16.msrb.mxu1 %v1927_v14 }
 0x589   :  { %2108 = vmatpush.bf16.msrb.mxu0 %v1929_v18 }
 0x58b   :  { %2323 = vmatmul.msk.bf16.vlgmr.msrb.gmra.mxu1 %vm187_vm1, %v2347_v52 }
 0x58c   :  { %2339 = vmatmul.msk.bf16.vlgmr.msrb.gmra.mxu0 %vm187_vm1, %v2347_v52 }
 0x595   :  { %2332 = vmatmul.msk.bf16.gmra.mxu3 %vm187_vm1, %v2348_v37 }
 0x59b   :  { %2324 = vmatmul.msk.bf16.gmra.mxu1 %vm187_vm1, %v2348_v37 }
 0x59c   :  { %2340 = vmatmul.msk.bf16.gmra.mxu0 %vm187_vm1, %v2348_v37 }
 0x5a5   :  { %2333 = vmatmul.msk.bf16.gmra.mxu3 %vm187_vm1, %v2349_v22 }
 0x5ab   :  { %2325 = vmatmul.msk.bf16.gmra.mxu1 %vm187_vm1, %v2349_v22 }
 0x5ac   :  { %2341 = vmatmul.msk.bf16.gmra.mxu0 %vm187_vm1, %v2349_v22 }
 0x5b5   :  { %2334 = vmatmul.msk.bf16.gmra.mxu3 %vm187_vm1, %v2350_v6 }
 0x5bb   :  { %2326 = vmatmul.msk.bf16.gmra.mxu1 %vm187_vm1, %v2350_v6 }
 0x5bc   :  { %2342 = vmatmul.msk.bf16.gmra.mxu0 %vm187_vm1, %v2350_v6 }
 0x5c5   :  { %2335 = vmatmul.msk.bf16.gmra.mxu3 %vm187_vm1, %v2351_v11 }
 0x5cb   :  { %2327 = vmatmul.msk.bf16.gmra.mxu1 %vm187_vm1, %v2351_v11 }
 0x5cc   :  { %2343 = vmatmul.msk.bf16.gmra.mxu0 %vm187_vm1, %v2351_v11 }
 0x5d5   :  { %2336 = vmatmul.msk.bf16.gmra.mxu3 %vm187_vm1, %v2352_v16 }
 0x5db   :  { %2328 = vmatmul.msk.bf16.gmra.mxu1 %vm187_vm1, %v2352_v16 }
 0x5dc   :  { %2344 = vmatmul.msk.bf16.gmra.mxu0 %vm187_vm1, %v2352_v16 }
 0x5e5   :  { %2337 = vmatmul.msk.bf16.gmra.mxu3 %vm187_vm1, %v2353_v58 }
 0x5eb   :  { %2329 = vmatmul.msk.bf16.gmra.mxu1 %vm187_vm1, %v2353_v58 }
 0x5ec   :  { %2345 = vmatmul.msk.bf16.gmra.mxu0 %vm187_vm1, %v2353_v58 }
 0x5f5   :  { %2338 = vmatmul.msk.bf16.gmra.mxu3 %vm187_vm1, %v2354_v0 }
 0x5fb   :  { %2330 = vmatmul.msk.bf16.gmra.mxu1 %vm187_vm1, %v2354_v0 }
 0x5fc   :  { %2346 = vmatmul.msk.bf16.gmra.mxu0 %vm187_vm1, %v2354_v0 }
 0x608   :  { %v2012_v14 = vpop.f32.mrf.mxu1  ;;  %v2061_v18 = vpop.f32.mrf.mxu3 }
 0x609   :  { %2150 = vst [vmem:[%s4301_s14] sm:$0xff] %v2012_v14  ;;  %v2110_v42 = vpop.f32.mrf.mxu0 }
 0x60a   :  { %2151 = vst [vmem:[%s4301_s14 + $0x8] sm:$0xff] %v2061_v18 }
 0x60b   :  { %2152 = vst [vmem:[%s4301_s14 + $0x10] sm:$0xff] %v2110_v42 }
 0x610   :  { %v2014_v27 = vpop.f32.mrf.mxu1  ;;  %v2063_v13 = vpop.f32.mrf.mxu3 }
 0x611   :  { %2153 = vst [vmem:[%s4301_s14 + $0x18] sm:$0xff] %v2014_v27  ;;  %v2112_v12 = vpop.f32.mrf.mxu0 }
 0x612   :  { %2154 = vst [vmem:[%s4301_s14 + $0x20] sm:$0xff] %v2063_v13 }
 0x613   :  { %2155 = vst [vmem:[%s4301_s14 + $0x28] sm:$0xff] %v2112_v12 }
 0x618   :  { %v2017_v33 = vpop.f32.mrf.mxu1  ;;  %v2066_v45 = vpop.f32.mrf.mxu3 }
 0x619   :  { %2156 = vst [vmem:[%s4301_s14 + $0x30] sm:$0xff] %v2017_v33  ;;  %v2115_v47 = vpop.f32.mrf.mxu0 }
 0x61a   :  { %2157 = vst [vmem:[%s4301_s14 + $0x38] sm:$0xff] %v2066_v45 }
 0x61b   :  { %2158 = vst [vmem:[%s4301_s14 + $0x40] sm:$0xff] %v2115_v47 }
 0x620   :  { %v2019_v32 = vpop.f32.mrf.mxu1  ;;  %v2068_v30 = vpop.f32.mrf.mxu3 }
 0x621   :  { %2159 = vst [vmem:[%s4301_s14 + $0x48] sm:$0xff] %v2019_v32  ;;  %v2117_v10 = vpop.f32.mrf.mxu0 }
 0x622   :  { %2160 = vst [vmem:[%s4301_s14 + $0x50] sm:$0xff] %v2068_v30 }
 0x623   :  { %2161 = vst [vmem:[%s4301_s14 + $0x58] sm:$0xff] %v2117_v10 }
 0x628   :  { %v2022_v57 = vpop.f32.mrf.mxu1  ;;  %v2071_v55 = vpop.f32.mrf.mxu3 }
 0x629   :  { %2162 = vst [vmem:[%s4301_s14 + $0x60] sm:$0xff] %v2022_v57  ;;  %v2120_v1 = vpop.f32.mrf.mxu0 }
 0x62a   :  { %2163 = vst [vmem:[%s4301_s14 + $0x68] sm:$0xff] %v2071_v55 }
 0x62b   :  { %2164 = vst [vmem:[%s4301_s14 + $0x70] sm:$0xff] %v2120_v1 }
 0x630   :  { %v2024_v2 = vpop.f32.mrf.mxu1  ;;  %v2073_v4 = vpop.f32.mrf.mxu3 }
 0x631   :  { %2165 = vst [vmem:[%s4301_s14 + $0x78] sm:$0xff] %v2024_v2  ;;  %v2122_v26 = vpop.f32.mrf.mxu0 }
 0x632   :  { %2166 = vst [vmem:[%s4301_s14 + $0x80] sm:$0xff] %v2073_v4 }
 0x633   :  { %2167 = vst [vmem:[%s4301_s14 + $0x88] sm:$0xff] %v2122_v26 }
 0x638   :  { %v2027_v60 = vpop.f32.mrf.mxu1  ;;  %v2076_v29 = vpop.f32.mrf.mxu3 }
 0x639   :  { %2168 = vst [vmem:[%s4301_s14 + $0x90] sm:$0xff] %v2027_v60  ;;  %v2125_v63 = vpop.f32.mrf.mxu0 }
 0x63a   :  { %2169 = vst [vmem:[%s4301_s14 + $0x98] sm:$0xff] %v2076_v29 }
 0x63b   :  { %2170 = vst [vmem:[%s4301_s14 + $0xa0] sm:$0xff] %v2125_v63 }
 0x640   :  { %v2029_v24 = vpop.f32.mrf.mxu1  ;;  %v2078_v25 = vpop.f32.mrf.mxu3 }
 0x641   :  { %2171 = vst [vmem:[%s4301_s14 + $0xa8] sm:$0xff] %v2029_v24  ;;  %v2127_v51 = vpop.f32.mrf.mxu0 }
 0x642   :  { %2172 = vst [vmem:[%s4301_s14 + $0xb0] sm:$0xff] %v2078_v25 }
 0x643   :  { %2173 = vst [vmem:[%s4301_s14 + $0xb8] sm:$0xff] %v2127_v51 }
 0x648   :  { %v2032_v23 = vpop.f32.mrf.mxu1  ;;  %v2081_v17 = vpop.f32.mrf.mxu3 }
 0x649   :  { %2174 = vst [vmem:[%s4301_s14 + $0xc0] sm:$0xff] %v2032_v23  ;;  %v2130_v34 = vpop.f32.mrf.mxu0 }
 0x64a   :  { %2175 = vst [vmem:[%s4301_s14 + $0xc8] sm:$0xff] %v2081_v17 }
 0x64b   :  { %2176 = vst [vmem:[%s4301_s14 + $0xd0] sm:$0xff] %v2130_v34 }
 0x650   :  { %v2034_v40 = vpop.f32.mrf.mxu1  ;;  %v2083_v39 = vpop.f32.mrf.mxu3 }
 0x651   :  { %2177 = vst [vmem:[%s4301_s14 + $0xd8] sm:$0xff] %v2034_v40  ;;  %v2132_v59 = vpop.f32.mrf.mxu0 }
 0x652   :  { %2178 = vst [vmem:[%s4301_s14 + $0xe0] sm:$0xff] %v2083_v39 }
 0x653   :  { %2179 = vst [vmem:[%s4301_s14 + $0xe8] sm:$0xff] %v2132_v59 }
 0x658   :  { %v2037_v15 = vpop.f32.mrf.mxu1  ;;  %v2086_v19 = vpop.f32.mrf.mxu3 }
 0x659   :  { %2180 = vst [vmem:[%s4301_s14 + $0xf0] sm:$0xff] %v2037_v15  ;;  %v2135_v46 = vpop.f32.mrf.mxu0 }
 0x65a   :  { %2181 = vst [vmem:[%s4301_s14 + $0xf8] sm:$0xff] %v2086_v19 }
 0x65b   :  { %2182 = vst [vmem:[%s4301_s14 + $0x100] sm:$0xff] %v2135_v46 }
 0x660   :  { %v2039_v44 = vpop.f32.mrf.mxu1  ;;  %v2088_v48 = vpop.f32.mrf.mxu3 }
 0x661   :  { %2183 = vst [vmem:[%s4301_s14 + $0x108] sm:$0xff] %v2039_v44  ;;  %v2137_v31 = vpop.f32.mrf.mxu0 }
 0x662   :  { %2184 = vst [vmem:[%s4301_s14 + $0x110] sm:$0xff] %v2088_v48 }
 0x663   :  { %2185 = vst [vmem:[%s4301_s14 + $0x118] sm:$0xff] %v2137_v31 }
 0x668   :  { %v2042_v41 = vpop.f32.mrf.mxu1  ;;  %v2091_v5 = vpop.f32.mrf.mxu3 }
 0x669   :  { %2186 = vst [vmem:[%s4301_s14 + $0x120] sm:$0xff] %v2042_v41  ;;  %v2140_v38 = vpop.f32.mrf.mxu0 }
 0x66a   :  { %2187 = vst [vmem:[%s4301_s14 + $0x128] sm:$0xff] %v2091_v5 }
 0x66b   :  { %2188 = vst [vmem:[%s4301_s14 + $0x130] sm:$0xff] %v2140_v38 }
 0x670   :  { %v2044_v36 = vpop.f32.mrf.mxu1  ;;  %v2093_v54 = vpop.f32.mrf.mxu3 }
 0x671   :  { %2189 = vst [vmem:[%s4301_s14 + $0x138] sm:$0xff] %v2044_v36  ;;  %v2142_v8 = vpop.f32.mrf.mxu0 }
 0x672   :  { %2190 = vst [vmem:[%s4301_s14 + $0x140] sm:$0xff] %v2093_v54 }
 0x673   :  { %2191 = vst [vmem:[%s4301_s14 + $0x148] sm:$0xff] %v2142_v8 }
 0x678   :  { %v2047_v62 = vpop.f32.mrf.mxu1  ;;  %v2096_v3 = vpop.f32.mrf.mxu3 }
 0x679   :  { %2192 = vst [vmem:[%s4301_s14 + $0x150] sm:$0xff] %v2047_v62  ;;  %v2145_v61 = vpop.f32.mrf.mxu0 }
 0x67a   :  { %2193 = vst [vmem:[%s4301_s14 + $0x158] sm:$0xff] %v2096_v3 }
 0x67b   :  { %2194 = vst [vmem:[%s4301_s14 + $0x160] sm:$0xff] %v2145_v61 }
 0x680   :  { %v2049_v28 = vpop.f32.mrf.mxu1  ;;  %v2098_v35 = vpop.f32.mrf.mxu3 }
 0x681   :  { %2195 = vst [vmem:[%s4301_s14 + $0x168] sm:$0xff] %v2049_v28  ;;  %v2147_v9 = vpop.f32.mrf.mxu0 }
 0x682   :  { %2196 = vst [vmem:[%s4301_s14 + $0x170] sm:$0xff] %v2098_v35 }
 0x683   :  { %2197 = vst [vmem:[%s4301_s14 + $0x178] sm:$0xff] %v2147_v9 }
 0x684   :  { %2202 = vsyncpa [#allocation4], 1 }

</bundles_post_ra>
